<compile_context>
chip_gen: v7x
topology: tpu7x:2x2x1
jax: 0.10.0
libtpu: 0.0.40
codegen_flags: <defaults>
</compile_context>

<pallas_src>
import functools

import jax
import jax.numpy as jnp
from jax.experimental import pallas as pl
from jax.experimental.pallas import tpu as pltpu


_C1, _C2 = 8, 16          # branch channel counts
_NUM_CLASSES = 5


def _out_len(L, k, s, p):
    return (L + 2 * p - k) // s + 1


def _branch_cfgs(shhs):
    # conv tuple = (Cout, Cin, K, stride, pad); pool tuple = (K, stride, pad)
    b1 = dict(conv1=(_C1, 1, 50, 6, 24), pool1=(8, 2, 4),
              conv2=(_C2, _C1, 8, 1, 4), conv3=(_C2, _C2, 8, 1, 4), pool2=(4, 4, 2))
    if not shhs:
        b2 = dict(conv1=(_C1, 1, 100, 12, 50), pool1=(4, 2, 2),
                  conv2=(_C2, _C1, 7, 1, 3), conv3=(_C2, _C2, 7, 1, 3), pool2=(2, 2, 1))
    else:
        b2 = dict(conv1=(_C1, 1, 80, 10, 40), pool1=(4, 2, 2),
                  conv2=(_C2, _C1, 7, 1, 3), conv3=(_C2, _C2, 7, 1, 3), pool2=(4, 4, 2))
    return b1, b2


def _branch_dims(L, cfg):
    _, _, k, s, p = cfg["conv1"]; L1 = _out_len(L, k, s, p)
    Lp1 = _out_len(L1, *cfg["pool1"])
    _, _, k, s, p = cfg["conv2"]; L2 = _out_len(Lp1, k, s, p)
    _, _, k, s, p = cfg["conv3"]; L3 = _out_len(L2, k, s, p)
    Lp2 = _out_len(L3, *cfg["pool2"])
    return dict(L1=L1, Lp1=Lp1, L2=L2, L3=L3, Lp2=Lp2)


# ---------------------------------------------------------------------------
# In-kernel building blocks (trace-time helpers, all data VMEM-resident)
# ---------------------------------------------------------------------------
def _gelu(x):
    return jax.nn.gelu(x, approximate=True)


def _ds(start, size, stride):
    return pl.ds(start, size) if stride == 1 else pl.ds(start, size, stride)


def _maxpool_resident(buf_ref, h, k, s, p):
    """PyTorch MaxPool1d over rows of h:(L,C) via a -inf padded VMEM scratch."""
    L, _ = h.shape
    Lout = _out_len(L, k, s, p)
    buf_ref[...] = jnp.full(buf_ref.shape, -jnp.inf, dtype=buf_ref.dtype)
    buf_ref[pl.ds(p, L), :] = h
    out = buf_ref[_ds(0, Lout, s), :]
    for j in range(1, k):
        out = jnp.maximum(out, buf_ref[_ds(j, Lout, s), :])
    return out


def _conv_bn_gelu_resident(buf_ref, h, w_ref, b_ref, k, p):
    """stride-1 Conv1d(+folded BN)+GELU over rows of h:(L,Cin), shift-and-matmul."""
    L, _ = h.shape
    Lout = _out_len(L, k, 1, p)
    buf_ref[...] = jnp.zeros(buf_ref.shape, dtype=buf_ref.dtype)
    buf_ref[pl.ds(p, L), :] = h
    acc = jnp.dot(buf_ref[pl.ds(0, Lout), :], w_ref[0],
                  preferred_element_type=jnp.float32)
    for j in range(1, k):
        acc = acc + jnp.dot(buf_ref[pl.ds(j, Lout), :], w_ref[j],
                            preferred_element_type=jnp.float32)
    return _gelu(acc + b_ref[...])


# ---------------------------------------------------------------------------
# The fused forward kernel
# ---------------------------------------------------------------------------
def _fused_forward_kernel(
        p1_ref, p2_ref,
        w11_ref, b11_ref, w12_ref, b12_ref, w13_ref, b13_ref,
        w21_ref, b21_ref, w22_ref, b22_ref, w23_ref, b23_ref,
        wh1_ref, wh2_ref, bh_ref,
        out_ref,
        s1_pool1, s1_conv2, s1_conv3, s1_pool2,
        s2_pool1, s2_conv2, s2_conv3, s2_pool2,
        *, batch, cfg1, cfg2):

    def branch(b, p_ref, w1, b1, w2, b2, w3, b3, bufs, cfg):
        # conv1 (input im2col'ed outside) + folded BN + GELU
        h = _gelu(jnp.dot(p_ref[b], w1[...], preferred_element_type=jnp.float32)
                  + b1[...])
        h = _maxpool_resident(bufs[0], h, *cfg["pool1"])
        # Dropout(0.5): identity in eval mode.
        h = _conv_bn_gelu_resident(bufs[1], h, w2, b2, cfg["conv2"][2], cfg["conv2"][4])
        h = _conv_bn_gelu_resident(bufs[2], h, w3, b3, cfg["conv3"][2], cfg["conv3"][4])
        h = _maxpool_resident(bufs[3], h, *cfg["pool2"])
        return h  # (T, C2), time on sublanes / channels on lanes

    lane_ids = jax.lax.broadcasted_iota(jnp.int32, (1, _NUM_CLASSES), 1)

    for b in range(batch):
        o1 = branch(b, p1_ref, w11_ref, b11_ref, w12_ref, b12_ref, w13_ref, b13_ref,
                    (s1_pool1, s1_conv2, s1_conv3, s1_pool2), cfg1)
        o2 = branch(b, p2_ref, w21_ref, b21_ref, w22_ref, b22_ref, w23_ref, b23_ref,
                    (s2_pool1, s2_conv2, s2_conv3, s2_pool2), cfg2)

        # Linear head: logits[n] = <o1, wh1[n]> + <o2, wh2[n]> + bias[n]
        # (head weight rows were pre-permuted to the kernel (T, C) layout, so the
        #  torch concat+flatten ordering is absorbed by the weight permutation).
        row = bh_ref[...]                                    # (1, 5)
        for n in range(_NUM_CLASSES):
            v = jnp.sum(jnp.sum(o1 * wh1_ref[n], axis=1, keepdims=True),
                        axis=0, keepdims=True)
            v = v + jnp.sum(jnp.sum(o2 * wh2_ref[n], axis=1, keepdims=True),
                            axis=0, keepdims=True)           # (1, 1)
            row = row + v * (lane_ids == n).astype(jnp.float32)
        out_ref[pl.ds(b, 1), :] = row


def _build_fused_call(cfg, dims1, dims2, batch, dtype=jnp.float32):
    cfg1, cfg2 = cfg["b1"], cfg["b2"]
    assert cfg1["conv2"][3] == 1 and cfg1["conv3"][3] == 1
    assert cfg2["conv2"][3] == 1 and cfg2["conv3"][3] == 1

    def scratch_for(cfg_b, d):
        return [
            pltpu.VMEM((d["L1"] + 2 * cfg_b["pool1"][2], _C1), dtype),   # pool1 pad buf
            pltpu.VMEM((d["Lp1"] + 2 * cfg_b["conv2"][4], _C1), dtype),  # conv2 pad buf
            pltpu.VMEM((d["L2"] + 2 * cfg_b["conv3"][4], _C2), dtype),   # conv3 pad buf
            pltpu.VMEM((d["L3"] + 2 * cfg_b["pool2"][2], _C2), dtype),   # pool2 pad buf
        ]

    scratch = scratch_for(cfg1, dims1) + scratch_for(cfg2, dims2)
    kernel = functools.partial(_fused_forward_kernel, batch=batch, cfg1=cfg1, cfg2=cfg2)

    vmem_spec = pl.BlockSpec(memory_space=pltpu.MemorySpace.VMEM)
    n_inputs = 17
    return pl.pallas_call(
        kernel,
        out_shape=jax.ShapeDtypeStruct((batch, _NUM_CLASSES), dtype),
        in_specs=[vmem_spec] * n_inputs,
        out_specs=vmem_spec,
        scratch_shapes=scratch,
    )


# ---------------------------------------------------------------------------
# Parameter construction / one-time weight reformatting (BN folding, layouts)
# ---------------------------------------------------------------------------
def _bn_fold(gamma, beta, mean, var, eps=1e-5):
    scale = gamma / jnp.sqrt(var + eps)
    shift = beta - mean * scale
    return scale, shift


def _init_conv(key, cout, cin, k):
    w = jax.random.normal(key, (cout, cin, k), jnp.float32) * 0.05
    # BatchNorm1d eval-mode fresh-init running stats
    return dict(w=w,
                gamma=jnp.ones((cout,), jnp.float32),
                beta=jnp.zeros((cout,), jnp.float32),
                mean=jnp.zeros((cout,), jnp.float32),
                var=jnp.ones((cout,), jnp.float32))


def _fold_conv1(layer):
    scale, shift = _bn_fold(layer["gamma"], layer["beta"], layer["mean"], layer["var"])
    wm = layer["w"][:, 0, :].T * scale[None, :]                 # (K, Cout)
    return wm, shift.reshape(1, -1)


def _fold_conv_taps(layer):
    scale, shift = _bn_fold(layer["gamma"], layer["beta"], layer["mean"], layer["var"])
    taps = jnp.transpose(layer["w"], (2, 1, 0)) * scale[None, None, :]  # (K, Cin, Cout)
    return taps, shift.reshape(1, -1)


def prepare_kernel_params(raw, t1, t2):
    kp = {}
    kp["w11"], kp["b11"] = _fold_conv1(raw["b1"]["conv1"])
    kp["w12"], kp["b12"] = _fold_conv_taps(raw["b1"]["conv2"])
    kp["w13"], kp["b13"] = _fold_conv_taps(raw["b1"]["conv3"])
    kp["w21"], kp["b21"] = _fold_conv1(raw["b2"]["conv1"])
    kp["w22"], kp["b22"] = _fold_conv_taps(raw["b2"]["conv2"])
    kp["w23"], kp["b23"] = _fold_conv_taps(raw["b2"]["conv3"])
    # Head: torch flatten index = c*(T1+T2) + t_concat.  Pre-permute rows to the
    # kernel's (T, C) layout: wh[n, t, c] = lin_w[c*Ttot + t, n].
    ttot = t1 + t2
    wh = jnp.transpose(raw["lin_w"].reshape(_C2, ttot, _NUM_CLASSES), (2, 1, 0))
    kp["wh1"] = wh[:, :t1, :]
    kp["wh2"] = wh[:, t1:, :]
    kp["bh"] = raw["lin_b"].reshape(1, -1)
    return kp


def init_model(key, input_len, shhs=False):
    cfg1, cfg2 = _branch_cfgs(shhs)
    cfg = dict(b1=cfg1, b2=cfg2)
    keys = jax.random.split(key, 8)
    raw = {
        "b1": {n: _init_conv(keys[i], *cfg1[n][:3])
               for i, n in enumerate(("conv1", "conv2", "conv3"))},
        "b2": {n: _init_conv(keys[3 + i], *cfg2[n][:3])
               for i, n in enumerate(("conv1", "conv2", "conv3"))},
    }
    d1, d2 = _branch_dims(input_len, cfg1), _branch_dims(input_len, cfg2)
    t1, t2 = d1["Lp2"], d2["Lp2"]
    in_features = _C2 * (t1 + t2)
    raw["lin_w"] = jax.random.normal(keys[6], (in_features, _NUM_CLASSES), jnp.float32) * 0.02
    raw["lin_b"] = jax.random.normal(keys[7], (_NUM_CLASSES,), jnp.float32) * 0.02
    params = dict(raw=raw, kernel=prepare_kernel_params(raw, t1, t2))
    return params, cfg


# ---------------------------------------------------------------------------
# Forward
# ---------------------------------------------------------------------------
def _im2col_input(x, conv_cfg):
    """Strided im2col of the raw (B,1,L) input for the stride>1 first conv."""
    _, _, k, s, p = conv_cfg
    B, Cin, L = x.shape
    assert Cin == 1
    xp = jnp.pad(x[:, 0, :], ((0, 0), (p, p)))
    Lout = _out_len(L, k, s, p)
    idx = jnp.arange(Lout)[:, None] * s + jnp.arange(k)[None, :]
    return xp[:, idx]                                        # (B, Lout, K)


def model_grey_forward(params, x, *, cfg):
    """x: (B, 1, L) float32 -> logits (B, 5)."""
    B, _, L = x.shape
    dims1 = _branch_dims(L, cfg["b1"])
    dims2 = _branch_dims(L, cfg["b2"])

    p1 = _im2col_input(x, cfg["b1"]["conv1"])
    p2 = _im2col_input(x, cfg["b2"]["conv1"])

    kp = params["kernel"]
    call = _build_fused_call(cfg, dims1, dims2, B)
    return call(
        p1, p2,
        kp["w11"], kp["b11"], kp["w12"], kp["b12"], kp["w13"], kp["b13"],
        kp["w21"], kp["b21"], kp["w22"], kp["b22"], kp["w23"], kp["b23"],
        kp["wh1"], kp["wh2"], kp["bh"],
    )


# ---------------------------------------------------------------------------
# Pure-JAX reference (eval-mode semantics) for a numerical self-check
# ---------------------------------------------------------------------------
def _reference_forward(params, x, cfg):
    raw = params["raw"]

    def conv_bn_gelu(h, layer, k, s, p):
        B, Cin, L = h.shape
        scale, shift = _bn_fold(layer["gamma"], layer["beta"],
                                layer["mean"], layer["var"])
        hp = jnp.pad(h, ((0, 0), (0, 0), (p, p)))
        Lout = _out_len(L, k, s, p)
        idx = jnp.arange(Lout)[:, None] * s + jnp.arange(k)[None, :]
        patches = hp[:, :, idx].transpose(0, 2, 1, 3).reshape(B, Lout, Cin * k)
        wm = layer["w"].reshape(layer["w"].shape[0], Cin * k).T * scale[None, :]
        y = jnp.dot(patches, wm, precision=jax.lax.Precision.HIGHEST) + shift
        return _gelu(y).transpose(0, 2, 1)                   # (B, Cout, Lout)

    def maxpool(h, k, s, p):
        hp = jnp.pad(h, ((0, 0), (0, 0), (p, p)), constant_values=-jnp.inf)
        Lout = _out_len(h.shape[-1], k, s, p)
        idx = jnp.arange(Lout)[:, None] * s + jnp.arange(k)[None, :]
        return hp[:, :, idx].max(axis=-1)

    def branch(h, p, c):
        h = conv_bn_gelu(h, p["conv1"], *c["conv1"][2:])
        h = maxpool(h, *c["pool1"])
        h = conv_bn_gelu(h, p["conv2"], *c["conv2"][2:])
        h = conv_bn_gelu(h, p["conv3"], *c["conv3"][2:])
        h = maxpool(h, *c["pool2"])
        return h

    x1 = branch(x, raw["b1"], cfg["b1"])
    x2 = branch(x, raw["b2"], cfg["b2"])
    flat = jnp.concatenate([x1, x2], axis=2).reshape(x.shape[0], -1)
    return jnp.dot(flat, raw["lin_w"],
                   precision=jax.lax.Precision.HIGHEST) + raw["lin_b"]


if __name__ == "__main__":
    key = jax.random.PRNGKey(0)
    kx, kparam = jax.random.split(key)

    B, Cin, L = 2, 1, 300
    shhs = False

    x = jax.random.normal(kx, (B, Cin, L), jnp.float32)
    params, cfg = init_model(kparam, L, shhs)

    fwd = jax.jit(functools.partial(model_grey_forward, cfg=cfg))
    y = fwd(params, x)
    jax.block_until_ready(y)

    assert y.shape == (B, _NUM_CLASSES), y.shape
    assert bool(jnp.all(jnp.isfinite(y)))

    y_ref = _reference_forward(params, x, cfg)
    assert bool(jnp.allclose(y, y_ref, atol=5e-3, rtol=5e-2)), (y, y_ref)

    print("KERNEL_OK")
</pallas_src>

<mosaic_0001>
module attributes {stable_mosaic.version = 11 : i64} {
  func.func @_fused_forward_kernel(%arg0: memref<2x50x50xf32, #tpu.memory_space<vmem>>, %arg1: memref<2x26x100xf32, #tpu.memory_space<vmem>>, %arg2: memref<50x8xf32, #tpu.memory_space<vmem>>, %arg3: memref<1x8xf32, #tpu.memory_space<vmem>>, %arg4: memref<8x8x16xf32, #tpu.memory_space<vmem>>, %arg5: memref<1x16xf32, #tpu.memory_space<vmem>>, %arg6: memref<8x16x16xf32, #tpu.memory_space<vmem>>, %arg7: memref<1x16xf32, #tpu.memory_space<vmem>>, %arg8: memref<100x8xf32, #tpu.memory_space<vmem>>, %arg9: memref<1x8xf32, #tpu.memory_space<vmem>>, %arg10: memref<7x8x16xf32, #tpu.memory_space<vmem>>, %arg11: memref<1x16xf32, #tpu.memory_space<vmem>>, %arg12: memref<7x16x16xf32, #tpu.memory_space<vmem>>, %arg13: memref<1x16xf32, #tpu.memory_space<vmem>>, %arg14: memref<5x8x16xf32, #tpu.memory_space<vmem>>, %arg15: memref<5x8x16xf32, #tpu.memory_space<vmem>>, %arg16: memref<1x5xf32, #tpu.memory_space<vmem>>, %arg17: memref<2x5xf32, #tpu.memory_space<vmem>>, %arg18: memref<58x8xf32, #tpu.memory_space<vmem>>, %arg19: memref<34x8xf32, #tpu.memory_space<vmem>>, %arg20: memref<35x16xf32, #tpu.memory_space<vmem>>, %arg21: memref<32x16xf32, #tpu.memory_space<vmem>>, %arg22: memref<30x8xf32, #tpu.memory_space<vmem>>, %arg23: memref<20x8xf32, #tpu.memory_space<vmem>>, %arg24: memref<20x16xf32, #tpu.memory_space<vmem>>, %arg25: memref<16x16xf32, #tpu.memory_space<vmem>>) attributes {dimension_semantics = [], scalar_prefetch = 0 : i64, scratch_operands = 8 : i64, tpu.core_type = #tpu.core_type<tc>} {
    %0 = tpu.iota {dimensions = array<i32: 1>} : vector<1x5xi32>
    %c0 = arith.constant 0 : index
    %c0_0 = arith.constant 0 : index
    %c0_1 = arith.constant 0 : index
    %1 = vector.load %arg0[%c0, %c0_0, %c0_1] : memref<2x50x50xf32, #tpu.memory_space<vmem>>, vector<1x50x50xf32>
    %2 = vector.shape_cast %1 : vector<1x50x50xf32> to vector<50x50xf32>
    %c0_2 = arith.constant 0 : index
    %c0_3 = arith.constant 0 : index
    %3 = vector.load %arg2[%c0_2, %c0_3] : memref<50x8xf32, #tpu.memory_space<vmem>>, vector<50x8xf32>
    %cst = arith.constant dense<0.000000e+00> : vector<50x8xf32>
    %4 = tpu.matmul %2, %3, %cst {dimension_numbers = #tpu.dot_dimension_numbers<[1], [0], [0], [1], [0, 0, 1, 1], [], []>} : vector<50x50xf32>, vector<50x8xf32>, vector<50x8xf32> -> vector<50x8xf32>
    %c0_4 = arith.constant 0 : index
    %c0_5 = arith.constant 0 : index
    %5 = vector.load %arg3[%c0_4, %c0_5] : memref<1x8xf32, #tpu.memory_space<vmem>>, vector<1x8xf32>
    %6 = vector.broadcast %5 : vector<1x8xf32> to vector<50x8xf32>
    %7 = arith.addf %4, %6 : vector<50x8xf32>
    %8 = arith.mulf %7, %7 : vector<50x8xf32>
    %9 = arith.mulf %7, %8 : vector<50x8xf32>
    %cst_6 = arith.constant 4.471500e-02 : f32
    %10 = vector.broadcast %cst_6 : f32 to vector<50x8xf32>
    %11 = arith.mulf %10, %9 : vector<50x8xf32>
    %12 = arith.addf %7, %11 : vector<50x8xf32>
    %cst_7 = arith.constant 0.797884583 : f32
    %13 = vector.broadcast %cst_7 : f32 to vector<50x8xf32>
    %14 = arith.mulf %13, %12 : vector<50x8xf32>
    %15 = math.tanh %14 : vector<50x8xf32>
    %cst_8 = arith.constant 1.000000e+00 : f32
    %16 = vector.broadcast %cst_8 : f32 to vector<50x8xf32>
    %17 = arith.addf %16, %15 : vector<50x8xf32>
    %cst_9 = arith.constant 5.000000e-01 : f32
    %18 = vector.broadcast %cst_9 : f32 to vector<50x8xf32>
    %19 = arith.mulf %18, %17 : vector<50x8xf32>
    %20 = arith.mulf %7, %19 : vector<50x8xf32>
    %cst_10 = arith.constant 0xFF800000 : f32
    %21 = vector.broadcast %cst_10 : f32 to vector<58x8xf32>
    %c0_11 = arith.constant 0 : index
    %c0_12 = arith.constant 0 : index
    %22 = vector.load %arg18[%c0_11, %c0_12] : memref<58x8xf32, #tpu.memory_space<vmem>>, vector<58x8xf32>
    tpu.vector_store %arg18[%c0_11, %c0_12], %21 {strides = array<i32>} : memref<58x8xf32, #tpu.memory_space<vmem>>, vector<58x8xf32>,
    %c4 = arith.constant 4 : index
    %c0_13 = arith.constant 0 : index
    %23 = vector.load %arg18[%c4, %c0_13] : memref<58x8xf32, #tpu.memory_space<vmem>>, vector<50x8xf32>
    tpu.vector_store %arg18[%c4, %c0_13], %20 {strides = array<i32>} : memref<58x8xf32, #tpu.memory_space<vmem>>, vector<50x8xf32>,
    %c0_14 = arith.constant 0 : index
    %c0_15 = arith.constant 0 : index
    %24 = tpu.strided_load %arg18[%c0_14, %c0_15] {strides = array<i32: 2, 1>} : memref<58x8xf32, #tpu.memory_space<vmem>>, vector<26x8xf32>
    %c1 = arith.constant 1 : index
    %c0_16 = arith.constant 0 : index
    %25 = tpu.strided_load %arg18[%c1, %c0_16] {strides = array<i32: 2, 1>} : memref<58x8xf32, #tpu.memory_space<vmem>>, vector<26x8xf32>
    %26 = arith.maximumf %24, %25 : vector<26x8xf32>
    %c2 = arith.constant 2 : index
    %c0_17 = arith.constant 0 : index
    %27 = tpu.strided_load %arg18[%c2, %c0_17] {strides = array<i32: 2, 1>} : memref<58x8xf32, #tpu.memory_space<vmem>>, vector<26x8xf32>
    %28 = arith.maximumf %26, %27 : vector<26x8xf32>
    %c3 = arith.constant 3 : index
    %c0_18 = arith.constant 0 : index
    %29 = tpu.strided_load %arg18[%c3, %c0_18] {strides = array<i32: 2, 1>} : memref<58x8xf32, #tpu.memory_space<vmem>>, vector<26x8xf32>
    %30 = arith.maximumf %28, %29 : vector<26x8xf32>
    %c4_19 = arith.constant 4 : index
    %c0_20 = arith.constant 0 : index
    %31 = tpu.strided_load %arg18[%c4_19, %c0_20] {strides = array<i32: 2, 1>} : memref<58x8xf32, #tpu.memory_space<vmem>>, vector<26x8xf32>
    %32 = arith.maximumf %30, %31 : vector<26x8xf32>
    %c5 = arith.constant 5 : index
    %c0_21 = arith.constant 0 : index
    %33 = tpu.strided_load %arg18[%c5, %c0_21] {strides = array<i32: 2, 1>} : memref<58x8xf32, #tpu.memory_space<vmem>>, vector<26x8xf32>
    %34 = arith.maximumf %32, %33 : vector<26x8xf32>
    %c6 = arith.constant 6 : index
    %c0_22 = arith.constant 0 : index
    %35 = tpu.strided_load %arg18[%c6, %c0_22] {strides = array<i32: 2, 1>} : memref<58x8xf32, #tpu.memory_space<vmem>>, vector<26x8xf32>
    %36 = arith.maximumf %34, %35 : vector<26x8xf32>
    %c7 = arith.constant 7 : index
    %c0_23 = arith.constant 0 : index
    %37 = tpu.strided_load %arg18[%c7, %c0_23] {strides = array<i32: 2, 1>} : memref<58x8xf32, #tpu.memory_space<vmem>>, vector<26x8xf32>
    %38 = arith.maximumf %36, %37 : vector<26x8xf32>
    %cst_24 = arith.constant 0.000000e+00 : f32
    %39 = vector.broadcast %cst_24 : f32 to vector<34x8xf32>
    %c0_25 = arith.constant 0 : index
    %c0_26 = arith.constant 0 : index
    %40 = vector.load %arg19[%c0_25, %c0_26] : memref<34x8xf32, #tpu.memory_space<vmem>>, vector<34x8xf32>
    tpu.vector_store %arg19[%c0_25, %c0_26], %39 {strides = array<i32>} : memref<34x8xf32, #tpu.memory_space<vmem>>, vector<34x8xf32>,
    %c4_27 = arith.constant 4 : index
    %c0_28 = arith.constant 0 : index
    %41 = vector.load %arg19[%c4_27, %c0_28] : memref<34x8xf32, #tpu.memory_space<vmem>>, vector<26x8xf32>
    tpu.vector_store %arg19[%c4_27, %c0_28], %38 {strides = array<i32>} : memref<34x8xf32, #tpu.memory_space<vmem>>, vector<26x8xf32>,
    %c0_29 = arith.constant 0 : index
    %c0_30 = arith.constant 0 : index
    %42 = vector.load %arg19[%c0_29, %c0_30] : memref<34x8xf32, #tpu.memory_space<vmem>>, vector<27x8xf32>
    %c0_31 = arith.constant 0 : index
    %c0_32 = arith.constant 0 : index
    %c0_33 = arith.constant 0 : index
    %43 = vector.load %arg4[%c0_31, %c0_32, %c0_33] : memref<8x8x16xf32, #tpu.memory_space<vmem>>, vector<1x8x16xf32>
    %44 = vector.shape_cast %43 : vector<1x8x16xf32> to vector<8x16xf32>
    %cst_34 = arith.constant dense<0.000000e+00> : vector<27x16xf32>
    %45 = tpu.matmul %42, %44, %cst_34 {dimension_numbers = #tpu.dot_dimension_numbers<[1], [0], [0], [1], [0, 0, 1, 1], [], []>} : vector<27x8xf32>, vector<8x16xf32>, vector<27x16xf32> -> vector<27x16xf32>
    %c1_35 = arith.constant 1 : index
    %c0_36 = arith.constant 0 : index
    %46 = vector.load %arg19[%c1_35, %c0_36] : memref<34x8xf32, #tpu.memory_space<vmem>>, vector<27x8xf32>
    %c1_37 = arith.constant 1 : index
    %c0_38 = arith.constant 0 : index
    %c0_39 = arith.constant 0 : index
    %47 = vector.load %arg4[%c1_37, %c0_38, %c0_39] : memref<8x8x16xf32, #tpu.memory_space<vmem>>, vector<1x8x16xf32>
    %48 = vector.shape_cast %47 : vector<1x8x16xf32> to vector<8x16xf32>
    %cst_40 = arith.constant dense<0.000000e+00> : vector<27x16xf32>
    %49 = tpu.matmul %46, %48, %cst_40 {dimension_numbers = #tpu.dot_dimension_numbers<[1], [0], [0], [1], [0, 0, 1, 1], [], []>} : vector<27x8xf32>, vector<8x16xf32>, vector<27x16xf32> -> vector<27x16xf32>
    %50 = arith.addf %45, %49 : vector<27x16xf32>
    %c2_41 = arith.constant 2 : index
    %c0_42 = arith.constant 0 : index
    %51 = vector.load %arg19[%c2_41, %c0_42] : memref<34x8xf32, #tpu.memory_space<vmem>>, vector<27x8xf32>
    %c2_43 = arith.constant 2 : index
    %c0_44 = arith.constant 0 : index
    %c0_45 = arith.constant 0 : index
    %52 = vector.load %arg4[%c2_43, %c0_44, %c0_45] : memref<8x8x16xf32, #tpu.memory_space<vmem>>, vector<1x8x16xf32>
    %53 = vector.shape_cast %52 : vector<1x8x16xf32> to vector<8x16xf32>
    %cst_46 = arith.constant dense<0.000000e+00> : vector<27x16xf32>
    %54 = tpu.matmul %51, %53, %cst_46 {dimension_numbers = #tpu.dot_dimension_numbers<[1], [0], [0], [1], [0, 0, 1, 1], [], []>} : vector<27x8xf32>, vector<8x16xf32>, vector<27x16xf32> -> vector<27x16xf32>
    %55 = arith.addf %50, %54 : vector<27x16xf32>
    %c3_47 = arith.constant 3 : index
    %c0_48 = arith.constant 0 : index
    %56 = vector.load %arg19[%c3_47, %c0_48] : memref<34x8xf32, #tpu.memory_space<vmem>>, vector<27x8xf32>
    %c3_49 = arith.constant 3 : index
    %c0_50 = arith.constant 0 : index
    %c0_51 = arith.constant 0 : index
    %57 = vector.load %arg4[%c3_49, %c0_50, %c0_51] : memref<8x8x16xf32, #tpu.memory_space<vmem>>, vector<1x8x16xf32>
    %58 = vector.shape_cast %57 : vector<1x8x16xf32> to vector<8x16xf32>
    %cst_52 = arith.constant dense<0.000000e+00> : vector<27x16xf32>
    %59 = tpu.matmul %56, %58, %cst_52 {dimension_numbers = #tpu.dot_dimension_numbers<[1], [0], [0], [1], [0, 0, 1, 1], [], []>} : vector<27x8xf32>, vector<8x16xf32>, vector<27x16xf32> -> vector<27x16xf32>
    %60 = arith.addf %55, %59 : vector<27x16xf32>
    %c4_53 = arith.constant 4 : index
    %c0_54 = arith.constant 0 : index
    %61 = vector.load %arg19[%c4_53, %c0_54] : memref<34x8xf32, #tpu.memory_space<vmem>>, vector<27x8xf32>
    %c4_55 = arith.constant 4 : index
    %c0_56 = arith.constant 0 : index
    %c0_57 = arith.constant 0 : index
    %62 = vector.load %arg4[%c4_55, %c0_56, %c0_57] : memref<8x8x16xf32, #tpu.memory_space<vmem>>, vector<1x8x16xf32>
    %63 = vector.shape_cast %62 : vector<1x8x16xf32> to vector<8x16xf32>
    %cst_58 = arith.constant dense<0.000000e+00> : vector<27x16xf32>
    %64 = tpu.matmul %61, %63, %cst_58 {dimension_numbers = #tpu.dot_dimension_numbers<[1], [0], [0], [1], [0, 0, 1, 1], [], []>} : vector<27x8xf32>, vector<8x16xf32>, vector<27x16xf32> -> vector<27x16xf32>
    %65 = arith.addf %60, %64 : vector<27x16xf32>
    %c5_59 = arith.constant 5 : index
    %c0_60 = arith.constant 0 : index
    %66 = vector.load %arg19[%c5_59, %c0_60] : memref<34x8xf32, #tpu.memory_space<vmem>>, vector<27x8xf32>
    %c5_61 = arith.constant 5 : index
    %c0_62 = arith.constant 0 : index
    %c0_63 = arith.constant 0 : index
    %67 = vector.load %arg4[%c5_61, %c0_62, %c0_63] : memref<8x8x16xf32, #tpu.memory_space<vmem>>, vector<1x8x16xf32>
    %68 = vector.shape_cast %67 : vector<1x8x16xf32> to vector<8x16xf32>
    %cst_64 = arith.constant dense<0.000000e+00> : vector<27x16xf32>
    %69 = tpu.matmul %66, %68, %cst_64 {dimension_numbers = #tpu.dot_dimension_numbers<[1], [0], [0], [1], [0, 0, 1, 1], [], []>} : vector<27x8xf32>, vector<8x16xf32>, vector<27x16xf32> -> vector<27x16xf32>
    %70 = arith.addf %65, %69 : vector<27x16xf32>
    %c6_65 = arith.constant 6 : index
    %c0_66 = arith.constant 0 : index
    %71 = vector.load %arg19[%c6_65, %c0_66] : memref<34x8xf32, #tpu.memory_space<vmem>>, vector<27x8xf32>
    %c6_67 = arith.constant 6 : index
    %c0_68 = arith.constant 0 : index
    %c0_69 = arith.constant 0 : index
    %72 = vector.load %arg4[%c6_67, %c0_68, %c0_69] : memref<8x8x16xf32, #tpu.memory_space<vmem>>, vector<1x8x16xf32>
    %73 = vector.shape_cast %72 : vector<1x8x16xf32> to vector<8x16xf32>
    %cst_70 = arith.constant dense<0.000000e+00> : vector<27x16xf32>
    %74 = tpu.matmul %71, %73, %cst_70 {dimension_numbers = #tpu.dot_dimension_numbers<[1], [0], [0], [1], [0, 0, 1, 1], [], []>} : vector<27x8xf32>, vector<8x16xf32>, vector<27x16xf32> -> vector<27x16xf32>
    %75 = arith.addf %70, %74 : vector<27x16xf32>
    %c7_71 = arith.constant 7 : index
    %c0_72 = arith.constant 0 : index
    %76 = vector.load %arg19[%c7_71, %c0_72] : memref<34x8xf32, #tpu.memory_space<vmem>>, vector<27x8xf32>
    %c7_73 = arith.constant 7 : index
    %c0_74 = arith.constant 0 : index
    %c0_75 = arith.constant 0 : index
    %77 = vector.load %arg4[%c7_73, %c0_74, %c0_75] : memref<8x8x16xf32, #tpu.memory_space<vmem>>, vector<1x8x16xf32>
    %78 = vector.shape_cast %77 : vector<1x8x16xf32> to vector<8x16xf32>
    %cst_76 = arith.constant dense<0.000000e+00> : vector<27x16xf32>
    %79 = tpu.matmul %76, %78, %cst_76 {dimension_numbers = #tpu.dot_dimension_numbers<[1], [0], [0], [1], [0, 0, 1, 1], [], []>} : vector<27x8xf32>, vector<8x16xf32>, vector<27x16xf32> -> vector<27x16xf32>
    %80 = arith.addf %75, %79 : vector<27x16xf32>
    %c0_77 = arith.constant 0 : index
    %c0_78 = arith.constant 0 : index
    %81 = vector.load %arg5[%c0_77, %c0_78] : memref<1x16xf32, #tpu.memory_space<vmem>>, vector<1x16xf32>
    %82 = vector.broadcast %81 : vector<1x16xf32> to vector<27x16xf32>
    %83 = arith.addf %80, %82 : vector<27x16xf32>
    %84 = arith.mulf %83, %83 : vector<27x16xf32>
    %85 = arith.mulf %83, %84 : vector<27x16xf32>
    %cst_79 = arith.constant 4.471500e-02 : f32
    %86 = vector.broadcast %cst_79 : f32 to vector<27x16xf32>
    %87 = arith.mulf %86, %85 : vector<27x16xf32>
    %88 = arith.addf %83, %87 : vector<27x16xf32>
    %cst_80 = arith.constant 0.797884583 : f32
    %89 = vector.broadcast %cst_80 : f32 to vector<27x16xf32>
    %90 = arith.mulf %89, %88 : vector<27x16xf32>
    %91 = math.tanh %90 : vector<27x16xf32>
    %cst_81 = arith.constant 1.000000e+00 : f32
    %92 = vector.broadcast %cst_81 : f32 to vector<27x16xf32>
    %93 = arith.addf %92, %91 : vector<27x16xf32>
    %cst_82 = arith.constant 5.000000e-01 : f32
    %94 = vector.broadcast %cst_82 : f32 to vector<27x16xf32>
    %95 = arith.mulf %94, %93 : vector<27x16xf32>
    %96 = arith.mulf %83, %95 : vector<27x16xf32>
    %cst_83 = arith.constant 0.000000e+00 : f32
    %97 = vector.broadcast %cst_83 : f32 to vector<35x16xf32>
    %c0_84 = arith.constant 0 : index
    %c0_85 = arith.constant 0 : index
    %98 = vector.load %arg20[%c0_84, %c0_85] : memref<35x16xf32, #tpu.memory_space<vmem>>, vector<35x16xf32>
    tpu.vector_store %arg20[%c0_84, %c0_85], %97 {strides = array<i32>} : memref<35x16xf32, #tpu.memory_space<vmem>>, vector<35x16xf32>,
    %c4_86 = arith.constant 4 : index
    %c0_87 = arith.constant 0 : index
    %99 = vector.load %arg20[%c4_86, %c0_87] : memref<35x16xf32, #tpu.memory_space<vmem>>, vector<27x16xf32>
    tpu.vector_store %arg20[%c4_86, %c0_87], %96 {strides = array<i32>} : memref<35x16xf32, #tpu.memory_space<vmem>>, vector<27x16xf32>,
    %c0_88 = arith.constant 0 : index
    %c0_89 = arith.constant 0 : index
    %100 = vector.load %arg20[%c0_88, %c0_89] : memref<35x16xf32, #tpu.memory_space<vmem>>, vector<28x16xf32>
    %c0_90 = arith.constant 0 : index
    %c0_91 = arith.constant 0 : index
    %c0_92 = arith.constant 0 : index
    %101 = vector.load %arg6[%c0_90, %c0_91, %c0_92] : memref<8x16x16xf32, #tpu.memory_space<vmem>>, vector<1x16x16xf32>
    %102 = vector.shape_cast %101 : vector<1x16x16xf32> to vector<16x16xf32>
    %cst_93 = arith.constant dense<0.000000e+00> : vector<28x16xf32>
    %103 = tpu.matmul %100, %102, %cst_93 {dimension_numbers = #tpu.dot_dimension_numbers<[1], [0], [0], [1], [0, 0, 1, 1], [], []>} : vector<28x16xf32>, vector<16x16xf32>, vector<28x16xf32> -> vector<28x16xf32>
    %c1_94 = arith.constant 1 : index
    %c0_95 = arith.constant 0 : index
    %104 = vector.load %arg20[%c1_94, %c0_95] : memref<35x16xf32, #tpu.memory_space<vmem>>, vector<28x16xf32>
    %c1_96 = arith.constant 1 : index
    %c0_97 = arith.constant 0 : index
    %c0_98 = arith.constant 0 : index
    %105 = vector.load %arg6[%c1_96, %c0_97, %c0_98] : memref<8x16x16xf32, #tpu.memory_space<vmem>>, vector<1x16x16xf32>
    %106 = vector.shape_cast %105 : vector<1x16x16xf32> to vector<16x16xf32>
    %cst_99 = arith.constant dense<0.000000e+00> : vector<28x16xf32>
    %107 = tpu.matmul %104, %106, %cst_99 {dimension_numbers = #tpu.dot_dimension_numbers<[1], [0], [0], [1], [0, 0, 1, 1], [], []>} : vector<28x16xf32>, vector<16x16xf32>, vector<28x16xf32> -> vector<28x16xf32>
    %108 = arith.addf %103, %107 : vector<28x16xf32>
    %c2_100 = arith.constant 2 : index
    %c0_101 = arith.constant 0 : index
    %109 = vector.load %arg20[%c2_100, %c0_101] : memref<35x16xf32, #tpu.memory_space<vmem>>, vector<28x16xf32>
    %c2_102 = arith.constant 2 : index
    %c0_103 = arith.constant 0 : index
    %c0_104 = arith.constant 0 : index
    %110 = vector.load %arg6[%c2_102, %c0_103, %c0_104] : memref<8x16x16xf32, #tpu.memory_space<vmem>>, vector<1x16x16xf32>
    %111 = vector.shape_cast %110 : vector<1x16x16xf32> to vector<16x16xf32>
    %cst_105 = arith.constant dense<0.000000e+00> : vector<28x16xf32>
    %112 = tpu.matmul %109, %111, %cst_105 {dimension_numbers = #tpu.dot_dimension_numbers<[1], [0], [0], [1], [0, 0, 1, 1], [], []>} : vector<28x16xf32>, vector<16x16xf32>, vector<28x16xf32> -> vector<28x16xf32>
    %113 = arith.addf %108, %112 : vector<28x16xf32>
    %c3_106 = arith.constant 3 : index
    %c0_107 = arith.constant 0 : index
    %114 = vector.load %arg20[%c3_106, %c0_107] : memref<35x16xf32, #tpu.memory_space<vmem>>, vector<28x16xf32>
    %c3_108 = arith.constant 3 : index
    %c0_109 = arith.constant 0 : index
    %c0_110 = arith.constant 0 : index
    %115 = vector.load %arg6[%c3_108, %c0_109, %c0_110] : memref<8x16x16xf32, #tpu.memory_space<vmem>>, vector<1x16x16xf32>
    %116 = vector.shape_cast %115 : vector<1x16x16xf32> to vector<16x16xf32>
    %cst_111 = arith.constant dense<0.000000e+00> : vector<28x16xf32>
    %117 = tpu.matmul %114, %116, %cst_111 {dimension_numbers = #tpu.dot_dimension_numbers<[1], [0], [0], [1], [0, 0, 1, 1], [], []>} : vector<28x16xf32>, vector<16x16xf32>, vector<28x16xf32> -> vector<28x16xf32>
    %118 = arith.addf %113, %117 : vector<28x16xf32>
    %c4_112 = arith.constant 4 : index
    %c0_113 = arith.constant 0 : index
    %119 = vector.load %arg20[%c4_112, %c0_113] : memref<35x16xf32, #tpu.memory_space<vmem>>, vector<28x16xf32>
    %c4_114 = arith.constant 4 : index
    %c0_115 = arith.constant 0 : index
    %c0_116 = arith.constant 0 : index
    %120 = vector.load %arg6[%c4_114, %c0_115, %c0_116] : memref<8x16x16xf32, #tpu.memory_space<vmem>>, vector<1x16x16xf32>
    %121 = vector.shape_cast %120 : vector<1x16x16xf32> to vector<16x16xf32>
    %cst_117 = arith.constant dense<0.000000e+00> : vector<28x16xf32>
    %122 = tpu.matmul %119, %121, %cst_117 {dimension_numbers = #tpu.dot_dimension_numbers<[1], [0], [0], [1], [0, 0, 1, 1], [], []>} : vector<28x16xf32>, vector<16x16xf32>, vector<28x16xf32> -> vector<28x16xf32>
    %123 = arith.addf %118, %122 : vector<28x16xf32>
    %c5_118 = arith.constant 5 : index
    %c0_119 = arith.constant 0 : index
    %124 = vector.load %arg20[%c5_118, %c0_119] : memref<35x16xf32, #tpu.memory_space<vmem>>, vector<28x16xf32>
    %c5_120 = arith.constant 5 : index
    %c0_121 = arith.constant 0 : index
    %c0_122 = arith.constant 0 : index
    %125 = vector.load %arg6[%c5_120, %c0_121, %c0_122] : memref<8x16x16xf32, #tpu.memory_space<vmem>>, vector<1x16x16xf32>
    %126 = vector.shape_cast %125 : vector<1x16x16xf32> to vector<16x16xf32>
    %cst_123 = arith.constant dense<0.000000e+00> : vector<28x16xf32>
    %127 = tpu.matmul %124, %126, %cst_123 {dimension_numbers = #tpu.dot_dimension_numbers<[1], [0], [0], [1], [0, 0, 1, 1], [], []>} : vector<28x16xf32>, vector<16x16xf32>, vector<28x16xf32> -> vector<28x16xf32>
    %128 = arith.addf %123, %127 : vector<28x16xf32>
    %c6_124 = arith.constant 6 : index
    %c0_125 = arith.constant 0 : index
    %129 = vector.load %arg20[%c6_124, %c0_125] : memref<35x16xf32, #tpu.memory_space<vmem>>, vector<28x16xf32>
    %c6_126 = arith.constant 6 : index
    %c0_127 = arith.constant 0 : index
    %c0_128 = arith.constant 0 : index
    %130 = vector.load %arg6[%c6_126, %c0_127, %c0_128] : memref<8x16x16xf32, #tpu.memory_space<vmem>>, vector<1x16x16xf32>
    %131 = vector.shape_cast %130 : vector<1x16x16xf32> to vector<16x16xf32>
    %cst_129 = arith.constant dense<0.000000e+00> : vector<28x16xf32>
    %132 = tpu.matmul %129, %131, %cst_129 {dimension_numbers = #tpu.dot_dimension_numbers<[1], [0], [0], [1], [0, 0, 1, 1], [], []>} : vector<28x16xf32>, vector<16x16xf32>, vector<28x16xf32> -> vector<28x16xf32>
    %133 = arith.addf %128, %132 : vector<28x16xf32>
    %c7_130 = arith.constant 7 : index
    %c0_131 = arith.constant 0 : index
    %134 = vector.load %arg20[%c7_130, %c0_131] : memref<35x16xf32, #tpu.memory_space<vmem>>, vector<28x16xf32>
    %c7_132 = arith.constant 7 : index
    %c0_133 = arith.constant 0 : index
    %c0_134 = arith.constant 0 : index
    %135 = vector.load %arg6[%c7_132, %c0_133, %c0_134] : memref<8x16x16xf32, #tpu.memory_space<vmem>>, vector<1x16x16xf32>
    %136 = vector.shape_cast %135 : vector<1x16x16xf32> to vector<16x16xf32>
    %cst_135 = arith.constant dense<0.000000e+00> : vector<28x16xf32>
    %137 = tpu.matmul %134, %136, %cst_135 {dimension_numbers = #tpu.dot_dimension_numbers<[1], [0], [0], [1], [0, 0, 1, 1], [], []>} : vector<28x16xf32>, vector<16x16xf32>, vector<28x16xf32> -> vector<28x16xf32>
    %138 = arith.addf %133, %137 : vector<28x16xf32>
    %c0_136 = arith.constant 0 : index
    %c0_137 = arith.constant 0 : index
    %139 = vector.load %arg7[%c0_136, %c0_137] : memref<1x16xf32, #tpu.memory_space<vmem>>, vector<1x16xf32>
    %140 = vector.broadcast %139 : vector<1x16xf32> to vector<28x16xf32>
    %141 = arith.addf %138, %140 : vector<28x16xf32>
    %142 = arith.mulf %141, %141 : vector<28x16xf32>
    %143 = arith.mulf %141, %142 : vector<28x16xf32>
    %cst_138 = arith.constant 4.471500e-02 : f32
    %144 = vector.broadcast %cst_138 : f32 to vector<28x16xf32>
    %145 = arith.mulf %144, %143 : vector<28x16xf32>
    %146 = arith.addf %141, %145 : vector<28x16xf32>
    %cst_139 = arith.constant 0.797884583 : f32
    %147 = vector.broadcast %cst_139 : f32 to vector<28x16xf32>
    %148 = arith.mulf %147, %146 : vector<28x16xf32>
    %149 = math.tanh %148 : vector<28x16xf32>
    %cst_140 = arith.constant 1.000000e+00 : f32
    %150 = vector.broadcast %cst_140 : f32 to vector<28x16xf32>
    %151 = arith.addf %150, %149 : vector<28x16xf32>
    %cst_141 = arith.constant 5.000000e-01 : f32
    %152 = vector.broadcast %cst_141 : f32 to vector<28x16xf32>
    %153 = arith.mulf %152, %151 : vector<28x16xf32>
    %154 = arith.mulf %141, %153 : vector<28x16xf32>
    %cst_142 = arith.constant 0xFF800000 : f32
    %155 = vector.broadcast %cst_142 : f32 to vector<32x16xf32>
    %c0_143 = arith.constant 0 : index
    %c0_144 = arith.constant 0 : index
    %156 = vector.load %arg21[%c0_143, %c0_144] : memref<32x16xf32, #tpu.memory_space<vmem>>, vector<32x16xf32>
    tpu.vector_store %arg21[%c0_143, %c0_144], %155 {strides = array<i32>} : memref<32x16xf32, #tpu.memory_space<vmem>>, vector<32x16xf32>,
    %c2_145 = arith.constant 2 : index
    %c0_146 = arith.constant 0 : index
    %157 = vector.load %arg21[%c2_145, %c0_146] : memref<32x16xf32, #tpu.memory_space<vmem>>, vector<28x16xf32>
    tpu.vector_store %arg21[%c2_145, %c0_146], %154 {strides = array<i32>} : memref<32x16xf32, #tpu.memory_space<vmem>>, vector<28x16xf32>,
    %c0_147 = arith.constant 0 : index
    %c0_148 = arith.constant 0 : index
    %158 = tpu.strided_load %arg21[%c0_147, %c0_148] {strides = array<i32: 4, 1>} : memref<32x16xf32, #tpu.memory_space<vmem>>, vector<8x16xf32>
    %c1_149 = arith.constant 1 : index
    %c0_150 = arith.constant 0 : index
    %159 = tpu.strided_load %arg21[%c1_149, %c0_150] {strides = array<i32: 4, 1>} : memref<32x16xf32, #tpu.memory_space<vmem>>, vector<8x16xf32>
    %160 = arith.maximumf %158, %159 : vector<8x16xf32>
    %c2_151 = arith.constant 2 : index
    %c0_152 = arith.constant 0 : index
    %161 = tpu.strided_load %arg21[%c2_151, %c0_152] {strides = array<i32: 4, 1>} : memref<32x16xf32, #tpu.memory_space<vmem>>, vector<8x16xf32>
    %162 = arith.maximumf %160, %161 : vector<8x16xf32>
    %c3_153 = arith.constant 3 : index
    %c0_154 = arith.constant 0 : index
    %163 = tpu.strided_load %arg21[%c3_153, %c0_154] {strides = array<i32: 4, 1>} : memref<32x16xf32, #tpu.memory_space<vmem>>, vector<8x16xf32>
    %164 = arith.maximumf %162, %163 : vector<8x16xf32>
    %c0_155 = arith.constant 0 : index
    %c0_156 = arith.constant 0 : index
    %c0_157 = arith.constant 0 : index
    %165 = vector.load %arg1[%c0_155, %c0_156, %c0_157] : memref<2x26x100xf32, #tpu.memory_space<vmem>>, vector<1x26x100xf32>
    %166 = vector.shape_cast %165 : vector<1x26x100xf32> to vector<26x100xf32>
    %c0_158 = arith.constant 0 : index
    %c0_159 = arith.constant 0 : index
    %167 = vector.load %arg8[%c0_158, %c0_159] : memref<100x8xf32, #tpu.memory_space<vmem>>, vector<100x8xf32>
    %cst_160 = arith.constant dense<0.000000e+00> : vector<26x8xf32>
    %168 = tpu.matmul %166, %167, %cst_160 {dimension_numbers = #tpu.dot_dimension_numbers<[1], [0], [0], [1], [0, 0, 1, 1], [], []>} : vector<26x100xf32>, vector<100x8xf32>, vector<26x8xf32> -> vector<26x8xf32>
    %c0_161 = arith.constant 0 : index
    %c0_162 = arith.constant 0 : index
    %169 = vector.load %arg9[%c0_161, %c0_162] : memref<1x8xf32, #tpu.memory_space<vmem>>, vector<1x8xf32>
    %170 = vector.broadcast %169 : vector<1x8xf32> to vector<26x8xf32>
    %171 = arith.addf %168, %170 : vector<26x8xf32>
    %172 = arith.mulf %171, %171 : vector<26x8xf32>
    %173 = arith.mulf %171, %172 : vector<26x8xf32>
    %cst_163 = arith.constant 4.471500e-02 : f32
    %174 = vector.broadcast %cst_163 : f32 to vector<26x8xf32>
    %175 = arith.mulf %174, %173 : vector<26x8xf32>
    %176 = arith.addf %171, %175 : vector<26x8xf32>
    %cst_164 = arith.constant 0.797884583 : f32
    %177 = vector.broadcast %cst_164 : f32 to vector<26x8xf32>
    %178 = arith.mulf %177, %176 : vector<26x8xf32>
    %179 = math.tanh %178 : vector<26x8xf32>
    %cst_165 = arith.constant 1.000000e+00 : f32
    %180 = vector.broadcast %cst_165 : f32 to vector<26x8xf32>
    %181 = arith.addf %180, %179 : vector<26x8xf32>
    %cst_166 = arith.constant 5.000000e-01 : f32
    %182 = vector.broadcast %cst_166 : f32 to vector<26x8xf32>
    %183 = arith.mulf %182, %181 : vector<26x8xf32>
    %184 = arith.mulf %171, %183 : vector<26x8xf32>
    %cst_167 = arith.constant 0xFF800000 : f32
    %185 = vector.broadcast %cst_167 : f32 to vector<30x8xf32>
    %c0_168 = arith.constant 0 : index
    %c0_169 = arith.constant 0 : index
    %186 = vector.load %arg22[%c0_168, %c0_169] : memref<30x8xf32, #tpu.memory_space<vmem>>, vector<30x8xf32>
    tpu.vector_store %arg22[%c0_168, %c0_169], %185 {strides = array<i32>} : memref<30x8xf32, #tpu.memory_space<vmem>>, vector<30x8xf32>,
    %c2_170 = arith.constant 2 : index
    %c0_171 = arith.constant 0 : index
    %187 = vector.load %arg22[%c2_170, %c0_171] : memref<30x8xf32, #tpu.memory_space<vmem>>, vector<26x8xf32>
    tpu.vector_store %arg22[%c2_170, %c0_171], %184 {strides = array<i32>} : memref<30x8xf32, #tpu.memory_space<vmem>>, vector<26x8xf32>,
    %c0_172 = arith.constant 0 : index
    %c0_173 = arith.constant 0 : index
    %188 = tpu.strided_load %arg22[%c0_172, %c0_173] {strides = array<i32: 2, 1>} : memref<30x8xf32, #tpu.memory_space<vmem>>, vector<14x8xf32>
    %c1_174 = arith.constant 1 : index
    %c0_175 = arith.constant 0 : index
    %189 = tpu.strided_load %arg22[%c1_174, %c0_175] {strides = array<i32: 2, 1>} : memref<30x8xf32, #tpu.memory_space<vmem>>, vector<14x8xf32>
    %190 = arith.maximumf %188, %189 : vector<14x8xf32>
    %c2_176 = arith.constant 2 : index
    %c0_177 = arith.constant 0 : index
    %191 = tpu.strided_load %arg22[%c2_176, %c0_177] {strides = array<i32: 2, 1>} : memref<30x8xf32, #tpu.memory_space<vmem>>, vector<14x8xf32>
    %192 = arith.maximumf %190, %191 : vector<14x8xf32>
    %c3_178 = arith.constant 3 : index
    %c0_179 = arith.constant 0 : index
    %193 = tpu.strided_load %arg22[%c3_178, %c0_179] {strides = array<i32: 2, 1>} : memref<30x8xf32, #tpu.memory_space<vmem>>, vector<14x8xf32>
    %194 = arith.maximumf %192, %193 : vector<14x8xf32>
    %cst_180 = arith.constant 0.000000e+00 : f32
    %195 = vector.broadcast %cst_180 : f32 to vector<20x8xf32>
    %c0_181 = arith.constant 0 : index
    %c0_182 = arith.constant 0 : index
    %196 = vector.load %arg23[%c0_181, %c0_182] : memref<20x8xf32, #tpu.memory_space<vmem>>, vector<20x8xf32>
    tpu.vector_store %arg23[%c0_181, %c0_182], %195 {strides = array<i32>} : memref<20x8xf32, #tpu.memory_space<vmem>>, vector<20x8xf32>,
    %c3_183 = arith.constant 3 : index
    %c0_184 = arith.constant 0 : index
    %197 = vector.load %arg23[%c3_183, %c0_184] : memref<20x8xf32, #tpu.memory_space<vmem>>, vector<14x8xf32>
    tpu.vector_store %arg23[%c3_183, %c0_184], %194 {strides = array<i32>} : memref<20x8xf32, #tpu.memory_space<vmem>>, vector<14x8xf32>,
    %c0_185 = arith.constant 0 : index
    %c0_186 = arith.constant 0 : index
    %198 = vector.load %arg23[%c0_185, %c0_186] : memref<20x8xf32, #tpu.memory_space<vmem>>, vector<14x8xf32>
    %c0_187 = arith.constant 0 : index
    %c0_188 = arith.constant 0 : index
    %c0_189 = arith.constant 0 : index
    %199 = vector.load %arg10[%c0_187, %c0_188, %c0_189] : memref<7x8x16xf32, #tpu.memory_space<vmem>>, vector<1x8x16xf32>
    %200 = vector.shape_cast %199 : vector<1x8x16xf32> to vector<8x16xf32>
    %cst_190 = arith.constant dense<0.000000e+00> : vector<14x16xf32>
    %201 = tpu.matmul %198, %200, %cst_190 {dimension_numbers = #tpu.dot_dimension_numbers<[1], [0], [0], [1], [0, 0, 1, 1], [], []>} : vector<14x8xf32>, vector<8x16xf32>, vector<14x16xf32> -> vector<14x16xf32>
    %c1_191 = arith.constant 1 : index
    %c0_192 = arith.constant 0 : index
    %202 = vector.load %arg23[%c1_191, %c0_192] : memref<20x8xf32, #tpu.memory_space<vmem>>, vector<14x8xf32>
    %c1_193 = arith.constant 1 : index
    %c0_194 = arith.constant 0 : index
    %c0_195 = arith.constant 0 : index
    %203 = vector.load %arg10[%c1_193, %c0_194, %c0_195] : memref<7x8x16xf32, #tpu.memory_space<vmem>>, vector<1x8x16xf32>
    %204 = vector.shape_cast %203 : vector<1x8x16xf32> to vector<8x16xf32>
    %cst_196 = arith.constant dense<0.000000e+00> : vector<14x16xf32>
    %205 = tpu.matmul %202, %204, %cst_196 {dimension_numbers = #tpu.dot_dimension_numbers<[1], [0], [0], [1], [0, 0, 1, 1], [], []>} : vector<14x8xf32>, vector<8x16xf32>, vector<14x16xf32> -> vector<14x16xf32>
    %206 = arith.addf %201, %205 : vector<14x16xf32>
    %c2_197 = arith.constant 2 : index
    %c0_198 = arith.constant 0 : index
    %207 = vector.load %arg23[%c2_197, %c0_198] : memref<20x8xf32, #tpu.memory_space<vmem>>, vector<14x8xf32>
    %c2_199 = arith.constant 2 : index
    %c0_200 = arith.constant 0 : index
    %c0_201 = arith.constant 0 : index
    %208 = vector.load %arg10[%c2_199, %c0_200, %c0_201] : memref<7x8x16xf32, #tpu.memory_space<vmem>>, vector<1x8x16xf32>
    %209 = vector.shape_cast %208 : vector<1x8x16xf32> to vector<8x16xf32>
    %cst_202 = arith.constant dense<0.000000e+00> : vector<14x16xf32>
    %210 = tpu.matmul %207, %209, %cst_202 {dimension_numbers = #tpu.dot_dimension_numbers<[1], [0], [0], [1], [0, 0, 1, 1], [], []>} : vector<14x8xf32>, vector<8x16xf32>, vector<14x16xf32> -> vector<14x16xf32>
    %211 = arith.addf %206, %210 : vector<14x16xf32>
    %c3_203 = arith.constant 3 : index
    %c0_204 = arith.constant 0 : index
    %212 = vector.load %arg23[%c3_203, %c0_204] : memref<20x8xf32, #tpu.memory_space<vmem>>, vector<14x8xf32>
    %c3_205 = arith.constant 3 : index
    %c0_206 = arith.constant 0 : index
    %c0_207 = arith.constant 0 : index
    %213 = vector.load %arg10[%c3_205, %c0_206, %c0_207] : memref<7x8x16xf32, #tpu.memory_space<vmem>>, vector<1x8x16xf32>
    %214 = vector.shape_cast %213 : vector<1x8x16xf32> to vector<8x16xf32>
    %cst_208 = arith.constant dense<0.000000e+00> : vector<14x16xf32>
    %215 = tpu.matmul %212, %214, %cst_208 {dimension_numbers = #tpu.dot_dimension_numbers<[1], [0], [0], [1], [0, 0, 1, 1], [], []>} : vector<14x8xf32>, vector<8x16xf32>, vector<14x16xf32> -> vector<14x16xf32>
    %216 = arith.addf %211, %215 : vector<14x16xf32>
    %c4_209 = arith.constant 4 : index
    %c0_210 = arith.constant 0 : index
    %217 = vector.load %arg23[%c4_209, %c0_210] : memref<20x8xf32, #tpu.memory_space<vmem>>, vector<14x8xf32>
    %c4_211 = arith.constant 4 : index
    %c0_212 = arith.constant 0 : index
    %c0_213 = arith.constant 0 : index
    %218 = vector.load %arg10[%c4_211, %c0_212, %c0_213] : memref<7x8x16xf32, #tpu.memory_space<vmem>>, vector<1x8x16xf32>
    %219 = vector.shape_cast %218 : vector<1x8x16xf32> to vector<8x16xf32>
    %cst_214 = arith.constant dense<0.000000e+00> : vector<14x16xf32>
    %220 = tpu.matmul %217, %219, %cst_214 {dimension_numbers = #tpu.dot_dimension_numbers<[1], [0], [0], [1], [0, 0, 1, 1], [], []>} : vector<14x8xf32>, vector<8x16xf32>, vector<14x16xf32> -> vector<14x16xf32>
    %221 = arith.addf %216, %220 : vector<14x16xf32>
    %c5_215 = arith.constant 5 : index
    %c0_216 = arith.constant 0 : index
    %222 = vector.load %arg23[%c5_215, %c0_216] : memref<20x8xf32, #tpu.memory_space<vmem>>, vector<14x8xf32>
    %c5_217 = arith.constant 5 : index
    %c0_218 = arith.constant 0 : index
    %c0_219 = arith.constant 0 : index
    %223 = vector.load %arg10[%c5_217, %c0_218, %c0_219] : memref<7x8x16xf32, #tpu.memory_space<vmem>>, vector<1x8x16xf32>
    %224 = vector.shape_cast %223 : vector<1x8x16xf32> to vector<8x16xf32>
    %cst_220 = arith.constant dense<0.000000e+00> : vector<14x16xf32>
    %225 = tpu.matmul %222, %224, %cst_220 {dimension_numbers = #tpu.dot_dimension_numbers<[1], [0], [0], [1], [0, 0, 1, 1], [], []>} : vector<14x8xf32>, vector<8x16xf32>, vector<14x16xf32> -> vector<14x16xf32>
    %226 = arith.addf %221, %225 : vector<14x16xf32>
    %c6_221 = arith.constant 6 : index
    %c0_222 = arith.constant 0 : index
    %227 = vector.load %arg23[%c6_221, %c0_222] : memref<20x8xf32, #tpu.memory_space<vmem>>, vector<14x8xf32>
    %c6_223 = arith.constant 6 : index
    %c0_224 = arith.constant 0 : index
    %c0_225 = arith.constant 0 : index
    %228 = vector.load %arg10[%c6_223, %c0_224, %c0_225] : memref<7x8x16xf32, #tpu.memory_space<vmem>>, vector<1x8x16xf32>
    %229 = vector.shape_cast %228 : vector<1x8x16xf32> to vector<8x16xf32>
    %cst_226 = arith.constant dense<0.000000e+00> : vector<14x16xf32>
    %230 = tpu.matmul %227, %229, %cst_226 {dimension_numbers = #tpu.dot_dimension_numbers<[1], [0], [0], [1], [0, 0, 1, 1], [], []>} : vector<14x8xf32>, vector<8x16xf32>, vector<14x16xf32> -> vector<14x16xf32>
    %231 = arith.addf %226, %230 : vector<14x16xf32>
    %c0_227 = arith.constant 0 : index
    %c0_228 = arith.constant 0 : index
    %232 = vector.load %arg11[%c0_227, %c0_228] : memref<1x16xf32, #tpu.memory_space<vmem>>, vector<1x16xf32>
    %233 = vector.broadcast %232 : vector<1x16xf32> to vector<14x16xf32>
    %234 = arith.addf %231, %233 : vector<14x16xf32>
    %235 = arith.mulf %234, %234 : vector<14x16xf32>
    %236 = arith.mulf %234, %235 : vector<14x16xf32>
    %cst_229 = arith.constant 4.471500e-02 : f32
    %237 = vector.broadcast %cst_229 : f32 to vector<14x16xf32>
    %238 = arith.mulf %237, %236 : vector<14x16xf32>
    %239 = arith.addf %234, %238 : vector<14x16xf32>
    %cst_230 = arith.constant 0.797884583 : f32
    %240 = vector.broadcast %cst_230 : f32 to vector<14x16xf32>
    %241 = arith.mulf %240, %239 : vector<14x16xf32>
    %242 = math.tanh %241 : vector<14x16xf32>
    %cst_231 = arith.constant 1.000000e+00 : f32
    %243 = vector.broadcast %cst_231 : f32 to vector<14x16xf32>
    %244 = arith.addf %243, %242 : vector<14x16xf32>
    %cst_232 = arith.constant 5.000000e-01 : f32
    %245 = vector.broadcast %cst_232 : f32 to vector<14x16xf32>
    %246 = arith.mulf %245, %244 : vector<14x16xf32>
    %247 = arith.mulf %234, %246 : vector<14x16xf32>
    %cst_233 = arith.constant 0.000000e+00 : f32
    %248 = vector.broadcast %cst_233 : f32 to vector<20x16xf32>
    %c0_234 = arith.constant 0 : index
    %c0_235 = arith.constant 0 : index
    %249 = vector.load %arg24[%c0_234, %c0_235] : memref<20x16xf32, #tpu.memory_space<vmem>>, vector<20x16xf32>
    tpu.vector_store %arg24[%c0_234, %c0_235], %248 {strides = array<i32>} : memref<20x16xf32, #tpu.memory_space<vmem>>, vector<20x16xf32>,
    %c3_236 = arith.constant 3 : index
    %c0_237 = arith.constant 0 : index
    %250 = vector.load %arg24[%c3_236, %c0_237] : memref<20x16xf32, #tpu.memory_space<vmem>>, vector<14x16xf32>
    tpu.vector_store %arg24[%c3_236, %c0_237], %247 {strides = array<i32>} : memref<20x16xf32, #tpu.memory_space<vmem>>, vector<14x16xf32>,
    %c0_238 = arith.constant 0 : index
    %c0_239 = arith.constant 0 : index
    %251 = vector.load %arg24[%c0_238, %c0_239] : memref<20x16xf32, #tpu.memory_space<vmem>>, vector<14x16xf32>
    %c0_240 = arith.constant 0 : index
    %c0_241 = arith.constant 0 : index
    %c0_242 = arith.constant 0 : index
    %252 = vector.load %arg12[%c0_240, %c0_241, %c0_242] : memref<7x16x16xf32, #tpu.memory_space<vmem>>, vector<1x16x16xf32>
    %253 = vector.shape_cast %252 : vector<1x16x16xf32> to vector<16x16xf32>
    %cst_243 = arith.constant dense<0.000000e+00> : vector<14x16xf32>
    %254 = tpu.matmul %251, %253, %cst_243 {dimension_numbers = #tpu.dot_dimension_numbers<[1], [0], [0], [1], [0, 0, 1, 1], [], []>} : vector<14x16xf32>, vector<16x16xf32>, vector<14x16xf32> -> vector<14x16xf32>
    %c1_244 = arith.constant 1 : index
    %c0_245 = arith.constant 0 : index
    %255 = vector.load %arg24[%c1_244, %c0_245] : memref<20x16xf32, #tpu.memory_space<vmem>>, vector<14x16xf32>
    %c1_246 = arith.constant 1 : index
    %c0_247 = arith.constant 0 : index
    %c0_248 = arith.constant 0 : index
    %256 = vector.load %arg12[%c1_246, %c0_247, %c0_248] : memref<7x16x16xf32, #tpu.memory_space<vmem>>, vector<1x16x16xf32>
    %257 = vector.shape_cast %256 : vector<1x16x16xf32> to vector<16x16xf32>
    %cst_249 = arith.constant dense<0.000000e+00> : vector<14x16xf32>
    %258 = tpu.matmul %255, %257, %cst_249 {dimension_numbers = #tpu.dot_dimension_numbers<[1], [0], [0], [1], [0, 0, 1, 1], [], []>} : vector<14x16xf32>, vector<16x16xf32>, vector<14x16xf32> -> vector<14x16xf32>
    %259 = arith.addf %254, %258 : vector<14x16xf32>
    %c2_250 = arith.constant 2 : index
    %c0_251 = arith.constant 0 : index
    %260 = vector.load %arg24[%c2_250, %c0_251] : memref<20x16xf32, #tpu.memory_space<vmem>>, vector<14x16xf32>
    %c2_252 = arith.constant 2 : index
    %c0_253 = arith.constant 0 : index
    %c0_254 = arith.constant 0 : index
    %261 = vector.load %arg12[%c2_252, %c0_253, %c0_254] : memref<7x16x16xf32, #tpu.memory_space<vmem>>, vector<1x16x16xf32>
    %262 = vector.shape_cast %261 : vector<1x16x16xf32> to vector<16x16xf32>
    %cst_255 = arith.constant dense<0.000000e+00> : vector<14x16xf32>
    %263 = tpu.matmul %260, %262, %cst_255 {dimension_numbers = #tpu.dot_dimension_numbers<[1], [0], [0], [1], [0, 0, 1, 1], [], []>} : vector<14x16xf32>, vector<16x16xf32>, vector<14x16xf32> -> vector<14x16xf32>
    %264 = arith.addf %259, %263 : vector<14x16xf32>
    %c3_256 = arith.constant 3 : index
    %c0_257 = arith.constant 0 : index
    %265 = vector.load %arg24[%c3_256, %c0_257] : memref<20x16xf32, #tpu.memory_space<vmem>>, vector<14x16xf32>
    %c3_258 = arith.constant 3 : index
    %c0_259 = arith.constant 0 : index
    %c0_260 = arith.constant 0 : index
    %266 = vector.load %arg12[%c3_258, %c0_259, %c0_260] : memref<7x16x16xf32, #tpu.memory_space<vmem>>, vector<1x16x16xf32>
    %267 = vector.shape_cast %266 : vector<1x16x16xf32> to vector<16x16xf32>
    %cst_261 = arith.constant dense<0.000000e+00> : vector<14x16xf32>
    %268 = tpu.matmul %265, %267, %cst_261 {dimension_numbers = #tpu.dot_dimension_numbers<[1], [0], [0], [1], [0, 0, 1, 1], [], []>} : vector<14x16xf32>, vector<16x16xf32>, vector<14x16xf32> -> vector<14x16xf32>
    %269 = arith.addf %264, %268 : vector<14x16xf32>
    %c4_262 = arith.constant 4 : index
    %c0_263 = arith.constant 0 : index
    %270 = vector.load %arg24[%c4_262, %c0_263] : memref<20x16xf32, #tpu.memory_space<vmem>>, vector<14x16xf32>
    %c4_264 = arith.constant 4 : index
    %c0_265 = arith.constant 0 : index
    %c0_266 = arith.constant 0 : index
    %271 = vector.load %arg12[%c4_264, %c0_265, %c0_266] : memref<7x16x16xf32, #tpu.memory_space<vmem>>, vector<1x16x16xf32>
    %272 = vector.shape_cast %271 : vector<1x16x16xf32> to vector<16x16xf32>
    %cst_267 = arith.constant dense<0.000000e+00> : vector<14x16xf32>
    %273 = tpu.matmul %270, %272, %cst_267 {dimension_numbers = #tpu.dot_dimension_numbers<[1], [0], [0], [1], [0, 0, 1, 1], [], []>} : vector<14x16xf32>, vector<16x16xf32>, vector<14x16xf32> -> vector<14x16xf32>
    %274 = arith.addf %269, %273 : vector<14x16xf32>
    %c5_268 = arith.constant 5 : index
    %c0_269 = arith.constant 0 : index
    %275 = vector.load %arg24[%c5_268, %c0_269] : memref<20x16xf32, #tpu.memory_space<vmem>>, vector<14x16xf32>
    %c5_270 = arith.constant 5 : index
    %c0_271 = arith.constant 0 : index
    %c0_272 = arith.constant 0 : index
    %276 = vector.load %arg12[%c5_270, %c0_271, %c0_272] : memref<7x16x16xf32, #tpu.memory_space<vmem>>, vector<1x16x16xf32>
    %277 = vector.shape_cast %276 : vector<1x16x16xf32> to vector<16x16xf32>
    %cst_273 = arith.constant dense<0.000000e+00> : vector<14x16xf32>
    %278 = tpu.matmul %275, %277, %cst_273 {dimension_numbers = #tpu.dot_dimension_numbers<[1], [0], [0], [1], [0, 0, 1, 1], [], []>} : vector<14x16xf32>, vector<16x16xf32>, vector<14x16xf32> -> vector<14x16xf32>
    %279 = arith.addf %274, %278 : vector<14x16xf32>
    %c6_274 = arith.constant 6 : index
    %c0_275 = arith.constant 0 : index
    %280 = vector.load %arg24[%c6_274, %c0_275] : memref<20x16xf32, #tpu.memory_space<vmem>>, vector<14x16xf32>
    %c6_276 = arith.constant 6 : index
    %c0_277 = arith.constant 0 : index
    %c0_278 = arith.constant 0 : index
    %281 = vector.load %arg12[%c6_276, %c0_277, %c0_278] : memref<7x16x16xf32, #tpu.memory_space<vmem>>, vector<1x16x16xf32>
    %282 = vector.shape_cast %281 : vector<1x16x16xf32> to vector<16x16xf32>
    %cst_279 = arith.constant dense<0.000000e+00> : vector<14x16xf32>
    %283 = tpu.matmul %280, %282, %cst_279 {dimension_numbers = #tpu.dot_dimension_numbers<[1], [0], [0], [1], [0, 0, 1, 1], [], []>} : vector<14x16xf32>, vector<16x16xf32>, vector<14x16xf32> -> vector<14x16xf32>
    %284 = arith.addf %279, %283 : vector<14x16xf32>
    %c0_280 = arith.constant 0 : index
    %c0_281 = arith.constant 0 : index
    %285 = vector.load %arg13[%c0_280, %c0_281] : memref<1x16xf32, #tpu.memory_space<vmem>>, vector<1x16xf32>
    %286 = vector.broadcast %285 : vector<1x16xf32> to vector<14x16xf32>
    %287 = arith.addf %284, %286 : vector<14x16xf32>
    %288 = arith.mulf %287, %287 : vector<14x16xf32>
    %289 = arith.mulf %287, %288 : vector<14x16xf32>
    %cst_282 = arith.constant 4.471500e-02 : f32
    %290 = vector.broadcast %cst_282 : f32 to vector<14x16xf32>
    %291 = arith.mulf %290, %289 : vector<14x16xf32>
    %292 = arith.addf %287, %291 : vector<14x16xf32>
    %cst_283 = arith.constant 0.797884583 : f32
    %293 = vector.broadcast %cst_283 : f32 to vector<14x16xf32>
    %294 = arith.mulf %293, %292 : vector<14x16xf32>
    %295 = math.tanh %294 : vector<14x16xf32>
    %cst_284 = arith.constant 1.000000e+00 : f32
    %296 = vector.broadcast %cst_284 : f32 to vector<14x16xf32>
    %297 = arith.addf %296, %295 : vector<14x16xf32>
    %cst_285 = arith.constant 5.000000e-01 : f32
    %298 = vector.broadcast %cst_285 : f32 to vector<14x16xf32>
    %299 = arith.mulf %298, %297 : vector<14x16xf32>
    %300 = arith.mulf %287, %299 : vector<14x16xf32>
    %cst_286 = arith.constant 0xFF800000 : f32
    %301 = vector.broadcast %cst_286 : f32 to vector<16x16xf32>
    %c0_287 = arith.constant 0 : index
    %c0_288 = arith.constant 0 : index
    %302 = vector.load %arg25[%c0_287, %c0_288] : memref<16x16xf32, #tpu.memory_space<vmem>>, vector<16x16xf32>
    tpu.vector_store %arg25[%c0_287, %c0_288], %301 {strides = array<i32>} : memref<16x16xf32, #tpu.memory_space<vmem>>, vector<16x16xf32>,
    %c1_289 = arith.constant 1 : index
    %c0_290 = arith.constant 0 : index
    %303 = vector.load %arg25[%c1_289, %c0_290] : memref<16x16xf32, #tpu.memory_space<vmem>>, vector<14x16xf32>
    tpu.vector_store %arg25[%c1_289, %c0_290], %300 {strides = array<i32>} : memref<16x16xf32, #tpu.memory_space<vmem>>, vector<14x16xf32>,
    %c0_291 = arith.constant 0 : index
    %c0_292 = arith.constant 0 : index
    %304 = tpu.strided_load %arg25[%c0_291, %c0_292] {strides = array<i32: 2, 1>} : memref<16x16xf32, #tpu.memory_space<vmem>>, vector<8x16xf32>
    %c1_293 = arith.constant 1 : index
    %c0_294 = arith.constant 0 : index
    %305 = tpu.strided_load %arg25[%c1_293, %c0_294] {strides = array<i32: 2, 1>} : memref<16x16xf32, #tpu.memory_space<vmem>>, vector<8x16xf32>
    %306 = arith.maximumf %304, %305 : vector<8x16xf32>
    %c0_295 = arith.constant 0 : index
    %c0_296 = arith.constant 0 : index
    %307 = vector.load %arg16[%c0_295, %c0_296] : memref<1x5xf32, #tpu.memory_space<vmem>>, vector<1x5xf32>
    %c0_297 = arith.constant 0 : index
    %c0_298 = arith.constant 0 : index
    %c0_299 = arith.constant 0 : index
    %308 = vector.load %arg14[%c0_297, %c0_298, %c0_299] : memref<5x8x16xf32, #tpu.memory_space<vmem>>, vector<1x8x16xf32>
    %309 = vector.shape_cast %308 : vector<1x8x16xf32> to vector<8x16xf32>
    %310 = arith.mulf %164, %309 : vector<8x16xf32>
    %cst_300 = arith.constant dense<0.000000e+00> : vector<8xf32>
    %311 = vector.multi_reduction <add>, %310, %cst_300 [1] : vector<8x16xf32> to vector<8xf32>
    %312 = vector.shape_cast %311 : vector<8xf32> to vector<8x1xf32>
    %cst_301 = arith.constant dense<0.000000e+00> : vector<1xf32>
    %313 = vector.multi_reduction <add>, %312, %cst_301 [0] : vector<8x1xf32> to vector<1xf32>
    %314 = vector.shape_cast %313 : vector<1xf32> to vector<1x1xf32>
    %c0_302 = arith.constant 0 : index
    %c0_303 = arith.constant 0 : index
    %c0_304 = arith.constant 0 : index
    %315 = vector.load %arg15[%c0_302, %c0_303, %c0_304] : memref<5x8x16xf32, #tpu.memory_space<vmem>>, vector<1x8x16xf32>
    %316 = vector.shape_cast %315 : vector<1x8x16xf32> to vector<8x16xf32>
    %317 = arith.mulf %306, %316 : vector<8x16xf32>
    %cst_305 = arith.constant dense<0.000000e+00> : vector<8xf32>
    %318 = vector.multi_reduction <add>, %317, %cst_305 [1] : vector<8x16xf32> to vector<8xf32>
    %319 = vector.shape_cast %318 : vector<8xf32> to vector<8x1xf32>
    %cst_306 = arith.constant dense<0.000000e+00> : vector<1xf32>
    %320 = vector.multi_reduction <add>, %319, %cst_306 [0] : vector<8x1xf32> to vector<1xf32>
    %321 = vector.shape_cast %320 : vector<1xf32> to vector<1x1xf32>
    %322 = arith.addf %314, %321 : vector<1x1xf32>
    %c0_i32 = arith.constant 0 : i32
    %323 = vector.broadcast %c0_i32 : i32 to vector<1x5xi32>
    %324 = arith.cmpi eq, %0, %323 : vector<1x5xi32>
    %325 = arith.extui %324 : vector<1x5xi1> to vector<1x5xi32>
    %326 = arith.sitofp %325 : vector<1x5xi32> to vector<1x5xf32>
    %327 = vector.broadcast %322 : vector<1x1xf32> to vector<1x5xf32>
    %328 = arith.mulf %327, %326 : vector<1x5xf32>
    %329 = arith.addf %307, %328 : vector<1x5xf32>
    %c1_307 = arith.constant 1 : index
    %c0_308 = arith.constant 0 : index
    %c0_309 = arith.constant 0 : index
    %330 = vector.load %arg14[%c1_307, %c0_308, %c0_309] : memref<5x8x16xf32, #tpu.memory_space<vmem>>, vector<1x8x16xf32>
    %331 = vector.shape_cast %330 : vector<1x8x16xf32> to vector<8x16xf32>
    %332 = arith.mulf %164, %331 : vector<8x16xf32>
    %cst_310 = arith.constant dense<0.000000e+00> : vector<8xf32>
    %333 = vector.multi_reduction <add>, %332, %cst_310 [1] : vector<8x16xf32> to vector<8xf32>
    %334 = vector.shape_cast %333 : vector<8xf32> to vector<8x1xf32>
    %cst_311 = arith.constant dense<0.000000e+00> : vector<1xf32>
    %335 = vector.multi_reduction <add>, %334, %cst_311 [0] : vector<8x1xf32> to vector<1xf32>
    %336 = vector.shape_cast %335 : vector<1xf32> to vector<1x1xf32>
    %c1_312 = arith.constant 1 : index
    %c0_313 = arith.constant 0 : index
    %c0_314 = arith.constant 0 : index
    %337 = vector.load %arg15[%c1_312, %c0_313, %c0_314] : memref<5x8x16xf32, #tpu.memory_space<vmem>>, vector<1x8x16xf32>
    %338 = vector.shape_cast %337 : vector<1x8x16xf32> to vector<8x16xf32>
    %339 = arith.mulf %306, %338 : vector<8x16xf32>
    %cst_315 = arith.constant dense<0.000000e+00> : vector<8xf32>
    %340 = vector.multi_reduction <add>, %339, %cst_315 [1] : vector<8x16xf32> to vector<8xf32>
    %341 = vector.shape_cast %340 : vector<8xf32> to vector<8x1xf32>
    %cst_316 = arith.constant dense<0.000000e+00> : vector<1xf32>
    %342 = vector.multi_reduction <add>, %341, %cst_316 [0] : vector<8x1xf32> to vector<1xf32>
    %343 = vector.shape_cast %342 : vector<1xf32> to vector<1x1xf32>
    %344 = arith.addf %336, %343 : vector<1x1xf32>
    %c1_i32 = arith.constant 1 : i32
    %345 = vector.broadcast %c1_i32 : i32 to vector<1x5xi32>
    %346 = arith.cmpi eq, %0, %345 : vector<1x5xi32>
    %347 = arith.extui %346 : vector<1x5xi1> to vector<1x5xi32>
    %348 = arith.sitofp %347 : vector<1x5xi32> to vector<1x5xf32>
    %349 = vector.broadcast %344 : vector<1x1xf32> to vector<1x5xf32>
    %350 = arith.mulf %349, %348 : vector<1x5xf32>
    %351 = arith.addf %329, %350 : vector<1x5xf32>
    %c2_317 = arith.constant 2 : index
    %c0_318 = arith.constant 0 : index
    %c0_319 = arith.constant 0 : index
    %352 = vector.load %arg14[%c2_317, %c0_318, %c0_319] : memref<5x8x16xf32, #tpu.memory_space<vmem>>, vector<1x8x16xf32>
    %353 = vector.shape_cast %352 : vector<1x8x16xf32> to vector<8x16xf32>
    %354 = arith.mulf %164, %353 : vector<8x16xf32>
    %cst_320 = arith.constant dense<0.000000e+00> : vector<8xf32>
    %355 = vector.multi_reduction <add>, %354, %cst_320 [1] : vector<8x16xf32> to vector<8xf32>
    %356 = vector.shape_cast %355 : vector<8xf32> to vector<8x1xf32>
    %cst_321 = arith.constant dense<0.000000e+00> : vector<1xf32>
    %357 = vector.multi_reduction <add>, %356, %cst_321 [0] : vector<8x1xf32> to vector<1xf32>
    %358 = vector.shape_cast %357 : vector<1xf32> to vector<1x1xf32>
    %c2_322 = arith.constant 2 : index
    %c0_323 = arith.constant 0 : index
    %c0_324 = arith.constant 0 : index
    %359 = vector.load %arg15[%c2_322, %c0_323, %c0_324] : memref<5x8x16xf32, #tpu.memory_space<vmem>>, vector<1x8x16xf32>
    %360 = vector.shape_cast %359 : vector<1x8x16xf32> to vector<8x16xf32>
    %361 = arith.mulf %306, %360 : vector<8x16xf32>
    %cst_325 = arith.constant dense<0.000000e+00> : vector<8xf32>
    %362 = vector.multi_reduction <add>, %361, %cst_325 [1] : vector<8x16xf32> to vector<8xf32>
    %363 = vector.shape_cast %362 : vector<8xf32> to vector<8x1xf32>
    %cst_326 = arith.constant dense<0.000000e+00> : vector<1xf32>
    %364 = vector.multi_reduction <add>, %363, %cst_326 [0] : vector<8x1xf32> to vector<1xf32>
    %365 = vector.shape_cast %364 : vector<1xf32> to vector<1x1xf32>
    %366 = arith.addf %358, %365 : vector<1x1xf32>
    %c2_i32 = arith.constant 2 : i32
    %367 = vector.broadcast %c2_i32 : i32 to vector<1x5xi32>
    %368 = arith.cmpi eq, %0, %367 : vector<1x5xi32>
    %369 = arith.extui %368 : vector<1x5xi1> to vector<1x5xi32>
    %370 = arith.sitofp %369 : vector<1x5xi32> to vector<1x5xf32>
    %371 = vector.broadcast %366 : vector<1x1xf32> to vector<1x5xf32>
    %372 = arith.mulf %371, %370 : vector<1x5xf32>
    %373 = arith.addf %351, %372 : vector<1x5xf32>
    %c3_327 = arith.constant 3 : index
    %c0_328 = arith.constant 0 : index
    %c0_329 = arith.constant 0 : index
    %374 = vector.load %arg14[%c3_327, %c0_328, %c0_329] : memref<5x8x16xf32, #tpu.memory_space<vmem>>, vector<1x8x16xf32>
    %375 = vector.shape_cast %374 : vector<1x8x16xf32> to vector<8x16xf32>
    %376 = arith.mulf %164, %375 : vector<8x16xf32>
    %cst_330 = arith.constant dense<0.000000e+00> : vector<8xf32>
    %377 = vector.multi_reduction <add>, %376, %cst_330 [1] : vector<8x16xf32> to vector<8xf32>
    %378 = vector.shape_cast %377 : vector<8xf32> to vector<8x1xf32>
    %cst_331 = arith.constant dense<0.000000e+00> : vector<1xf32>
    %379 = vector.multi_reduction <add>, %378, %cst_331 [0] : vector<8x1xf32> to vector<1xf32>
    %380 = vector.shape_cast %379 : vector<1xf32> to vector<1x1xf32>
    %c3_332 = arith.constant 3 : index
    %c0_333 = arith.constant 0 : index
    %c0_334 = arith.constant 0 : index
    %381 = vector.load %arg15[%c3_332, %c0_333, %c0_334] : memref<5x8x16xf32, #tpu.memory_space<vmem>>, vector<1x8x16xf32>
    %382 = vector.shape_cast %381 : vector<1x8x16xf32> to vector<8x16xf32>
    %383 = arith.mulf %306, %382 : vector<8x16xf32>
    %cst_335 = arith.constant dense<0.000000e+00> : vector<8xf32>
    %384 = vector.multi_reduction <add>, %383, %cst_335 [1] : vector<8x16xf32> to vector<8xf32>
    %385 = vector.shape_cast %384 : vector<8xf32> to vector<8x1xf32>
    %cst_336 = arith.constant dense<0.000000e+00> : vector<1xf32>
    %386 = vector.multi_reduction <add>, %385, %cst_336 [0] : vector<8x1xf32> to vector<1xf32>
    %387 = vector.shape_cast %386 : vector<1xf32> to vector<1x1xf32>
    %388 = arith.addf %380, %387 : vector<1x1xf32>
    %c3_i32 = arith.constant 3 : i32
    %389 = vector.broadcast %c3_i32 : i32 to vector<1x5xi32>
    %390 = arith.cmpi eq, %0, %389 : vector<1x5xi32>
    %391 = arith.extui %390 : vector<1x5xi1> to vector<1x5xi32>
    %392 = arith.sitofp %391 : vector<1x5xi32> to vector<1x5xf32>
    %393 = vector.broadcast %388 : vector<1x1xf32> to vector<1x5xf32>
    %394 = arith.mulf %393, %392 : vector<1x5xf32>
    %395 = arith.addf %373, %394 : vector<1x5xf32>
    %c4_337 = arith.constant 4 : index
    %c0_338 = arith.constant 0 : index
    %c0_339 = arith.constant 0 : index
    %396 = vector.load %arg14[%c4_337, %c0_338, %c0_339] : memref<5x8x16xf32, #tpu.memory_space<vmem>>, vector<1x8x16xf32>
    %397 = vector.shape_cast %396 : vector<1x8x16xf32> to vector<8x16xf32>
    %398 = arith.mulf %164, %397 : vector<8x16xf32>
    %cst_340 = arith.constant dense<0.000000e+00> : vector<8xf32>
    %399 = vector.multi_reduction <add>, %398, %cst_340 [1] : vector<8x16xf32> to vector<8xf32>
    %400 = vector.shape_cast %399 : vector<8xf32> to vector<8x1xf32>
    %cst_341 = arith.constant dense<0.000000e+00> : vector<1xf32>
    %401 = vector.multi_reduction <add>, %400, %cst_341 [0] : vector<8x1xf32> to vector<1xf32>
    %402 = vector.shape_cast %401 : vector<1xf32> to vector<1x1xf32>
    %c4_342 = arith.constant 4 : index
    %c0_343 = arith.constant 0 : index
    %c0_344 = arith.constant 0 : index
    %403 = vector.load %arg15[%c4_342, %c0_343, %c0_344] : memref<5x8x16xf32, #tpu.memory_space<vmem>>, vector<1x8x16xf32>
    %404 = vector.shape_cast %403 : vector<1x8x16xf32> to vector<8x16xf32>
    %405 = arith.mulf %306, %404 : vector<8x16xf32>
    %cst_345 = arith.constant dense<0.000000e+00> : vector<8xf32>
    %406 = vector.multi_reduction <add>, %405, %cst_345 [1] : vector<8x16xf32> to vector<8xf32>
    %407 = vector.shape_cast %406 : vector<8xf32> to vector<8x1xf32>
    %cst_346 = arith.constant dense<0.000000e+00> : vector<1xf32>
    %408 = vector.multi_reduction <add>, %407, %cst_346 [0] : vector<8x1xf32> to vector<1xf32>
    %409 = vector.shape_cast %408 : vector<1xf32> to vector<1x1xf32>
    %410 = arith.addf %402, %409 : vector<1x1xf32>
    %c4_i32 = arith.constant 4 : i32
    %411 = vector.broadcast %c4_i32 : i32 to vector<1x5xi32>
    %412 = arith.cmpi eq, %0, %411 : vector<1x5xi32>
    %413 = arith.extui %412 : vector<1x5xi1> to vector<1x5xi32>
    %414 = arith.sitofp %413 : vector<1x5xi32> to vector<1x5xf32>
    %415 = vector.broadcast %410 : vector<1x1xf32> to vector<1x5xf32>
    %416 = arith.mulf %415, %414 : vector<1x5xf32>
    %417 = arith.addf %395, %416 : vector<1x5xf32>
    %c0_347 = arith.constant 0 : index
    %c0_348 = arith.constant 0 : index
    %418 = vector.load %arg17[%c0_347, %c0_348] : memref<2x5xf32, #tpu.memory_space<vmem>>, vector<1x5xf32>
    tpu.vector_store %arg17[%c0_347, %c0_348], %417 {strides = array<i32>} : memref<2x5xf32, #tpu.memory_space<vmem>>, vector<1x5xf32>,
    %c1_349 = arith.constant 1 : index
    %c0_350 = arith.constant 0 : index
    %c0_351 = arith.constant 0 : index
    %419 = vector.load %arg0[%c1_349, %c0_350, %c0_351] : memref<2x50x50xf32, #tpu.memory_space<vmem>>, vector<1x50x50xf32>
    %420 = vector.shape_cast %419 : vector<1x50x50xf32> to vector<50x50xf32>
    %c0_352 = arith.constant 0 : index
    %c0_353 = arith.constant 0 : index
    %421 = vector.load %arg2[%c0_352, %c0_353] : memref<50x8xf32, #tpu.memory_space<vmem>>, vector<50x8xf32>
    %cst_354 = arith.constant dense<0.000000e+00> : vector<50x8xf32>
    %422 = tpu.matmul %420, %421, %cst_354 {dimension_numbers = #tpu.dot_dimension_numbers<[1], [0], [0], [1], [0, 0, 1, 1], [], []>} : vector<50x50xf32>, vector<50x8xf32>, vector<50x8xf32> -> vector<50x8xf32>
    %c0_355 = arith.constant 0 : index
    %c0_356 = arith.constant 0 : index
    %423 = vector.load %arg3[%c0_355, %c0_356] : memref<1x8xf32, #tpu.memory_space<vmem>>, vector<1x8xf32>
    %424 = vector.broadcast %423 : vector<1x8xf32> to vector<50x8xf32>
    %425 = arith.addf %422, %424 : vector<50x8xf32>
    %426 = arith.mulf %425, %425 : vector<50x8xf32>
    %427 = arith.mulf %425, %426 : vector<50x8xf32>
    %cst_357 = arith.constant 4.471500e-02 : f32
    %428 = vector.broadcast %cst_357 : f32 to vector<50x8xf32>
    %429 = arith.mulf %428, %427 : vector<50x8xf32>
    %430 = arith.addf %425, %429 : vector<50x8xf32>
    %cst_358 = arith.constant 0.797884583 : f32
    %431 = vector.broadcast %cst_358 : f32 to vector<50x8xf32>
    %432 = arith.mulf %431, %430 : vector<50x8xf32>
    %433 = math.tanh %432 : vector<50x8xf32>
    %cst_359 = arith.constant 1.000000e+00 : f32
    %434 = vector.broadcast %cst_359 : f32 to vector<50x8xf32>
    %435 = arith.addf %434, %433 : vector<50x8xf32>
    %cst_360 = arith.constant 5.000000e-01 : f32
    %436 = vector.broadcast %cst_360 : f32 to vector<50x8xf32>
    %437 = arith.mulf %436, %435 : vector<50x8xf32>
    %438 = arith.mulf %425, %437 : vector<50x8xf32>
    %cst_361 = arith.constant 0xFF800000 : f32
    %439 = vector.broadcast %cst_361 : f32 to vector<58x8xf32>
    %c0_362 = arith.constant 0 : index
    %c0_363 = arith.constant 0 : index
    %440 = vector.load %arg18[%c0_362, %c0_363] : memref<58x8xf32, #tpu.memory_space<vmem>>, vector<58x8xf32>
    tpu.vector_store %arg18[%c0_362, %c0_363], %439 {strides = array<i32>} : memref<58x8xf32, #tpu.memory_space<vmem>>, vector<58x8xf32>,
    %c4_364 = arith.constant 4 : index
    %c0_365 = arith.constant 0 : index
    %441 = vector.load %arg18[%c4_364, %c0_365] : memref<58x8xf32, #tpu.memory_space<vmem>>, vector<50x8xf32>
    tpu.vector_store %arg18[%c4_364, %c0_365], %438 {strides = array<i32>} : memref<58x8xf32, #tpu.memory_space<vmem>>, vector<50x8xf32>,
    %c0_366 = arith.constant 0 : index
    %c0_367 = arith.constant 0 : index
    %442 = tpu.strided_load %arg18[%c0_366, %c0_367] {strides = array<i32: 2, 1>} : memref<58x8xf32, #tpu.memory_space<vmem>>, vector<26x8xf32>
    %c1_368 = arith.constant 1 : index
    %c0_369 = arith.constant 0 : index
    %443 = tpu.strided_load %arg18[%c1_368, %c0_369] {strides = array<i32: 2, 1>} : memref<58x8xf32, #tpu.memory_space<vmem>>, vector<26x8xf32>
    %444 = arith.maximumf %442, %443 : vector<26x8xf32>
    %c2_370 = arith.constant 2 : index
    %c0_371 = arith.constant 0 : index
    %445 = tpu.strided_load %arg18[%c2_370, %c0_371] {strides = array<i32: 2, 1>} : memref<58x8xf32, #tpu.memory_space<vmem>>, vector<26x8xf32>
    %446 = arith.maximumf %444, %445 : vector<26x8xf32>
    %c3_372 = arith.constant 3 : index
    %c0_373 = arith.constant 0 : index
    %447 = tpu.strided_load %arg18[%c3_372, %c0_373] {strides = array<i32: 2, 1>} : memref<58x8xf32, #tpu.memory_space<vmem>>, vector<26x8xf32>
    %448 = arith.maximumf %446, %447 : vector<26x8xf32>
    %c4_374 = arith.constant 4 : index
    %c0_375 = arith.constant 0 : index
    %449 = tpu.strided_load %arg18[%c4_374, %c0_375] {strides = array<i32: 2, 1>} : memref<58x8xf32, #tpu.memory_space<vmem>>, vector<26x8xf32>
    %450 = arith.maximumf %448, %449 : vector<26x8xf32>
    %c5_376 = arith.constant 5 : index
    %c0_377 = arith.constant 0 : index
    %451 = tpu.strided_load %arg18[%c5_376, %c0_377] {strides = array<i32: 2, 1>} : memref<58x8xf32, #tpu.memory_space<vmem>>, vector<26x8xf32>
    %452 = arith.maximumf %450, %451 : vector<26x8xf32>
    %c6_378 = arith.constant 6 : index
    %c0_379 = arith.constant 0 : index
    %453 = tpu.strided_load %arg18[%c6_378, %c0_379] {strides = array<i32: 2, 1>} : memref<58x8xf32, #tpu.memory_space<vmem>>, vector<26x8xf32>
    %454 = arith.maximumf %452, %453 : vector<26x8xf32>
    %c7_380 = arith.constant 7 : index
    %c0_381 = arith.constant 0 : index
    %455 = tpu.strided_load %arg18[%c7_380, %c0_381] {strides = array<i32: 2, 1>} : memref<58x8xf32, #tpu.memory_space<vmem>>, vector<26x8xf32>
    %456 = arith.maximumf %454, %455 : vector<26x8xf32>
    %cst_382 = arith.constant 0.000000e+00 : f32
    %457 = vector.broadcast %cst_382 : f32 to vector<34x8xf32>
    %c0_383 = arith.constant 0 : index
    %c0_384 = arith.constant 0 : index
    %458 = vector.load %arg19[%c0_383, %c0_384] : memref<34x8xf32, #tpu.memory_space<vmem>>, vector<34x8xf32>
    tpu.vector_store %arg19[%c0_383, %c0_384], %457 {strides = array<i32>} : memref<34x8xf32, #tpu.memory_space<vmem>>, vector<34x8xf32>,
    %c4_385 = arith.constant 4 : index
    %c0_386 = arith.constant 0 : index
    %459 = vector.load %arg19[%c4_385, %c0_386] : memref<34x8xf32, #tpu.memory_space<vmem>>, vector<26x8xf32>
    tpu.vector_store %arg19[%c4_385, %c0_386], %456 {strides = array<i32>} : memref<34x8xf32, #tpu.memory_space<vmem>>, vector<26x8xf32>,
    %c0_387 = arith.constant 0 : index
    %c0_388 = arith.constant 0 : index
    %460 = vector.load %arg19[%c0_387, %c0_388] : memref<34x8xf32, #tpu.memory_space<vmem>>, vector<27x8xf32>
    %c0_389 = arith.constant 0 : index
    %c0_390 = arith.constant 0 : index
    %c0_391 = arith.constant 0 : index
    %461 = vector.load %arg4[%c0_389, %c0_390, %c0_391] : memref<8x8x16xf32, #tpu.memory_space<vmem>>, vector<1x8x16xf32>
    %462 = vector.shape_cast %461 : vector<1x8x16xf32> to vector<8x16xf32>
    %cst_392 = arith.constant dense<0.000000e+00> : vector<27x16xf32>
    %463 = tpu.matmul %460, %462, %cst_392 {dimension_numbers = #tpu.dot_dimension_numbers<[1], [0], [0], [1], [0, 0, 1, 1], [], []>} : vector<27x8xf32>, vector<8x16xf32>, vector<27x16xf32> -> vector<27x16xf32>
    %c1_393 = arith.constant 1 : index
    %c0_394 = arith.constant 0 : index
    %464 = vector.load %arg19[%c1_393, %c0_394] : memref<34x8xf32, #tpu.memory_space<vmem>>, vector<27x8xf32>
    %c1_395 = arith.constant 1 : index
    %c0_396 = arith.constant 0 : index
    %c0_397 = arith.constant 0 : index
    %465 = vector.load %arg4[%c1_395, %c0_396, %c0_397] : memref<8x8x16xf32, #tpu.memory_space<vmem>>, vector<1x8x16xf32>
    %466 = vector.shape_cast %465 : vector<1x8x16xf32> to vector<8x16xf32>
    %cst_398 = arith.constant dense<0.000000e+00> : vector<27x16xf32>
    %467 = tpu.matmul %464, %466, %cst_398 {dimension_numbers = #tpu.dot_dimension_numbers<[1], [0], [0], [1], [0, 0, 1, 1], [], []>} : vector<27x8xf32>, vector<8x16xf32>, vector<27x16xf32> -> vector<27x16xf32>
    %468 = arith.addf %463, %467 : vector<27x16xf32>
    %c2_399 = arith.constant 2 : index
    %c0_400 = arith.constant 0 : index
    %469 = vector.load %arg19[%c2_399, %c0_400] : memref<34x8xf32, #tpu.memory_space<vmem>>, vector<27x8xf32>
    %c2_401 = arith.constant 2 : index
    %c0_402 = arith.constant 0 : index
    %c0_403 = arith.constant 0 : index
    %470 = vector.load %arg4[%c2_401, %c0_402, %c0_403] : memref<8x8x16xf32, #tpu.memory_space<vmem>>, vector<1x8x16xf32>
    %471 = vector.shape_cast %470 : vector<1x8x16xf32> to vector<8x16xf32>
    %cst_404 = arith.constant dense<0.000000e+00> : vector<27x16xf32>
    %472 = tpu.matmul %469, %471, %cst_404 {dimension_numbers = #tpu.dot_dimension_numbers<[1], [0], [0], [1], [0, 0, 1, 1], [], []>} : vector<27x8xf32>, vector<8x16xf32>, vector<27x16xf32> -> vector<27x16xf32>
    %473 = arith.addf %468, %472 : vector<27x16xf32>
    %c3_405 = arith.constant 3 : index
    %c0_406 = arith.constant 0 : index
    %474 = vector.load %arg19[%c3_405, %c0_406] : memref<34x8xf32, #tpu.memory_space<vmem>>, vector<27x8xf32>
    %c3_407 = arith.constant 3 : index
    %c0_408 = arith.constant 0 : index
    %c0_409 = arith.constant 0 : index
    %475 = vector.load %arg4[%c3_407, %c0_408, %c0_409] : memref<8x8x16xf32, #tpu.memory_space<vmem>>, vector<1x8x16xf32>
    %476 = vector.shape_cast %475 : vector<1x8x16xf32> to vector<8x16xf32>
    %cst_410 = arith.constant dense<0.000000e+00> : vector<27x16xf32>
    %477 = tpu.matmul %474, %476, %cst_410 {dimension_numbers = #tpu.dot_dimension_numbers<[1], [0], [0], [1], [0, 0, 1, 1], [], []>} : vector<27x8xf32>, vector<8x16xf32>, vector<27x16xf32> -> vector<27x16xf32>
    %478 = arith.addf %473, %477 : vector<27x16xf32>
    %c4_411 = arith.constant 4 : index
    %c0_412 = arith.constant 0 : index
    %479 = vector.load %arg19[%c4_411, %c0_412] : memref<34x8xf32, #tpu.memory_space<vmem>>, vector<27x8xf32>
    %c4_413 = arith.constant 4 : index
    %c0_414 = arith.constant 0 : index
    %c0_415 = arith.constant 0 : index
    %480 = vector.load %arg4[%c4_413, %c0_414, %c0_415] : memref<8x8x16xf32, #tpu.memory_space<vmem>>, vector<1x8x16xf32>
    %481 = vector.shape_cast %480 : vector<1x8x16xf32> to vector<8x16xf32>
    %cst_416 = arith.constant dense<0.000000e+00> : vector<27x16xf32>
    %482 = tpu.matmul %479, %481, %cst_416 {dimension_numbers = #tpu.dot_dimension_numbers<[1], [0], [0], [1], [0, 0, 1, 1], [], []>} : vector<27x8xf32>, vector<8x16xf32>, vector<27x16xf32> -> vector<27x16xf32>
    %483 = arith.addf %478, %482 : vector<27x16xf32>
    %c5_417 = arith.constant 5 : index
    %c0_418 = arith.constant 0 : index
    %484 = vector.load %arg19[%c5_417, %c0_418] : memref<34x8xf32, #tpu.memory_space<vmem>>, vector<27x8xf32>
    %c5_419 = arith.constant 5 : index
    %c0_420 = arith.constant 0 : index
    %c0_421 = arith.constant 0 : index
    %485 = vector.load %arg4[%c5_419, %c0_420, %c0_421] : memref<8x8x16xf32, #tpu.memory_space<vmem>>, vector<1x8x16xf32>
    %486 = vector.shape_cast %485 : vector<1x8x16xf32> to vector<8x16xf32>
    %cst_422 = arith.constant dense<0.000000e+00> : vector<27x16xf32>
    %487 = tpu.matmul %484, %486, %cst_422 {dimension_numbers = #tpu.dot_dimension_numbers<[1], [0], [0], [1], [0, 0, 1, 1], [], []>} : vector<27x8xf32>, vector<8x16xf32>, vector<27x16xf32> -> vector<27x16xf32>
    %488 = arith.addf %483, %487 : vector<27x16xf32>
    %c6_423 = arith.constant 6 : index
    %c0_424 = arith.constant 0 : index
    %489 = vector.load %arg19[%c6_423, %c0_424] : memref<34x8xf32, #tpu.memory_space<vmem>>, vector<27x8xf32>
    %c6_425 = arith.constant 6 : index
    %c0_426 = arith.constant 0 : index
    %c0_427 = arith.constant 0 : index
    %490 = vector.load %arg4[%c6_425, %c0_426, %c0_427] : memref<8x8x16xf32, #tpu.memory_space<vmem>>, vector<1x8x16xf32>
    %491 = vector.shape_cast %490 : vector<1x8x16xf32> to vector<8x16xf32>
    %cst_428 = arith.constant dense<0.000000e+00> : vector<27x16xf32>
    %492 = tpu.matmul %489, %491, %cst_428 {dimension_numbers = #tpu.dot_dimension_numbers<[1], [0], [0], [1], [0, 0, 1, 1], [], []>} : vector<27x8xf32>, vector<8x16xf32>, vector<27x16xf32> -> vector<27x16xf32>
    %493 = arith.addf %488, %492 : vector<27x16xf32>
    %c7_429 = arith.constant 7 : index
    %c0_430 = arith.constant 0 : index
    %494 = vector.load %arg19[%c7_429, %c0_430] : memref<34x8xf32, #tpu.memory_space<vmem>>, vector<27x8xf32>
    %c7_431 = arith.constant 7 : index
    %c0_432 = arith.constant 0 : index
    %c0_433 = arith.constant 0 : index
    %495 = vector.load %arg4[%c7_431, %c0_432, %c0_433] : memref<8x8x16xf32, #tpu.memory_space<vmem>>, vector<1x8x16xf32>
    %496 = vector.shape_cast %495 : vector<1x8x16xf32> to vector<8x16xf32>
    %cst_434 = arith.constant dense<0.000000e+00> : vector<27x16xf32>
    %497 = tpu.matmul %494, %496, %cst_434 {dimension_numbers = #tpu.dot_dimension_numbers<[1], [0], [0], [1], [0, 0, 1, 1], [], []>} : vector<27x8xf32>, vector<8x16xf32>, vector<27x16xf32> -> vector<27x16xf32>
    %498 = arith.addf %493, %497 : vector<27x16xf32>
    %c0_435 = arith.constant 0 : index
    %c0_436 = arith.constant 0 : index
    %499 = vector.load %arg5[%c0_435, %c0_436] : memref<1x16xf32, #tpu.memory_space<vmem>>, vector<1x16xf32>
    %500 = vector.broadcast %499 : vector<1x16xf32> to vector<27x16xf32>
    %501 = arith.addf %498, %500 : vector<27x16xf32>
    %502 = arith.mulf %501, %501 : vector<27x16xf32>
    %503 = arith.mulf %501, %502 : vector<27x16xf32>
    %cst_437 = arith.constant 4.471500e-02 : f32
    %504 = vector.broadcast %cst_437 : f32 to vector<27x16xf32>
    %505 = arith.mulf %504, %503 : vector<27x16xf32>
    %506 = arith.addf %501, %505 : vector<27x16xf32>
    %cst_438 = arith.constant 0.797884583 : f32
    %507 = vector.broadcast %cst_438 : f32 to vector<27x16xf32>
    %508 = arith.mulf %507, %506 : vector<27x16xf32>
    %509 = math.tanh %508 : vector<27x16xf32>
    %cst_439 = arith.constant 1.000000e+00 : f32
    %510 = vector.broadcast %cst_439 : f32 to vector<27x16xf32>
    %511 = arith.addf %510, %509 : vector<27x16xf32>
    %cst_440 = arith.constant 5.000000e-01 : f32
    %512 = vector.broadcast %cst_440 : f32 to vector<27x16xf32>
    %513 = arith.mulf %512, %511 : vector<27x16xf32>
    %514 = arith.mulf %501, %513 : vector<27x16xf32>
    %cst_441 = arith.constant 0.000000e+00 : f32
    %515 = vector.broadcast %cst_441 : f32 to vector<35x16xf32>
    %c0_442 = arith.constant 0 : index
    %c0_443 = arith.constant 0 : index
    %516 = vector.load %arg20[%c0_442, %c0_443] : memref<35x16xf32, #tpu.memory_space<vmem>>, vector<35x16xf32>
    tpu.vector_store %arg20[%c0_442, %c0_443], %515 {strides = array<i32>} : memref<35x16xf32, #tpu.memory_space<vmem>>, vector<35x16xf32>,
    %c4_444 = arith.constant 4 : index
    %c0_445 = arith.constant 0 : index
    %517 = vector.load %arg20[%c4_444, %c0_445] : memref<35x16xf32, #tpu.memory_space<vmem>>, vector<27x16xf32>
    tpu.vector_store %arg20[%c4_444, %c0_445], %514 {strides = array<i32>} : memref<35x16xf32, #tpu.memory_space<vmem>>, vector<27x16xf32>,
    %c0_446 = arith.constant 0 : index
    %c0_447 = arith.constant 0 : index
    %518 = vector.load %arg20[%c0_446, %c0_447] : memref<35x16xf32, #tpu.memory_space<vmem>>, vector<28x16xf32>
    %c0_448 = arith.constant 0 : index
    %c0_449 = arith.constant 0 : index
    %c0_450 = arith.constant 0 : index
    %519 = vector.load %arg6[%c0_448, %c0_449, %c0_450] : memref<8x16x16xf32, #tpu.memory_space<vmem>>, vector<1x16x16xf32>
    %520 = vector.shape_cast %519 : vector<1x16x16xf32> to vector<16x16xf32>
    %cst_451 = arith.constant dense<0.000000e+00> : vector<28x16xf32>
    %521 = tpu.matmul %518, %520, %cst_451 {dimension_numbers = #tpu.dot_dimension_numbers<[1], [0], [0], [1], [0, 0, 1, 1], [], []>} : vector<28x16xf32>, vector<16x16xf32>, vector<28x16xf32> -> vector<28x16xf32>
    %c1_452 = arith.constant 1 : index
    %c0_453 = arith.constant 0 : index
    %522 = vector.load %arg20[%c1_452, %c0_453] : memref<35x16xf32, #tpu.memory_space<vmem>>, vector<28x16xf32>
    %c1_454 = arith.constant 1 : index
    %c0_455 = arith.constant 0 : index
    %c0_456 = arith.constant 0 : index
    %523 = vector.load %arg6[%c1_454, %c0_455, %c0_456] : memref<8x16x16xf32, #tpu.memory_space<vmem>>, vector<1x16x16xf32>
    %524 = vector.shape_cast %523 : vector<1x16x16xf32> to vector<16x16xf32>
    %cst_457 = arith.constant dense<0.000000e+00> : vector<28x16xf32>
    %525 = tpu.matmul %522, %524, %cst_457 {dimension_numbers = #tpu.dot_dimension_numbers<[1], [0], [0], [1], [0, 0, 1, 1], [], []>} : vector<28x16xf32>, vector<16x16xf32>, vector<28x16xf32> -> vector<28x16xf32>
    %526 = arith.addf %521, %525 : vector<28x16xf32>
    %c2_458 = arith.constant 2 : index
    %c0_459 = arith.constant 0 : index
    %527 = vector.load %arg20[%c2_458, %c0_459] : memref<35x16xf32, #tpu.memory_space<vmem>>, vector<28x16xf32>
    %c2_460 = arith.constant 2 : index
    %c0_461 = arith.constant 0 : index
    %c0_462 = arith.constant 0 : index
    %528 = vector.load %arg6[%c2_460, %c0_461, %c0_462] : memref<8x16x16xf32, #tpu.memory_space<vmem>>, vector<1x16x16xf32>
    %529 = vector.shape_cast %528 : vector<1x16x16xf32> to vector<16x16xf32>
    %cst_463 = arith.constant dense<0.000000e+00> : vector<28x16xf32>
    %530 = tpu.matmul %527, %529, %cst_463 {dimension_numbers = #tpu.dot_dimension_numbers<[1], [0], [0], [1], [0, 0, 1, 1], [], []>} : vector<28x16xf32>, vector<16x16xf32>, vector<28x16xf32> -> vector<28x16xf32>
    %531 = arith.addf %526, %530 : vector<28x16xf32>
    %c3_464 = arith.constant 3 : index
    %c0_465 = arith.constant 0 : index
    %532 = vector.load %arg20[%c3_464, %c0_465] : memref<35x16xf32, #tpu.memory_space<vmem>>, vector<28x16xf32>
    %c3_466 = arith.constant 3 : index
    %c0_467 = arith.constant 0 : index
    %c0_468 = arith.constant 0 : index
    %533 = vector.load %arg6[%c3_466, %c0_467, %c0_468] : memref<8x16x16xf32, #tpu.memory_space<vmem>>, vector<1x16x16xf32>
    %534 = vector.shape_cast %533 : vector<1x16x16xf32> to vector<16x16xf32>
    %cst_469 = arith.constant dense<0.000000e+00> : vector<28x16xf32>
    %535 = tpu.matmul %532, %534, %cst_469 {dimension_numbers = #tpu.dot_dimension_numbers<[1], [0], [0], [1], [0, 0, 1, 1], [], []>} : vector<28x16xf32>, vector<16x16xf32>, vector<28x16xf32> -> vector<28x16xf32>
    %536 = arith.addf %531, %535 : vector<28x16xf32>
    %c4_470 = arith.constant 4 : index
    %c0_471 = arith.constant 0 : index
    %537 = vector.load %arg20[%c4_470, %c0_471] : memref<35x16xf32, #tpu.memory_space<vmem>>, vector<28x16xf32>
    %c4_472 = arith.constant 4 : index
    %c0_473 = arith.constant 0 : index
    %c0_474 = arith.constant 0 : index
    %538 = vector.load %arg6[%c4_472, %c0_473, %c0_474] : memref<8x16x16xf32, #tpu.memory_space<vmem>>, vector<1x16x16xf32>
    %539 = vector.shape_cast %538 : vector<1x16x16xf32> to vector<16x16xf32>
    %cst_475 = arith.constant dense<0.000000e+00> : vector<28x16xf32>
    %540 = tpu.matmul %537, %539, %cst_475 {dimension_numbers = #tpu.dot_dimension_numbers<[1], [0], [0], [1], [0, 0, 1, 1], [], []>} : vector<28x16xf32>, vector<16x16xf32>, vector<28x16xf32> -> vector<28x16xf32>
    %541 = arith.addf %536, %540 : vector<28x16xf32>
    %c5_476 = arith.constant 5 : index
    %c0_477 = arith.constant 0 : index
    %542 = vector.load %arg20[%c5_476, %c0_477] : memref<35x16xf32, #tpu.memory_space<vmem>>, vector<28x16xf32>
    %c5_478 = arith.constant 5 : index
    %c0_479 = arith.constant 0 : index
    %c0_480 = arith.constant 0 : index
    %543 = vector.load %arg6[%c5_478, %c0_479, %c0_480] : memref<8x16x16xf32, #tpu.memory_space<vmem>>, vector<1x16x16xf32>
    %544 = vector.shape_cast %543 : vector<1x16x16xf32> to vector<16x16xf32>
    %cst_481 = arith.constant dense<0.000000e+00> : vector<28x16xf32>
    %545 = tpu.matmul %542, %544, %cst_481 {dimension_numbers = #tpu.dot_dimension_numbers<[1], [0], [0], [1], [0, 0, 1, 1], [], []>} : vector<28x16xf32>, vector<16x16xf32>, vector<28x16xf32> -> vector<28x16xf32>
    %546 = arith.addf %541, %545 : vector<28x16xf32>
    %c6_482 = arith.constant 6 : index
    %c0_483 = arith.constant 0 : index
    %547 = vector.load %arg20[%c6_482, %c0_483] : memref<35x16xf32, #tpu.memory_space<vmem>>, vector<28x16xf32>
    %c6_484 = arith.constant 6 : index
    %c0_485 = arith.constant 0 : index
    %c0_486 = arith.constant 0 : index
    %548 = vector.load %arg6[%c6_484, %c0_485, %c0_486] : memref<8x16x16xf32, #tpu.memory_space<vmem>>, vector<1x16x16xf32>
    %549 = vector.shape_cast %548 : vector<1x16x16xf32> to vector<16x16xf32>
    %cst_487 = arith.constant dense<0.000000e+00> : vector<28x16xf32>
    %550 = tpu.matmul %547, %549, %cst_487 {dimension_numbers = #tpu.dot_dimension_numbers<[1], [0], [0], [1], [0, 0, 1, 1], [], []>} : vector<28x16xf32>, vector<16x16xf32>, vector<28x16xf32> -> vector<28x16xf32>
    %551 = arith.addf %546, %550 : vector<28x16xf32>
    %c7_488 = arith.constant 7 : index
    %c0_489 = arith.constant 0 : index
    %552 = vector.load %arg20[%c7_488, %c0_489] : memref<35x16xf32, #tpu.memory_space<vmem>>, vector<28x16xf32>
    %c7_490 = arith.constant 7 : index
    %c0_491 = arith.constant 0 : index
    %c0_492 = arith.constant 0 : index
    %553 = vector.load %arg6[%c7_490, %c0_491, %c0_492] : memref<8x16x16xf32, #tpu.memory_space<vmem>>, vector<1x16x16xf32>
    %554 = vector.shape_cast %553 : vector<1x16x16xf32> to vector<16x16xf32>
    %cst_493 = arith.constant dense<0.000000e+00> : vector<28x16xf32>
    %555 = tpu.matmul %552, %554, %cst_493 {dimension_numbers = #tpu.dot_dimension_numbers<[1], [0], [0], [1], [0, 0, 1, 1], [], []>} : vector<28x16xf32>, vector<16x16xf32>, vector<28x16xf32> -> vector<28x16xf32>
    %556 = arith.addf %551, %555 : vector<28x16xf32>
    %c0_494 = arith.constant 0 : index
    %c0_495 = arith.constant 0 : index
    %557 = vector.load %arg7[%c0_494, %c0_495] : memref<1x16xf32, #tpu.memory_space<vmem>>, vector<1x16xf32>
    %558 = vector.broadcast %557 : vector<1x16xf32> to vector<28x16xf32>
    %559 = arith.addf %556, %558 : vector<28x16xf32>
    %560 = arith.mulf %559, %559 : vector<28x16xf32>
    %561 = arith.mulf %559, %560 : vector<28x16xf32>
    %cst_496 = arith.constant 4.471500e-02 : f32
    %562 = vector.broadcast %cst_496 : f32 to vector<28x16xf32>
    %563 = arith.mulf %562, %561 : vector<28x16xf32>
    %564 = arith.addf %559, %563 : vector<28x16xf32>
    %cst_497 = arith.constant 0.797884583 : f32
    %565 = vector.broadcast %cst_497 : f32 to vector<28x16xf32>
    %566 = arith.mulf %565, %564 : vector<28x16xf32>
    %567 = math.tanh %566 : vector<28x16xf32>
    %cst_498 = arith.constant 1.000000e+00 : f32
    %568 = vector.broadcast %cst_498 : f32 to vector<28x16xf32>
    %569 = arith.addf %568, %567 : vector<28x16xf32>
    %cst_499 = arith.constant 5.000000e-01 : f32
    %570 = vector.broadcast %cst_499 : f32 to vector<28x16xf32>
    %571 = arith.mulf %570, %569 : vector<28x16xf32>
    %572 = arith.mulf %559, %571 : vector<28x16xf32>
    %cst_500 = arith.constant 0xFF800000 : f32
    %573 = vector.broadcast %cst_500 : f32 to vector<32x16xf32>
    %c0_501 = arith.constant 0 : index
    %c0_502 = arith.constant 0 : index
    %574 = vector.load %arg21[%c0_501, %c0_502] : memref<32x16xf32, #tpu.memory_space<vmem>>, vector<32x16xf32>
    tpu.vector_store %arg21[%c0_501, %c0_502], %573 {strides = array<i32>} : memref<32x16xf32, #tpu.memory_space<vmem>>, vector<32x16xf32>,
    %c2_503 = arith.constant 2 : index
    %c0_504 = arith.constant 0 : index
    %575 = vector.load %arg21[%c2_503, %c0_504] : memref<32x16xf32, #tpu.memory_space<vmem>>, vector<28x16xf32>
    tpu.vector_store %arg21[%c2_503, %c0_504], %572 {strides = array<i32>} : memref<32x16xf32, #tpu.memory_space<vmem>>, vector<28x16xf32>,
    %c0_505 = arith.constant 0 : index
    %c0_506 = arith.constant 0 : index
    %576 = tpu.strided_load %arg21[%c0_505, %c0_506] {strides = array<i32: 4, 1>} : memref<32x16xf32, #tpu.memory_space<vmem>>, vector<8x16xf32>
    %c1_507 = arith.constant 1 : index
    %c0_508 = arith.constant 0 : index
    %577 = tpu.strided_load %arg21[%c1_507, %c0_508] {strides = array<i32: 4, 1>} : memref<32x16xf32, #tpu.memory_space<vmem>>, vector<8x16xf32>
    %578 = arith.maximumf %576, %577 : vector<8x16xf32>
    %c2_509 = arith.constant 2 : index
    %c0_510 = arith.constant 0 : index
    %579 = tpu.strided_load %arg21[%c2_509, %c0_510] {strides = array<i32: 4, 1>} : memref<32x16xf32, #tpu.memory_space<vmem>>, vector<8x16xf32>
    %580 = arith.maximumf %578, %579 : vector<8x16xf32>
    %c3_511 = arith.constant 3 : index
    %c0_512 = arith.constant 0 : index
    %581 = tpu.strided_load %arg21[%c3_511, %c0_512] {strides = array<i32: 4, 1>} : memref<32x16xf32, #tpu.memory_space<vmem>>, vector<8x16xf32>
    %582 = arith.maximumf %580, %581 : vector<8x16xf32>
    %c1_513 = arith.constant 1 : index
    %c0_514 = arith.constant 0 : index
    %c0_515 = arith.constant 0 : index
    %583 = vector.load %arg1[%c1_513, %c0_514, %c0_515] : memref<2x26x100xf32, #tpu.memory_space<vmem>>, vector<1x26x100xf32>
    %584 = vector.shape_cast %583 : vector<1x26x100xf32> to vector<26x100xf32>
    %c0_516 = arith.constant 0 : index
    %c0_517 = arith.constant 0 : index
    %585 = vector.load %arg8[%c0_516, %c0_517] : memref<100x8xf32, #tpu.memory_space<vmem>>, vector<100x8xf32>
    %cst_518 = arith.constant dense<0.000000e+00> : vector<26x8xf32>
    %586 = tpu.matmul %584, %585, %cst_518 {dimension_numbers = #tpu.dot_dimension_numbers<[1], [0], [0], [1], [0, 0, 1, 1], [], []>} : vector<26x100xf32>, vector<100x8xf32>, vector<26x8xf32> -> vector<26x8xf32>
    %c0_519 = arith.constant 0 : index
    %c0_520 = arith.constant 0 : index
    %587 = vector.load %arg9[%c0_519, %c0_520] : memref<1x8xf32, #tpu.memory_space<vmem>>, vector<1x8xf32>
    %588 = vector.broadcast %587 : vector<1x8xf32> to vector<26x8xf32>
    %589 = arith.addf %586, %588 : vector<26x8xf32>
    %590 = arith.mulf %589, %589 : vector<26x8xf32>
    %591 = arith.mulf %589, %590 : vector<26x8xf32>
    %cst_521 = arith.constant 4.471500e-02 : f32
    %592 = vector.broadcast %cst_521 : f32 to vector<26x8xf32>
    %593 = arith.mulf %592, %591 : vector<26x8xf32>
    %594 = arith.addf %589, %593 : vector<26x8xf32>
    %cst_522 = arith.constant 0.797884583 : f32
    %595 = vector.broadcast %cst_522 : f32 to vector<26x8xf32>
    %596 = arith.mulf %595, %594 : vector<26x8xf32>
    %597 = math.tanh %596 : vector<26x8xf32>
    %cst_523 = arith.constant 1.000000e+00 : f32
    %598 = vector.broadcast %cst_523 : f32 to vector<26x8xf32>
    %599 = arith.addf %598, %597 : vector<26x8xf32>
    %cst_524 = arith.constant 5.000000e-01 : f32
    %600 = vector.broadcast %cst_524 : f32 to vector<26x8xf32>
    %601 = arith.mulf %600, %599 : vector<26x8xf32>
    %602 = arith.mulf %589, %601 : vector<26x8xf32>
    %cst_525 = arith.constant 0xFF800000 : f32
    %603 = vector.broadcast %cst_525 : f32 to vector<30x8xf32>
    %c0_526 = arith.constant 0 : index
    %c0_527 = arith.constant 0 : index
    %604 = vector.load %arg22[%c0_526, %c0_527] : memref<30x8xf32, #tpu.memory_space<vmem>>, vector<30x8xf32>
    tpu.vector_store %arg22[%c0_526, %c0_527], %603 {strides = array<i32>} : memref<30x8xf32, #tpu.memory_space<vmem>>, vector<30x8xf32>,
    %c2_528 = arith.constant 2 : index
    %c0_529 = arith.constant 0 : index
    %605 = vector.load %arg22[%c2_528, %c0_529] : memref<30x8xf32, #tpu.memory_space<vmem>>, vector<26x8xf32>
    tpu.vector_store %arg22[%c2_528, %c0_529], %602 {strides = array<i32>} : memref<30x8xf32, #tpu.memory_space<vmem>>, vector<26x8xf32>,
    %c0_530 = arith.constant 0 : index
    %c0_531 = arith.constant 0 : index
    %606 = tpu.strided_load %arg22[%c0_530, %c0_531] {strides = array<i32: 2, 1>} : memref<30x8xf32, #tpu.memory_space<vmem>>, vector<14x8xf32>
    %c1_532 = arith.constant 1 : index
    %c0_533 = arith.constant 0 : index
    %607 = tpu.strided_load %arg22[%c1_532, %c0_533] {strides = array<i32: 2, 1>} : memref<30x8xf32, #tpu.memory_space<vmem>>, vector<14x8xf32>
    %608 = arith.maximumf %606, %607 : vector<14x8xf32>
    %c2_534 = arith.constant 2 : index
    %c0_535 = arith.constant 0 : index
    %609 = tpu.strided_load %arg22[%c2_534, %c0_535] {strides = array<i32: 2, 1>} : memref<30x8xf32, #tpu.memory_space<vmem>>, vector<14x8xf32>
    %610 = arith.maximumf %608, %609 : vector<14x8xf32>
    %c3_536 = arith.constant 3 : index
    %c0_537 = arith.constant 0 : index
    %611 = tpu.strided_load %arg22[%c3_536, %c0_537] {strides = array<i32: 2, 1>} : memref<30x8xf32, #tpu.memory_space<vmem>>, vector<14x8xf32>
    %612 = arith.maximumf %610, %611 : vector<14x8xf32>
    %cst_538 = arith.constant 0.000000e+00 : f32
    %613 = vector.broadcast %cst_538 : f32 to vector<20x8xf32>
    %c0_539 = arith.constant 0 : index
    %c0_540 = arith.constant 0 : index
    %614 = vector.load %arg23[%c0_539, %c0_540] : memref<20x8xf32, #tpu.memory_space<vmem>>, vector<20x8xf32>
    tpu.vector_store %arg23[%c0_539, %c0_540], %613 {strides = array<i32>} : memref<20x8xf32, #tpu.memory_space<vmem>>, vector<20x8xf32>,
    %c3_541 = arith.constant 3 : index
    %c0_542 = arith.constant 0 : index
    %615 = vector.load %arg23[%c3_541, %c0_542] : memref<20x8xf32, #tpu.memory_space<vmem>>, vector<14x8xf32>
    tpu.vector_store %arg23[%c3_541, %c0_542], %612 {strides = array<i32>} : memref<20x8xf32, #tpu.memory_space<vmem>>, vector<14x8xf32>,
    %c0_543 = arith.constant 0 : index
    %c0_544 = arith.constant 0 : index
    %616 = vector.load %arg23[%c0_543, %c0_544] : memref<20x8xf32, #tpu.memory_space<vmem>>, vector<14x8xf32>
    %c0_545 = arith.constant 0 : index
    %c0_546 = arith.constant 0 : index
    %c0_547 = arith.constant 0 : index
    %617 = vector.load %arg10[%c0_545, %c0_546, %c0_547] : memref<7x8x16xf32, #tpu.memory_space<vmem>>, vector<1x8x16xf32>
    %618 = vector.shape_cast %617 : vector<1x8x16xf32> to vector<8x16xf32>
    %cst_548 = arith.constant dense<0.000000e+00> : vector<14x16xf32>
    %619 = tpu.matmul %616, %618, %cst_548 {dimension_numbers = #tpu.dot_dimension_numbers<[1], [0], [0], [1], [0, 0, 1, 1], [], []>} : vector<14x8xf32>, vector<8x16xf32>, vector<14x16xf32> -> vector<14x16xf32>
    %c1_549 = arith.constant 1 : index
    %c0_550 = arith.constant 0 : index
    %620 = vector.load %arg23[%c1_549, %c0_550] : memref<20x8xf32, #tpu.memory_space<vmem>>, vector<14x8xf32>
    %c1_551 = arith.constant 1 : index
    %c0_552 = arith.constant 0 : index
    %c0_553 = arith.constant 0 : index
    %621 = vector.load %arg10[%c1_551, %c0_552, %c0_553] : memref<7x8x16xf32, #tpu.memory_space<vmem>>, vector<1x8x16xf32>
    %622 = vector.shape_cast %621 : vector<1x8x16xf32> to vector<8x16xf32>
    %cst_554 = arith.constant dense<0.000000e+00> : vector<14x16xf32>
    %623 = tpu.matmul %620, %622, %cst_554 {dimension_numbers = #tpu.dot_dimension_numbers<[1], [0], [0], [1], [0, 0, 1, 1], [], []>} : vector<14x8xf32>, vector<8x16xf32>, vector<14x16xf32> -> vector<14x16xf32>
    %624 = arith.addf %619, %623 : vector<14x16xf32>
    %c2_555 = arith.constant 2 : index
    %c0_556 = arith.constant 0 : index
    %625 = vector.load %arg23[%c2_555, %c0_556] : memref<20x8xf32, #tpu.memory_space<vmem>>, vector<14x8xf32>
    %c2_557 = arith.constant 2 : index
    %c0_558 = arith.constant 0 : index
    %c0_559 = arith.constant 0 : index
    %626 = vector.load %arg10[%c2_557, %c0_558, %c0_559] : memref<7x8x16xf32, #tpu.memory_space<vmem>>, vector<1x8x16xf32>
    %627 = vector.shape_cast %626 : vector<1x8x16xf32> to vector<8x16xf32>
    %cst_560 = arith.constant dense<0.000000e+00> : vector<14x16xf32>
    %628 = tpu.matmul %625, %627, %cst_560 {dimension_numbers = #tpu.dot_dimension_numbers<[1], [0], [0], [1], [0, 0, 1, 1], [], []>} : vector<14x8xf32>, vector<8x16xf32>, vector<14x16xf32> -> vector<14x16xf32>
    %629 = arith.addf %624, %628 : vector<14x16xf32>
    %c3_561 = arith.constant 3 : index
    %c0_562 = arith.constant 0 : index
    %630 = vector.load %arg23[%c3_561, %c0_562] : memref<20x8xf32, #tpu.memory_space<vmem>>, vector<14x8xf32>
    %c3_563 = arith.constant 3 : index
    %c0_564 = arith.constant 0 : index
    %c0_565 = arith.constant 0 : index
    %631 = vector.load %arg10[%c3_563, %c0_564, %c0_565] : memref<7x8x16xf32, #tpu.memory_space<vmem>>, vector<1x8x16xf32>
    %632 = vector.shape_cast %631 : vector<1x8x16xf32> to vector<8x16xf32>
    %cst_566 = arith.constant dense<0.000000e+00> : vector<14x16xf32>
    %633 = tpu.matmul %630, %632, %cst_566 {dimension_numbers = #tpu.dot_dimension_numbers<[1], [0], [0], [1], [0, 0, 1, 1], [], []>} : vector<14x8xf32>, vector<8x16xf32>, vector<14x16xf32> -> vector<14x16xf32>
    %634 = arith.addf %629, %633 : vector<14x16xf32>
    %c4_567 = arith.constant 4 : index
    %c0_568 = arith.constant 0 : index
    %635 = vector.load %arg23[%c4_567, %c0_568] : memref<20x8xf32, #tpu.memory_space<vmem>>, vector<14x8xf32>
    %c4_569 = arith.constant 4 : index
    %c0_570 = arith.constant 0 : index
    %c0_571 = arith.constant 0 : index
    %636 = vector.load %arg10[%c4_569, %c0_570, %c0_571] : memref<7x8x16xf32, #tpu.memory_space<vmem>>, vector<1x8x16xf32>
    %637 = vector.shape_cast %636 : vector<1x8x16xf32> to vector<8x16xf32>
    %cst_572 = arith.constant dense<0.000000e+00> : vector<14x16xf32>
    %638 = tpu.matmul %635, %637, %cst_572 {dimension_numbers = #tpu.dot_dimension_numbers<[1], [0], [0], [1], [0, 0, 1, 1], [], []>} : vector<14x8xf32>, vector<8x16xf32>, vector<14x16xf32> -> vector<14x16xf32>
    %639 = arith.addf %634, %638 : vector<14x16xf32>
    %c5_573 = arith.constant 5 : index
    %c0_574 = arith.constant 0 : index
    %640 = vector.load %arg23[%c5_573, %c0_574] : memref<20x8xf32, #tpu.memory_space<vmem>>, vector<14x8xf32>
    %c5_575 = arith.constant 5 : index
    %c0_576 = arith.constant 0 : index
    %c0_577 = arith.constant 0 : index
    %641 = vector.load %arg10[%c5_575, %c0_576, %c0_577] : memref<7x8x16xf32, #tpu.memory_space<vmem>>, vector<1x8x16xf32>
    %642 = vector.shape_cast %641 : vector<1x8x16xf32> to vector<8x16xf32>
    %cst_578 = arith.constant dense<0.000000e+00> : vector<14x16xf32>
    %643 = tpu.matmul %640, %642, %cst_578 {dimension_numbers = #tpu.dot_dimension_numbers<[1], [0], [0], [1], [0, 0, 1, 1], [], []>} : vector<14x8xf32>, vector<8x16xf32>, vector<14x16xf32> -> vector<14x16xf32>
    %644 = arith.addf %639, %643 : vector<14x16xf32>
    %c6_579 = arith.constant 6 : index
    %c0_580 = arith.constant 0 : index
    %645 = vector.load %arg23[%c6_579, %c0_580] : memref<20x8xf32, #tpu.memory_space<vmem>>, vector<14x8xf32>
    %c6_581 = arith.constant 6 : index
    %c0_582 = arith.constant 0 : index
    %c0_583 = arith.constant 0 : index
    %646 = vector.load %arg10[%c6_581, %c0_582, %c0_583] : memref<7x8x16xf32, #tpu.memory_space<vmem>>, vector<1x8x16xf32>
    %647 = vector.shape_cast %646 : vector<1x8x16xf32> to vector<8x16xf32>
    %cst_584 = arith.constant dense<0.000000e+00> : vector<14x16xf32>
    %648 = tpu.matmul %645, %647, %cst_584 {dimension_numbers = #tpu.dot_dimension_numbers<[1], [0], [0], [1], [0, 0, 1, 1], [], []>} : vector<14x8xf32>, vector<8x16xf32>, vector<14x16xf32> -> vector<14x16xf32>
    %649 = arith.addf %644, %648 : vector<14x16xf32>
    %c0_585 = arith.constant 0 : index
    %c0_586 = arith.constant 0 : index
    %650 = vector.load %arg11[%c0_585, %c0_586] : memref<1x16xf32, #tpu.memory_space<vmem>>, vector<1x16xf32>
    %651 = vector.broadcast %650 : vector<1x16xf32> to vector<14x16xf32>
    %652 = arith.addf %649, %651 : vector<14x16xf32>
    %653 = arith.mulf %652, %652 : vector<14x16xf32>
    %654 = arith.mulf %652, %653 : vector<14x16xf32>
    %cst_587 = arith.constant 4.471500e-02 : f32
    %655 = vector.broadcast %cst_587 : f32 to vector<14x16xf32>
    %656 = arith.mulf %655, %654 : vector<14x16xf32>
    %657 = arith.addf %652, %656 : vector<14x16xf32>
    %cst_588 = arith.constant 0.797884583 : f32
    %658 = vector.broadcast %cst_588 : f32 to vector<14x16xf32>
    %659 = arith.mulf %658, %657 : vector<14x16xf32>
    %660 = math.tanh %659 : vector<14x16xf32>
    %cst_589 = arith.constant 1.000000e+00 : f32
    %661 = vector.broadcast %cst_589 : f32 to vector<14x16xf32>
    %662 = arith.addf %661, %660 : vector<14x16xf32>
    %cst_590 = arith.constant 5.000000e-01 : f32
    %663 = vector.broadcast %cst_590 : f32 to vector<14x16xf32>
    %664 = arith.mulf %663, %662 : vector<14x16xf32>
    %665 = arith.mulf %652, %664 : vector<14x16xf32>
    %cst_591 = arith.constant 0.000000e+00 : f32
    %666 = vector.broadcast %cst_591 : f32 to vector<20x16xf32>
    %c0_592 = arith.constant 0 : index
    %c0_593 = arith.constant 0 : index
    %667 = vector.load %arg24[%c0_592, %c0_593] : memref<20x16xf32, #tpu.memory_space<vmem>>, vector<20x16xf32>
    tpu.vector_store %arg24[%c0_592, %c0_593], %666 {strides = array<i32>} : memref<20x16xf32, #tpu.memory_space<vmem>>, vector<20x16xf32>,
    %c3_594 = arith.constant 3 : index
    %c0_595 = arith.constant 0 : index
    %668 = vector.load %arg24[%c3_594, %c0_595] : memref<20x16xf32, #tpu.memory_space<vmem>>, vector<14x16xf32>
    tpu.vector_store %arg24[%c3_594, %c0_595], %665 {strides = array<i32>} : memref<20x16xf32, #tpu.memory_space<vmem>>, vector<14x16xf32>,
    %c0_596 = arith.constant 0 : index
    %c0_597 = arith.constant 0 : index
    %669 = vector.load %arg24[%c0_596, %c0_597] : memref<20x16xf32, #tpu.memory_space<vmem>>, vector<14x16xf32>
    %c0_598 = arith.constant 0 : index
    %c0_599 = arith.constant 0 : index
    %c0_600 = arith.constant 0 : index
    %670 = vector.load %arg12[%c0_598, %c0_599, %c0_600] : memref<7x16x16xf32, #tpu.memory_space<vmem>>, vector<1x16x16xf32>
    %671 = vector.shape_cast %670 : vector<1x16x16xf32> to vector<16x16xf32>
    %cst_601 = arith.constant dense<0.000000e+00> : vector<14x16xf32>
    %672 = tpu.matmul %669, %671, %cst_601 {dimension_numbers = #tpu.dot_dimension_numbers<[1], [0], [0], [1], [0, 0, 1, 1], [], []>} : vector<14x16xf32>, vector<16x16xf32>, vector<14x16xf32> -> vector<14x16xf32>
    %c1_602 = arith.constant 1 : index
    %c0_603 = arith.constant 0 : index
    %673 = vector.load %arg24[%c1_602, %c0_603] : memref<20x16xf32, #tpu.memory_space<vmem>>, vector<14x16xf32>
    %c1_604 = arith.constant 1 : index
    %c0_605 = arith.constant 0 : index
    %c0_606 = arith.constant 0 : index
    %674 = vector.load %arg12[%c1_604, %c0_605, %c0_606] : memref<7x16x16xf32, #tpu.memory_space<vmem>>, vector<1x16x16xf32>
    %675 = vector.shape_cast %674 : vector<1x16x16xf32> to vector<16x16xf32>
    %cst_607 = arith.constant dense<0.000000e+00> : vector<14x16xf32>
    %676 = tpu.matmul %673, %675, %cst_607 {dimension_numbers = #tpu.dot_dimension_numbers<[1], [0], [0], [1], [0, 0, 1, 1], [], []>} : vector<14x16xf32>, vector<16x16xf32>, vector<14x16xf32> -> vector<14x16xf32>
    %677 = arith.addf %672, %676 : vector<14x16xf32>
    %c2_608 = arith.constant 2 : index
    %c0_609 = arith.constant 0 : index
    %678 = vector.load %arg24[%c2_608, %c0_609] : memref<20x16xf32, #tpu.memory_space<vmem>>, vector<14x16xf32>
    %c2_610 = arith.constant 2 : index
    %c0_611 = arith.constant 0 : index
    %c0_612 = arith.constant 0 : index
    %679 = vector.load %arg12[%c2_610, %c0_611, %c0_612] : memref<7x16x16xf32, #tpu.memory_space<vmem>>, vector<1x16x16xf32>
    %680 = vector.shape_cast %679 : vector<1x16x16xf32> to vector<16x16xf32>
    %cst_613 = arith.constant dense<0.000000e+00> : vector<14x16xf32>
    %681 = tpu.matmul %678, %680, %cst_613 {dimension_numbers = #tpu.dot_dimension_numbers<[1], [0], [0], [1], [0, 0, 1, 1], [], []>} : vector<14x16xf32>, vector<16x16xf32>, vector<14x16xf32> -> vector<14x16xf32>
    %682 = arith.addf %677, %681 : vector<14x16xf32>
    %c3_614 = arith.constant 3 : index
    %c0_615 = arith.constant 0 : index
    %683 = vector.load %arg24[%c3_614, %c0_615] : memref<20x16xf32, #tpu.memory_space<vmem>>, vector<14x16xf32>
    %c3_616 = arith.constant 3 : index
    %c0_617 = arith.constant 0 : index
    %c0_618 = arith.constant 0 : index
    %684 = vector.load %arg12[%c3_616, %c0_617, %c0_618] : memref<7x16x16xf32, #tpu.memory_space<vmem>>, vector<1x16x16xf32>
    %685 = vector.shape_cast %684 : vector<1x16x16xf32> to vector<16x16xf32>
    %cst_619 = arith.constant dense<0.000000e+00> : vector<14x16xf32>
    %686 = tpu.matmul %683, %685, %cst_619 {dimension_numbers = #tpu.dot_dimension_numbers<[1], [0], [0], [1], [0, 0, 1, 1], [], []>} : vector<14x16xf32>, vector<16x16xf32>, vector<14x16xf32> -> vector<14x16xf32>
    %687 = arith.addf %682, %686 : vector<14x16xf32>
    %c4_620 = arith.constant 4 : index
    %c0_621 = arith.constant 0 : index
    %688 = vector.load %arg24[%c4_620, %c0_621] : memref<20x16xf32, #tpu.memory_space<vmem>>, vector<14x16xf32>
    %c4_622 = arith.constant 4 : index
    %c0_623 = arith.constant 0 : index
    %c0_624 = arith.constant 0 : index
    %689 = vector.load %arg12[%c4_622, %c0_623, %c0_624] : memref<7x16x16xf32, #tpu.memory_space<vmem>>, vector<1x16x16xf32>
    %690 = vector.shape_cast %689 : vector<1x16x16xf32> to vector<16x16xf32>
    %cst_625 = arith.constant dense<0.000000e+00> : vector<14x16xf32>
    %691 = tpu.matmul %688, %690, %cst_625 {dimension_numbers = #tpu.dot_dimension_numbers<[1], [0], [0], [1], [0, 0, 1, 1], [], []>} : vector<14x16xf32>, vector<16x16xf32>, vector<14x16xf32> -> vector<14x16xf32>
    %692 = arith.addf %687, %691 : vector<14x16xf32>
    %c5_626 = arith.constant 5 : index
    %c0_627 = arith.constant 0 : index
    %693 = vector.load %arg24[%c5_626, %c0_627] : memref<20x16xf32, #tpu.memory_space<vmem>>, vector<14x16xf32>
    %c5_628 = arith.constant 5 : index
    %c0_629 = arith.constant 0 : index
    %c0_630 = arith.constant 0 : index
    %694 = vector.load %arg12[%c5_628, %c0_629, %c0_630] : memref<7x16x16xf32, #tpu.memory_space<vmem>>, vector<1x16x16xf32>
    %695 = vector.shape_cast %694 : vector<1x16x16xf32> to vector<16x16xf32>
    %cst_631 = arith.constant dense<0.000000e+00> : vector<14x16xf32>
    %696 = tpu.matmul %693, %695, %cst_631 {dimension_numbers = #tpu.dot_dimension_numbers<[1], [0], [0], [1], [0, 0, 1, 1], [], []>} : vector<14x16xf32>, vector<16x16xf32>, vector<14x16xf32> -> vector<14x16xf32>
    %697 = arith.addf %692, %696 : vector<14x16xf32>
    %c6_632 = arith.constant 6 : index
    %c0_633 = arith.constant 0 : index
    %698 = vector.load %arg24[%c6_632, %c0_633] : memref<20x16xf32, #tpu.memory_space<vmem>>, vector<14x16xf32>
    %c6_634 = arith.constant 6 : index
    %c0_635 = arith.constant 0 : index
    %c0_636 = arith.constant 0 : index
    %699 = vector.load %arg12[%c6_634, %c0_635, %c0_636] : memref<7x16x16xf32, #tpu.memory_space<vmem>>, vector<1x16x16xf32>
    %700 = vector.shape_cast %699 : vector<1x16x16xf32> to vector<16x16xf32>
    %cst_637 = arith.constant dense<0.000000e+00> : vector<14x16xf32>
    %701 = tpu.matmul %698, %700, %cst_637 {dimension_numbers = #tpu.dot_dimension_numbers<[1], [0], [0], [1], [0, 0, 1, 1], [], []>} : vector<14x16xf32>, vector<16x16xf32>, vector<14x16xf32> -> vector<14x16xf32>
    %702 = arith.addf %697, %701 : vector<14x16xf32>
    %c0_638 = arith.constant 0 : index
    %c0_639 = arith.constant 0 : index
    %703 = vector.load %arg13[%c0_638, %c0_639] : memref<1x16xf32, #tpu.memory_space<vmem>>, vector<1x16xf32>
    %704 = vector.broadcast %703 : vector<1x16xf32> to vector<14x16xf32>
    %705 = arith.addf %702, %704 : vector<14x16xf32>
    %706 = arith.mulf %705, %705 : vector<14x16xf32>
    %707 = arith.mulf %705, %706 : vector<14x16xf32>
    %cst_640 = arith.constant 4.471500e-02 : f32
    %708 = vector.broadcast %cst_640 : f32 to vector<14x16xf32>
    %709 = arith.mulf %708, %707 : vector<14x16xf32>
    %710 = arith.addf %705, %709 : vector<14x16xf32>
    %cst_641 = arith.constant 0.797884583 : f32
    %711 = vector.broadcast %cst_641 : f32 to vector<14x16xf32>
    %712 = arith.mulf %711, %710 : vector<14x16xf32>
    %713 = math.tanh %712 : vector<14x16xf32>
    %cst_642 = arith.constant 1.000000e+00 : f32
    %714 = vector.broadcast %cst_642 : f32 to vector<14x16xf32>
    %715 = arith.addf %714, %713 : vector<14x16xf32>
    %cst_643 = arith.constant 5.000000e-01 : f32
    %716 = vector.broadcast %cst_643 : f32 to vector<14x16xf32>
    %717 = arith.mulf %716, %715 : vector<14x16xf32>
    %718 = arith.mulf %705, %717 : vector<14x16xf32>
    %cst_644 = arith.constant 0xFF800000 : f32
    %719 = vector.broadcast %cst_644 : f32 to vector<16x16xf32>
    %c0_645 = arith.constant 0 : index
    %c0_646 = arith.constant 0 : index
    %720 = vector.load %arg25[%c0_645, %c0_646] : memref<16x16xf32, #tpu.memory_space<vmem>>, vector<16x16xf32>
    tpu.vector_store %arg25[%c0_645, %c0_646], %719 {strides = array<i32>} : memref<16x16xf32, #tpu.memory_space<vmem>>, vector<16x16xf32>,
    %c1_647 = arith.constant 1 : index
    %c0_648 = arith.constant 0 : index
    %721 = vector.load %arg25[%c1_647, %c0_648] : memref<16x16xf32, #tpu.memory_space<vmem>>, vector<14x16xf32>
    tpu.vector_store %arg25[%c1_647, %c0_648], %718 {strides = array<i32>} : memref<16x16xf32, #tpu.memory_space<vmem>>, vector<14x16xf32>,
    %c0_649 = arith.constant 0 : index
    %c0_650 = arith.constant 0 : index
    %722 = tpu.strided_load %arg25[%c0_649, %c0_650] {strides = array<i32: 2, 1>} : memref<16x16xf32, #tpu.memory_space<vmem>>, vector<8x16xf32>
    %c1_651 = arith.constant 1 : index
    %c0_652 = arith.constant 0 : index
    %723 = tpu.strided_load %arg25[%c1_651, %c0_652] {strides = array<i32: 2, 1>} : memref<16x16xf32, #tpu.memory_space<vmem>>, vector<8x16xf32>
    %724 = arith.maximumf %722, %723 : vector<8x16xf32>
    %c0_653 = arith.constant 0 : index
    %c0_654 = arith.constant 0 : index
    %725 = vector.load %arg16[%c0_653, %c0_654] : memref<1x5xf32, #tpu.memory_space<vmem>>, vector<1x5xf32>
    %c0_655 = arith.constant 0 : index
    %c0_656 = arith.constant 0 : index
    %c0_657 = arith.constant 0 : index
    %726 = vector.load %arg14[%c0_655, %c0_656, %c0_657] : memref<5x8x16xf32, #tpu.memory_space<vmem>>, vector<1x8x16xf32>
    %727 = vector.shape_cast %726 : vector<1x8x16xf32> to vector<8x16xf32>
    %728 = arith.mulf %582, %727 : vector<8x16xf32>
    %cst_658 = arith.constant dense<0.000000e+00> : vector<8xf32>
    %729 = vector.multi_reduction <add>, %728, %cst_658 [1] : vector<8x16xf32> to vector<8xf32>
    %730 = vector.shape_cast %729 : vector<8xf32> to vector<8x1xf32>
    %cst_659 = arith.constant dense<0.000000e+00> : vector<1xf32>
    %731 = vector.multi_reduction <add>, %730, %cst_659 [0] : vector<8x1xf32> to vector<1xf32>
    %732 = vector.shape_cast %731 : vector<1xf32> to vector<1x1xf32>
    %c0_660 = arith.constant 0 : index
    %c0_661 = arith.constant 0 : index
    %c0_662 = arith.constant 0 : index
    %733 = vector.load %arg15[%c0_660, %c0_661, %c0_662] : memref<5x8x16xf32, #tpu.memory_space<vmem>>, vector<1x8x16xf32>
    %734 = vector.shape_cast %733 : vector<1x8x16xf32> to vector<8x16xf32>
    %735 = arith.mulf %724, %734 : vector<8x16xf32>
    %cst_663 = arith.constant dense<0.000000e+00> : vector<8xf32>
    %736 = vector.multi_reduction <add>, %735, %cst_663 [1] : vector<8x16xf32> to vector<8xf32>
    %737 = vector.shape_cast %736 : vector<8xf32> to vector<8x1xf32>
    %cst_664 = arith.constant dense<0.000000e+00> : vector<1xf32>
    %738 = vector.multi_reduction <add>, %737, %cst_664 [0] : vector<8x1xf32> to vector<1xf32>
    %739 = vector.shape_cast %738 : vector<1xf32> to vector<1x1xf32>
    %740 = arith.addf %732, %739 : vector<1x1xf32>
    %c0_i32_665 = arith.constant 0 : i32
    %741 = vector.broadcast %c0_i32_665 : i32 to vector<1x5xi32>
    %742 = arith.cmpi eq, %0, %741 : vector<1x5xi32>
    %743 = arith.extui %742 : vector<1x5xi1> to vector<1x5xi32>
    %744 = arith.sitofp %743 : vector<1x5xi32> to vector<1x5xf32>
    %745 = vector.broadcast %740 : vector<1x1xf32> to vector<1x5xf32>
    %746 = arith.mulf %745, %744 : vector<1x5xf32>
    %747 = arith.addf %725, %746 : vector<1x5xf32>
    %c1_666 = arith.constant 1 : index
    %c0_667 = arith.constant 0 : index
    %c0_668 = arith.constant 0 : index
    %748 = vector.load %arg14[%c1_666, %c0_667, %c0_668] : memref<5x8x16xf32, #tpu.memory_space<vmem>>, vector<1x8x16xf32>
    %749 = vector.shape_cast %748 : vector<1x8x16xf32> to vector<8x16xf32>
    %750 = arith.mulf %582, %749 : vector<8x16xf32>
    %cst_669 = arith.constant dense<0.000000e+00> : vector<8xf32>
    %751 = vector.multi_reduction <add>, %750, %cst_669 [1] : vector<8x16xf32> to vector<8xf32>
    %752 = vector.shape_cast %751 : vector<8xf32> to vector<8x1xf32>
    %cst_670 = arith.constant dense<0.000000e+00> : vector<1xf32>
    %753 = vector.multi_reduction <add>, %752, %cst_670 [0] : vector<8x1xf32> to vector<1xf32>
    %754 = vector.shape_cast %753 : vector<1xf32> to vector<1x1xf32>
    %c1_671 = arith.constant 1 : index
    %c0_672 = arith.constant 0 : index
    %c0_673 = arith.constant 0 : index
    %755 = vector.load %arg15[%c1_671, %c0_672, %c0_673] : memref<5x8x16xf32, #tpu.memory_space<vmem>>, vector<1x8x16xf32>
    %756 = vector.shape_cast %755 : vector<1x8x16xf32> to vector<8x16xf32>
    %757 = arith.mulf %724, %756 : vector<8x16xf32>
    %cst_674 = arith.constant dense<0.000000e+00> : vector<8xf32>
    %758 = vector.multi_reduction <add>, %757, %cst_674 [1] : vector<8x16xf32> to vector<8xf32>
    %759 = vector.shape_cast %758 : vector<8xf32> to vector<8x1xf32>
    %cst_675 = arith.constant dense<0.000000e+00> : vector<1xf32>
    %760 = vector.multi_reduction <add>, %759, %cst_675 [0] : vector<8x1xf32> to vector<1xf32>
    %761 = vector.shape_cast %760 : vector<1xf32> to vector<1x1xf32>
    %762 = arith.addf %754, %761 : vector<1x1xf32>
    %c1_i32_676 = arith.constant 1 : i32
    %763 = vector.broadcast %c1_i32_676 : i32 to vector<1x5xi32>
    %764 = arith.cmpi eq, %0, %763 : vector<1x5xi32>
    %765 = arith.extui %764 : vector<1x5xi1> to vector<1x5xi32>
    %766 = arith.sitofp %765 : vector<1x5xi32> to vector<1x5xf32>
    %767 = vector.broadcast %762 : vector<1x1xf32> to vector<1x5xf32>
    %768 = arith.mulf %767, %766 : vector<1x5xf32>
    %769 = arith.addf %747, %768 : vector<1x5xf32>
    %c2_677 = arith.constant 2 : index
    %c0_678 = arith.constant 0 : index
    %c0_679 = arith.constant 0 : index
    %770 = vector.load %arg14[%c2_677, %c0_678, %c0_679] : memref<5x8x16xf32, #tpu.memory_space<vmem>>, vector<1x8x16xf32>
    %771 = vector.shape_cast %770 : vector<1x8x16xf32> to vector<8x16xf32>
    %772 = arith.mulf %582, %771 : vector<8x16xf32>
    %cst_680 = arith.constant dense<0.000000e+00> : vector<8xf32>
    %773 = vector.multi_reduction <add>, %772, %cst_680 [1] : vector<8x16xf32> to vector<8xf32>
    %774 = vector.shape_cast %773 : vector<8xf32> to vector<8x1xf32>
    %cst_681 = arith.constant dense<0.000000e+00> : vector<1xf32>
    %775 = vector.multi_reduction <add>, %774, %cst_681 [0] : vector<8x1xf32> to vector<1xf32>
    %776 = vector.shape_cast %775 : vector<1xf32> to vector<1x1xf32>
    %c2_682 = arith.constant 2 : index
    %c0_683 = arith.constant 0 : index
    %c0_684 = arith.constant 0 : index
    %777 = vector.load %arg15[%c2_682, %c0_683, %c0_684] : memref<5x8x16xf32, #tpu.memory_space<vmem>>, vector<1x8x16xf32>
    %778 = vector.shape_cast %777 : vector<1x8x16xf32> to vector<8x16xf32>
    %779 = arith.mulf %724, %778 : vector<8x16xf32>
    %cst_685 = arith.constant dense<0.000000e+00> : vector<8xf32>
    %780 = vector.multi_reduction <add>, %779, %cst_685 [1] : vector<8x16xf32> to vector<8xf32>
    %781 = vector.shape_cast %780 : vector<8xf32> to vector<8x1xf32>
    %cst_686 = arith.constant dense<0.000000e+00> : vector<1xf32>
    %782 = vector.multi_reduction <add>, %781, %cst_686 [0] : vector<8x1xf32> to vector<1xf32>
    %783 = vector.shape_cast %782 : vector<1xf32> to vector<1x1xf32>
    %784 = arith.addf %776, %783 : vector<1x1xf32>
    %c2_i32_687 = arith.constant 2 : i32
    %785 = vector.broadcast %c2_i32_687 : i32 to vector<1x5xi32>
    %786 = arith.cmpi eq, %0, %785 : vector<1x5xi32>
    %787 = arith.extui %786 : vector<1x5xi1> to vector<1x5xi32>
    %788 = arith.sitofp %787 : vector<1x5xi32> to vector<1x5xf32>
    %789 = vector.broadcast %784 : vector<1x1xf32> to vector<1x5xf32>
    %790 = arith.mulf %789, %788 : vector<1x5xf32>
    %791 = arith.addf %769, %790 : vector<1x5xf32>
    %c3_688 = arith.constant 3 : index
    %c0_689 = arith.constant 0 : index
    %c0_690 = arith.constant 0 : index
    %792 = vector.load %arg14[%c3_688, %c0_689, %c0_690] : memref<5x8x16xf32, #tpu.memory_space<vmem>>, vector<1x8x16xf32>
    %793 = vector.shape_cast %792 : vector<1x8x16xf32> to vector<8x16xf32>
    %794 = arith.mulf %582, %793 : vector<8x16xf32>
    %cst_691 = arith.constant dense<0.000000e+00> : vector<8xf32>
    %795 = vector.multi_reduction <add>, %794, %cst_691 [1] : vector<8x16xf32> to vector<8xf32>
    %796 = vector.shape_cast %795 : vector<8xf32> to vector<8x1xf32>
    %cst_692 = arith.constant dense<0.000000e+00> : vector<1xf32>
    %797 = vector.multi_reduction <add>, %796, %cst_692 [0] : vector<8x1xf32> to vector<1xf32>
    %798 = vector.shape_cast %797 : vector<1xf32> to vector<1x1xf32>
    %c3_693 = arith.constant 3 : index
    %c0_694 = arith.constant 0 : index
    %c0_695 = arith.constant 0 : index
    %799 = vector.load %arg15[%c3_693, %c0_694, %c0_695] : memref<5x8x16xf32, #tpu.memory_space<vmem>>, vector<1x8x16xf32>
    %800 = vector.shape_cast %799 : vector<1x8x16xf32> to vector<8x16xf32>
    %801 = arith.mulf %724, %800 : vector<8x16xf32>
    %cst_696 = arith.constant dense<0.000000e+00> : vector<8xf32>
    %802 = vector.multi_reduction <add>, %801, %cst_696 [1] : vector<8x16xf32> to vector<8xf32>
    %803 = vector.shape_cast %802 : vector<8xf32> to vector<8x1xf32>
    %cst_697 = arith.constant dense<0.000000e+00> : vector<1xf32>
    %804 = vector.multi_reduction <add>, %803, %cst_697 [0] : vector<8x1xf32> to vector<1xf32>
    %805 = vector.shape_cast %804 : vector<1xf32> to vector<1x1xf32>
    %806 = arith.addf %798, %805 : vector<1x1xf32>
    %c3_i32_698 = arith.constant 3 : i32
    %807 = vector.broadcast %c3_i32_698 : i32 to vector<1x5xi32>
    %808 = arith.cmpi eq, %0, %807 : vector<1x5xi32>
    %809 = arith.extui %808 : vector<1x5xi1> to vector<1x5xi32>
    %810 = arith.sitofp %809 : vector<1x5xi32> to vector<1x5xf32>
    %811 = vector.broadcast %806 : vector<1x1xf32> to vector<1x5xf32>
    %812 = arith.mulf %811, %810 : vector<1x5xf32>
    %813 = arith.addf %791, %812 : vector<1x5xf32>
    %c4_699 = arith.constant 4 : index
    %c0_700 = arith.constant 0 : index
    %c0_701 = arith.constant 0 : index
    %814 = vector.load %arg14[%c4_699, %c0_700, %c0_701] : memref<5x8x16xf32, #tpu.memory_space<vmem>>, vector<1x8x16xf32>
    %815 = vector.shape_cast %814 : vector<1x8x16xf32> to vector<8x16xf32>
    %816 = arith.mulf %582, %815 : vector<8x16xf32>
    %cst_702 = arith.constant dense<0.000000e+00> : vector<8xf32>
    %817 = vector.multi_reduction <add>, %816, %cst_702 [1] : vector<8x16xf32> to vector<8xf32>
    %818 = vector.shape_cast %817 : vector<8xf32> to vector<8x1xf32>
    %cst_703 = arith.constant dense<0.000000e+00> : vector<1xf32>
    %819 = vector.multi_reduction <add>, %818, %cst_703 [0] : vector<8x1xf32> to vector<1xf32>
    %820 = vector.shape_cast %819 : vector<1xf32> to vector<1x1xf32>
    %c4_704 = arith.constant 4 : index
    %c0_705 = arith.constant 0 : index
    %c0_706 = arith.constant 0 : index
    %821 = vector.load %arg15[%c4_704, %c0_705, %c0_706] : memref<5x8x16xf32, #tpu.memory_space<vmem>>, vector<1x8x16xf32>
    %822 = vector.shape_cast %821 : vector<1x8x16xf32> to vector<8x16xf32>
    %823 = arith.mulf %724, %822 : vector<8x16xf32>
    %cst_707 = arith.constant dense<0.000000e+00> : vector<8xf32>
    %824 = vector.multi_reduction <add>, %823, %cst_707 [1] : vector<8x16xf32> to vector<8xf32>
    %825 = vector.shape_cast %824 : vector<8xf32> to vector<8x1xf32>
    %cst_708 = arith.constant dense<0.000000e+00> : vector<1xf32>
    %826 = vector.multi_reduction <add>, %825, %cst_708 [0] : vector<8x1xf32> to vector<1xf32>
    %827 = vector.shape_cast %826 : vector<1xf32> to vector<1x1xf32>
    %828 = arith.addf %820, %827 : vector<1x1xf32>
    %c4_i32_709 = arith.constant 4 : i32
    %829 = vector.broadcast %c4_i32_709 : i32 to vector<1x5xi32>
    %830 = arith.cmpi eq, %0, %829 : vector<1x5xi32>
    %831 = arith.extui %830 : vector<1x5xi1> to vector<1x5xi32>
    %832 = arith.sitofp %831 : vector<1x5xi32> to vector<1x5xf32>
    %833 = vector.broadcast %828 : vector<1x1xf32> to vector<1x5xf32>
    %834 = arith.mulf %833, %832 : vector<1x5xf32>
    %835 = arith.addf %813, %834 : vector<1x5xf32>
    %c1_710 = arith.constant 1 : index
    %c0_711 = arith.constant 0 : index
    %836 = vector.load %arg17[%c1_710, %c0_711] : memref<2x5xf32, #tpu.memory_space<vmem>>, vector<1x5xf32>
    tpu.vector_store %arg17[%c1_710, %c0_711], %835 {strides = array<i32>} : memref<2x5xf32, #tpu.memory_space<vmem>>, vector<1x5xf32>,
    return
  }
}

</mosaic_0001>

<bundles_post_ra>
// kernel: model_grey_forward.1
= control target key start
LH: loop header
LB: loop body
LE: loop exit
PB: predicated region body
PF: predicated region fallthrough
CT: control target
= control target key end

     0   :  { %s10712_s0 = inlined_call_operand.vmem [shape: f32[2,50,50], index: 0, kind: input, shape index: {}]   ;;  %s10713_s1 = inlined_call_operand.vmem [shape: f32[2,26,100], index: 1, kind: input, shape index: {}]   ;;  %s10714_s2 = inlined_call_operand.vmem [shape: f32[50,8], index: 2, kind: input, shape index: {}]   ;;  %s10715_s3 = inlined_call_operand.vmem [shape: f32[1,8], index: 3, kind: input, shape index: {}]   ;;  %s10716_s4 = inlined_call_operand.vmem [shape: f32[8,8,16], index: 4, kind: input, shape index: {}]   ;;  %s10717_s5 = inlined_call_operand.vmem [shape: f32[1,16], index: 5, kind: input, shape index: {}]   ;;  %s10718_s6 = inlined_call_operand.vmem [shape: f32[8,16,16], index: 6, kind: input, shape index: {}]   ;;  %s10719_s7 = inlined_call_operand.vmem [shape: f32[1,16], index: 7, kind: input, shape index: {}]   ;;  %s10720_s8 = inlined_call_operand.vmem [shape: f32[100,8], index: 8, kind: input, shape index: {}]   ;;  %s10721_s9 = inlined_call_operand.vmem [shape: f32[1,8], index: 9, kind: input, shape index: {}]   ;;  %s10722_s10 = inlined_call_operand.vmem [shape: f32[7,8,16], index: 10, kind: input, shape index: {}]   ;;  %s10723_s11 = inlined_call_operand.vmem [shape: f32[1,16], index: 11, kind: input, shape index: {}]   ;;  %s10724_s12 = inlined_call_operand.vmem [shape: f32[7,16,16], index: 12, kind: input, shape index: {}]   ;;  %s10725_s13 = inlined_call_operand.vmem [shape: f32[1,16], index: 13, kind: input, shape index: {}]   ;;  %s10726_s14 = inlined_call_operand.vmem [shape: f32[5,8,16], index: 14, kind: input, shape index: {}]   ;;  %s10727_s15 = inlined_call_operand.vmem [shape: f32[5,8,16], index: 15, kind: input, shape index: {}]   ;;  %s10728_s16 = inlined_call_operand.vmem [shape: f32[1,5], index: 16, kind: input, shape index: {}]   ;;  %s10729_s17 = inlined_call_operand.hbm [shape: f32[2,5], index: 17, kind: output, shape index: {}]  }
   0x1   :  { %10732 = sst [smem:[#allocation13_spill]] %s10712_s0 }
   0x2   :  { %10733 = sst [smem:[#allocation14_spill]] %s10713_s1 }
   0x3   :  { %v66_v0 = vld [vmem:[%s10714_s2] sm:$0xff]  ;;  %v67_v1 = vld [vmem:[%s10714_s2 + $0x8] sm:$0xff]  ;;  %v68_v2 = vld [vmem:[%s10714_s2 + $0x10] sm:$0xff]  ;;  %v9266_v3 = vmov 0.0|0.0   ;;  %vm9267_vm0 = vmmov 0   ;;  %v9268_v6 = vmov 0.0  }
   0x4   :  { %8799 = vmatprep.subr.bf16.mxu0 %v9266_v3  ;;  %v8800_v4 = vpack.c.bf16 %v67_v1, %v66_v0  ;;  %v69_v5 = vld [vmem:[%s10714_s2 + $0x18] sm:$0xff]  ;;  %8223 = vmatprep.mubr.msk.f32.mxu0 %vm9267_vm0, %v9268_v6  ;;  %v70_v8 = vld [vmem:[%s10714_s2 + $0x20] sm:$0xff]  ;;  %v71_v9 = vld [vmem:[%s10714_s2 + $0x28] sm:$0xff] }
   0x5   :  { %v8803_v7 = vpack.c.bf16 %v69_v5, %v68_v2 }
   0x6   :  { %8801 = vmatpush3.bf16.msra.mxu0 %v8800_v4 }
   0x7   :  { %8802 = vmatprep.subr.bf16.mxu0 %v9266_v3 }
   0x8   :  { %22 = vsyncpa [#allocation11], 0  ;;  %v8806_v10 = vpack.c.bf16 %v71_v9, %v70_v8  ;;  %v72_v11 = vld [vmem:[%s10714_s2 + $0x30] sm:$0x3]  ;;  %vm102_vm1 = vcmask 1041408   ;;  %s10734_s25 = sld [smem:[#allocation13_spill]] }
   0x9   :  { %vm80_vm2 = vcmask 408576   ;;  %vm269_vm3 = vcmask 64512   ;;  %v9269_v19 = vmov -inf   ;;  %vm277_vm4 = vcmask 58368   ;;  %v7550_v20 = vld [vmem:[%s10716_s4 + $0x8] sm:$0xff]  ;;  %v9471_v21 = vld [vmem:[%s10716_s4] sm:$0xff] }
   0xa   :  { %8804 = vmatpush3.bf16.msra.mxu0 %v8803_v7  ;;  %270 = vst.msk [vmem:[#allocation2] sm:$0xff] %vm269_vm3, %v9269_v19  ;;  %271 = vst.msk [vmem:[#allocation2 + $0x8] sm:$0xff] %vm269_vm3, %v9269_v19  ;;  %8244 = vmatprep.subr.mxu1 %v7550_v20  ;;  %v7541_v24 = vld [vmem:[%s10715_s3] ss:$0 sm:$0xff]  ;;  %s10735_s28 = sld [smem:[#allocation14_spill]]  ;;  %vm2236_vm5 = vcmask 818176  }
   0xb   :  { %8805 = vmatprep.subr.bf16.mxu0 %v9266_v3  ;;  %272 = vst.msk [vmem:[#allocation2 + $0x10] sm:$0xff] %vm269_vm3, %v9269_v19  ;;  %273 = vst.msk [vmem:[#allocation2 + $0x18] sm:$0xff] %vm269_vm3, %v9269_v19  ;;  %8245 = vmatpush3.msra.mxu1 %v7550_v20  ;;  %vm2249_vm6 = vcmask 1043456   ;;  %vm1280_vm7 = vcmask 130048   ;;  %vm1285_vm8 = vcmask 124928   ;;  %vm2377_vm9 = vcmask 62464  }
   0xc   :  { %274 = vst.msk [vmem:[#allocation2 + $0x20] sm:$0xff] %vm269_vm3, %v9269_v19  ;;  %275 = vst.msk [vmem:[#allocation2 + $0x28] sm:$0xff] %vm269_vm3, %v9269_v19  ;;  %8252 = vmatprep.subr.mxu1 %v9471_v21  ;;  %vm2406_vm10 = vcmask 60416   ;;  %vm2200_vm11 = vcmask 125952   ;;  %vm3045_vm12 = vcmask 128000   ;;  %s9270_s19 = smov [#allocation10]  }
   0xd   :  { %276 = vst.msk [vmem:[#allocation2 + $0x30] sm:$0xff] %vm269_vm3, %v9269_v19  ;;  %377 = vst.msk [vmem:[#allocation3] sm:$0xff] %vm269_vm3, %v9268_v6 }
   0xe   :  { %8807 = vmatpush3.bf16.msra.mxu0 %v8806_v10  ;;  %v59_v12 = vld [vmem:[%s10734_s25] sm:$0xff]  ;;  %v60_v13 = vld [vmem:[%s10734_s25 + $0x8] sm:$0xff]  ;;  %v61_v14 = vld [vmem:[%s10734_s25 + $0x10] sm:$0xff]  ;;  %378 = vst.msk [vmem:[#allocation3 + $0x8] sm:$0xff] %vm269_vm3, %v9268_v6 }
   0xf   :  { %8221 = vmatprep.subr.mxu0 %v9268_v6  ;;  %v62_v15 = vld [vmem:[%s10734_s25 + $0x18] sm:$0xff]  ;;  %v63_v16 = vld [vmem:[%s10734_s25 + $0x20] sm:$0xff]  ;;  %v64_v17 = vld [vmem:[%s10734_s25 + $0x28] sm:$0xff]  ;;  %379 = vst.msk [vmem:[#allocation3 + $0x10] sm:$0xff] %vm269_vm3, %v9268_v6 }
  0x10   :  { %v65_v18 = vld [vmem:[%s10734_s25 + $0x30] sm:$0x3]  ;;  %380 = vst.msk [vmem:[#allocation3 + $0x18] sm:$0xff] %vm269_vm3, %v9268_v6  ;;  %2374 = vst.msk [vmem:[#allocation6] sm:$0xff] %vm269_vm3, %v9269_v19 }
  0x11   :  { %2375 = vst.msk [vmem:[#allocation6 + $0x8] sm:$0xff] %vm269_vm3, %v9269_v19  ;;  %2376 = vst.msk [vmem:[#allocation6 + $0x10] sm:$0xff] %vm269_vm3, %v9269_v19 }
  0x12   :  { %8222 = vmatpush3.msk.msra.mxu0 %vm102_vm1, %v72_v11  ;;  %2404 = vst.msk [vmem:[#allocation7] sm:$0xff] %vm269_vm3, %v9268_v6  ;;  %2405 = vst.msk [vmem:[#allocation7 + $0x8] sm:$0xff] %vm269_vm3, %v9268_v6 }
  0x13   :  { %8224 = vmatmul.mubr.msk.f32.vlgmr.msra.gmra.mrb[0].mxu0 %vm80_vm2, %v59_v12  ;;  %278 = vst.msk [vmem:[#allocation2 + $0x38] sm:$0x3] %vm277_vm4, %v9269_v19  ;;  %381 = vst.msk [vmem:[#allocation3 + $0x20] sm:$0x3] %vm277_vm4, %v9268_v6 }
  0x14   :  { %8226 = vmatprep.mubr.msk.f32.mxu0 %vm9267_vm0, %v9268_v6  ;;  %1282 = vst.msk [vmem:[#allocation4 + $0x8] sm:$0xff] %vm1280_vm7, %v9268_v6  ;;  %1283 = vst.msk [vmem:[#allocation4 + $0x10] sm:$0xff] %vm1280_vm7, %v9268_v6 }
  0x15   :  { %1281 = vst.msk [vmem:[#allocation4] sm:$0xff] %vm1280_vm7, %v9268_v6  ;;  %1284 = vst.msk [vmem:[#allocation4 + $0x18] sm:$0xff] %vm1280_vm7, %v9268_v6 }
  0x16   :  { %2193 = vst.msk [vmem:[#allocation5] sm:$0xff] %vm1280_vm7, %v9269_v19  ;;  %2194 = vst.msk [vmem:[#allocation5 + $0x8] sm:$0xff] %vm1280_vm7, %v9269_v19 }
  0x17   :  { %8227 = vmatmul.mubr.msk.f32.gmra.mrb[2].mxu0 %vm80_vm2, %v60_v13  ;;  %2195 = vst.msk [vmem:[#allocation5 + $0x10] sm:$0xff] %vm1280_vm7, %v9269_v19  ;;  %2196 = vst.msk [vmem:[#allocation5 + $0x18] sm:$0xff] %vm1280_vm7, %v9269_v19 }
  0x18   :  { %8229 = vmatprep.mubr.msk.f32.mxu0 %vm9267_vm0, %v9268_v6  ;;  %3041 = vst.msk [vmem:[#allocation8] sm:$0xff] %vm1280_vm7, %v9268_v6  ;;  %3042 = vst.msk [vmem:[#allocation8 + $0x8] sm:$0xff] %vm1280_vm7, %v9268_v6 }
  0x19   :  { %3685 = vst.msk [vmem:[#allocation9] sm:$0xff] %vm1280_vm7, %v9269_v19  ;;  %3686 = vst.msk [vmem:[#allocation9 + $0x8] sm:$0xff] %vm1280_vm7, %v9269_v19 }
  0x1a   :  { %v9474_v22 = vld [vmem:[#allocation2 + $0x36] ss:$2 sm:$0x3]  ;;  %v9476_v23 = vld [vmem:[#allocation2 + $0x37] ss:$2 sm:$0x3] }
  0x1b   :  { %8230 = vmatmul.mubr.msk.f32.gmra.mrb[4].mxu0 %vm80_vm2, %v61_v14  ;;  %4060 = vst.msk [vmem:[#allocation2 + $0x38] sm:$0x3] %vm277_vm4, %v9269_v19  ;;  %v9487_v36 = vld [vmem:[#allocation3 + $0x1e] sm:$0x7] }
  0x1c   :  { %8232 = vmatprep.mubr.msk.f32.mxu0 %vm9267_vm0, %v9268_v6  ;;  %v9489_v37 = vld [vmem:[#allocation3 + $0x1f] sm:$0x7]  ;;  %1286 = vst.msk [vmem:[#allocation4 + $0x20] sm:$0x7] %vm1285_vm8, %v9268_v6 }
  0x1d   :  { %4132 = vst.msk [vmem:[#allocation3 + $0x20] sm:$0x3] %vm277_vm4, %v9268_v6 }
  0x1e   :  { %2378 = vst.msk [vmem:[#allocation6 + $0x18] sm:$0x3f] %vm2377_vm9, %v9269_v19 }
  0x1f   :  { %8233 = vmatmul.mubr.msk.f32.gmra.mrb[6].mxu0 %vm80_vm2, %v62_v15  ;;  %2407 = vst.msk [vmem:[#allocation7 + $0x10] sm:$0xf] %vm2406_vm10, %v9268_v6 }
  0x20   :  { %8235 = vmatprep.mubr.msk.f32.mxu0 %vm9267_vm0, %v9268_v6  ;;  %3043 = vst.msk [vmem:[#allocation8 + $0x10] sm:$0xf] %vm2200_vm11, %v9268_v6 }
  0x23   :  { %8236 = vmatmul.mubr.msk.f32.gmra.mrb[8].mxu0 %vm80_vm2, %v63_v16 }
  0x24   :  { %8238 = vmatprep.mubr.msk.f32.mxu0 %vm9267_vm0, %v9268_v6 }
  0x27   :  { %8239 = vmatmul.mubr.msk.f32.gmra.mrb[10].mxu0 %vm80_vm2, %v64_v17 }
  0x28   :  { %8241 = vmatprep.mubr.msk.f32.mxu0 %vm9267_vm0, %v9268_v6 }
  0x2b   :  { %8242 = vmatmul.mubr.msk.f32.gmra.mrb[12].mxu0 %vm80_vm2, %v65_v18 }
  0xe6   :  { %v172_v25 = vpop.f32.mrb[0].mxu0 }
  0xe7   :  { %v173_v26 = vadd.f32 %v7541_v24, %v172_v25  ;;  %v8225_v27 = vpop.f32.mrb[1].mxu0 }
  0xe9   :  { %v206_v28 = vmul.f32 %v173_v26, %v173_v26 }
  0xea   :  { %v177_v29 = vpop.f32.mrb[2].mxu0 }
  0xeb   :  { %v213_v30 = vmul.f32 %v206_v28, %v173_v26  ;;  %v9483_v31 = vadd.f32 %v7541_v24, %v177_v29  ;;  %v8228_v32 = vpop.f32.mrb[3].mxu0 }
  0xed   :  { %v220_v33 = vmul.f32 0.044715, %v213_v30  ;;  %v207_v34 = vmul.f32 %v9483_v31, %v9483_v31 }
  0xee   :  { %v182_v35 = vpop.f32.mrb[4].mxu0 }
  0xef   :  { %v227_v38 = vadd.f32 %v220_v33, %v173_v26  ;;  %v214_v39 = vmul.f32 %v207_v34, %v9483_v31  ;;  %v9492_v40 = vadd.f32 %v7541_v24, %v182_v35  ;;  %v8231_v41 = vpop.f32.mrb[5].mxu0 }
  0xf1   :  { %v234_v42 = vmul.f32 0.7978846, %v227_v38  ;;  %v221_v43 = vmul.f32 0.044715, %v214_v39  ;;  %v208_v44 = vmul.f32 %v9492_v40, %v9492_v40 }
  0xf2   :  { %v187_v45 = vpop.f32.mrb[6].mxu0 }
  0xf3   :  { %9150 = vtanh.f32 %v234_v42  ;;  %v228_v46 = vadd.f32 %v221_v43, %v9483_v31  ;;  %v215_v47 = vmul.f32 %v208_v44, %v9492_v40  ;;  %v188_v48 = vadd.f32 %v7541_v24, %v187_v45  ;;  %v8234_v49 = vpop.f32.mrb[7].mxu0 }
  0xf5   :  { %v235_v50 = vmul.f32 0.7978846, %v228_v46  ;;  %v222_v51 = vmul.f32 0.044715, %v215_v47  ;;  %v209_v52 = vmul.f32 %v188_v48, %v188_v48 }
  0xf6   :  { %v192_v53 = vpop.f32.mrb[8].mxu0 }
  0xf7   :  { %9152 = vtanh.f32 %v235_v50  ;;  %v229_v54 = vadd.f32 %v222_v51, %v9492_v40  ;;  %v216_v55 = vmul.f32 %v209_v52, %v188_v48  ;;  %v9501_v56 = vadd.f32 %v7541_v24, %v192_v53  ;;  %v8237_v57 = vpop.f32.mrb[9].mxu0 }
  0xf9   :  { %v236_v58 = vmul.f32 0.7978846, %v229_v54  ;;  %v223_v59 = vmul.f32 0.044715, %v216_v55  ;;  %v210_v60 = vmul.f32 %v9501_v56, %v9501_v56 }
  0xfa   :  { %v197_v61 = vpop.f32.mrb[10].mxu0 }
  0xfb   :  { %9154 = vtanh.f32 %v236_v58  ;;  %v230_v62 = vadd.f32 %v223_v59, %v188_v48  ;;  %v217_v63 = vmul.f32 %v210_v60, %v9501_v56  ;;  %v9506_v0 = vadd.f32 %v7541_v24, %v197_v61  ;;  %v8240_v1 = vpop.f32.mrb[11].mxu0 }
  0xfd   :  { %v9151_v2 = vpop.eup %9150  ;;  %v237_v4 = vmul.f32 0.7978846, %v230_v62  ;;  %v224_v5 = vmul.f32 0.044715, %v217_v63  ;;  %v211_v7 = vmul.f32 %v9506_v0, %v9506_v0 }
  0xfe   :  { %v248_v8 = vadd.f32 1.0, %v9151_v2  ;;  %v202_v9 = vpop.f32.mrb[12].mxu0 }
  0xff   :  { %9156 = vtanh.f32 %v237_v4  ;;  %v231_v10 = vadd.f32 %v224_v5, %v9501_v56  ;;  %v218_v11 = vmul.f32 %v211_v7, %v9506_v0  ;;  %v9512_v12 = vadd.f32 %v7541_v24, %v202_v9  ;;  %v8243_v13 = vpop.f32.mrb[13].mxu0 }
 0x100   :  { %v255_v14 = vmul.f32 0.5, %v248_v8 }
 0x101   :  { %v9153_v15 = vpop.eup %9152  ;;  %v238_v16 = vmul.f32 0.7978846, %v231_v10  ;;  %v225_v17 = vmul.f32 0.044715, %v218_v11  ;;  %v212_v18 = vmul.f32 %v9512_v12, %v9512_v12 }
 0x102   :  { %v262_v20 = vmul.f32 %v255_v14, %v173_v26  ;;  %v249_v25 = vadd.f32 1.0, %v9153_v15 }
 0x103   :  { %9158 = vtanh.f32 %v238_v16  ;;  %v232_v27 = vadd.f32 %v225_v17, %v9506_v0  ;;  %v219_v28 = vmul.f32 %v212_v18, %v9512_v12 }
 0x104   :  { %279 = vst.msk [vmem:[#allocation2 + $0x4] sm:$0xff] %vm269_vm3, %v262_v20  ;;  %v256_v29 = vmul.f32 0.5, %v249_v25 }
 0x105   :  { %v9155_v24 = vpop.eup %9154  ;;  %v239_v30 = vmul.f32 0.7978846, %v232_v27  ;;  %v226_v32 = vmul.f32 0.044715, %v219_v28 }
 0x106   :  { %v263_v33 = vmul.f32 %v256_v29, %v9483_v31  ;;  %v250_v34 = vadd.f32 1.0, %v9155_v24 }
 0x107   :  { %9160 = vtanh.f32 %v239_v30  ;;  %v233_v35 = vadd.f32 %v226_v32, %v9512_v12 }
 0x108   :  { %280 = vst.msk [vmem:[#allocation2 + $0xc] sm:$0xff] %vm269_vm3, %v263_v33  ;;  %v257_v26 = vmul.f32 0.5, %v250_v34 }
 0x109   :  { %v9157_v38 = vpop.eup %9156  ;;  %v240_v39 = vmul.f32 0.7978846, %v233_v35 }
 0x10a   :  { %v264_v41 = vmul.f32 %v257_v26, %v9492_v40  ;;  %v251_v42 = vadd.f32 1.0, %v9157_v38 }
 0x10b   :  { %9162 = vtanh.f32 %v240_v39 }
 0x10c   :  { %281 = vst.msk [vmem:[#allocation2 + $0x14] sm:$0xff] %vm269_vm3, %v264_v41  ;;  %v258_v43 = vmul.f32 0.5, %v251_v42 }
 0x10d   :  { %v9159_v44 = vpop.eup %9158 }
 0x10e   :  { %v265_v45 = vmul.f32 %v258_v43, %v188_v48  ;;  %v252_v46 = vadd.f32 1.0, %v9159_v44 }
 0x10f   :  { %v286_v31 = vld [vmem:[#allocation2] ss:$2 sm:$0xff]  ;;  %v294_v47 = vld [vmem:[#allocation2 + $0x1] ss:$2 sm:$0xff] }
 0x110   :  { %v301_v49 = vmax.f32 %v286_v31, %v294_v47  ;;  %282 = vst.msk [vmem:[#allocation2 + $0x1c] sm:$0xff] %vm269_vm3, %v265_v45  ;;  %v306_v51 = vld [vmem:[#allocation2 + $0x2] ss:$2 sm:$0xff]  ;;  %v259_v52 = vmul.f32 0.5, %v252_v46  ;;  %v318_v53 = vld [vmem:[#allocation2 + $0x3] ss:$2 sm:$0xff] }
 0x111   :  { %v9161_v50 = vpop.eup %9160  ;;  %v330_v54 = vld [vmem:[#allocation2 + $0x4] ss:$2 sm:$0xff]  ;;  %v342_v57 = vld [vmem:[#allocation2 + $0x5] ss:$2 sm:$0xff] }
 0x112   :  { %v253_v55 = vadd.f32 1.0, %v9161_v50  ;;  %v313_v40 = vmax.f32 %v301_v49, %v306_v51  ;;  %v266_v60 = vmul.f32 %v259_v52, %v9501_v56 }
 0x113   :  { %v354_v58 = vld [vmem:[#allocation2 + $0x6] ss:$2 sm:$0xff]  ;;  %v366_v59 = vld [vmem:[#allocation2 + $0x7] ss:$2 sm:$0xff] }
 0x114   :  { %4053 = vst.msk [vmem:[#allocation2] sm:$0xff] %vm269_vm3, %v9269_v19  ;;  %4054 = vst.msk [vmem:[#allocation2 + $0x8] sm:$0xff] %vm269_vm3, %v9269_v19  ;;  %v260_v48 = vmul.f32 0.5, %v253_v55  ;;  %v325_v61 = vmax.f32 %v313_v40, %v318_v53 }
 0x115   :  { %v9163_v62 = vpop.eup %9162  ;;  %283 = vst.msk [vmem:[#allocation2 + $0x24] sm:$0xff] %vm269_vm3, %v266_v60  ;;  %v7559_v60 = vld [vmem:[%s10716_s4 + $0x10] sm:$0xff] }
 0x116   :  { %v267_v63 = vmul.f32 %v260_v48, %v9506_v0  ;;  %v254_v1 = vadd.f32 1.0, %v9163_v62  ;;  %v337_v2 = vmax.f32 %v325_v61, %v330_v54 }
 0x117   :  { %v288_v4 = vld [vmem:[#allocation2 + $0x10] ss:$2 sm:$0xff]  ;;  %v296_v5 = vld [vmem:[#allocation2 + $0x11] ss:$2 sm:$0xff] }
 0x118   :  { %v302_v7 = vmax.f32 %v288_v4, %v296_v5  ;;  %284 = vst.msk [vmem:[#allocation2 + $0x2c] sm:$0xff] %vm269_vm3, %v267_v63  ;;  %v349_v56 = vmax.f32 %v337_v2, %v342_v57  ;;  %v308_v8 = vld [vmem:[#allocation2 + $0x12] ss:$2 sm:$0xff]  ;;  %v261_v9 = vmul.f32 0.5, %v254_v1  ;;  %v320_v13 = vld [vmem:[#allocation2 + $0x13] ss:$2 sm:$0xff] }
 0x119   :  { %v332_v14 = vld [vmem:[#allocation2 + $0x14] ss:$2 sm:$0xff]  ;;  %v344_v16 = vld [vmem:[#allocation2 + $0x15] ss:$2 sm:$0xff] }
 0x11a   :  { %v361_v10 = vmax.f32 %v349_v56, %v354_v58  ;;  %v314_v11 = vmax.f32 %v302_v7, %v308_v8  ;;  %v268_v15 = vmul.f32 %v261_v9, %v9512_v12  ;;  %v7564_v8 = vld [vmem:[%s10716_s4 + $0x18] sm:$0xff] }
 0x11c   :  { %v356_v17 = vld [vmem:[#allocation2 + $0x16] ss:$2 sm:$0xff]  ;;  %v368_v18 = vld [vmem:[#allocation2 + $0x17] ss:$2 sm:$0xff]  ;;  %v373_v0 = vmax.f32 %v361_v10, %v366_v59  ;;  %v326_v20 = vmax.f32 %v314_v11, %v320_v13  ;;  %285 = vst.msk [vmem:[#allocation2 + $0x34] sm:$0x3] %vm277_vm4, %v268_v15 }
 0x11d   :  { %4055 = vst.msk [vmem:[#allocation2 + $0x10] sm:$0xff] %vm269_vm3, %v9269_v19  ;;  %4056 = vst.msk [vmem:[#allocation2 + $0x18] sm:$0xff] %vm269_vm3, %v9269_v19 }
 0x11e   :  { %382 = vst.msk [vmem:[#allocation3 + $0x4] sm:$0xff] %vm269_vm3, %v373_v0  ;;  %v338_v25 = vmax.f32 %v326_v20, %v332_v14 }
 0x11f   :  { %v290_v27 = vld [vmem:[#allocation2 + $0x20] ss:$2 sm:$0xff]  ;;  %v292_v28 = vld [vmem:[#allocation2 + $0x30] ss:$2 sm:$0x3] }
 0x120   :  { %v298_v29 = vld [vmem:[#allocation2 + $0x21] ss:$2 sm:$0xff]  ;;  %v300_v12 = vld [vmem:[#allocation2 + $0x31] ss:$2 sm:$0x3]  ;;  %v350_v24 = vmax.f32 %v338_v25, %v344_v16 }
 0x121   :  { %v303_v30 = vmax.f32 %v290_v27, %v298_v29  ;;  %v310_v32 = vld [vmem:[#allocation2 + $0x22] ss:$2 sm:$0xff]  ;;  %v304_v34 = vmax.f32 %v292_v28, %v300_v12  ;;  %v322_v35 = vld [vmem:[#allocation2 + $0x23] ss:$2 sm:$0xff] }
 0x122   :  { %v362_v33 = vmax.f32 %v350_v24, %v356_v17  ;;  %v334_v38 = vld [vmem:[#allocation2 + $0x24] ss:$2 sm:$0xff]  ;;  %v346_v39 = vld [vmem:[#allocation2 + $0x25] ss:$2 sm:$0xff] }
 0x123   :  { %v315_v26 = vmax.f32 %v303_v30, %v310_v32  ;;  %v312_v41 = vld [vmem:[#allocation2 + $0x32] ss:$2 sm:$0x3]  ;;  %v324_v42 = vld [vmem:[#allocation2 + $0x33] ss:$2 sm:$0x3] }
 0x124   :  { %v374_v43 = vmax.f32 %v362_v33, %v368_v18  ;;  %v316_v44 = vmax.f32 %v304_v34, %v312_v41  ;;  %v336_v45 = vld [vmem:[#allocation2 + $0x34] ss:$2 sm:$0x3]  ;;  %v348_v46 = vld [vmem:[#allocation2 + $0x35] ss:$2 sm:$0x3] }
 0x125   :  { %v327_v31 = vmax.f32 %v315_v26, %v322_v35  ;;  %v358_v47 = vld [vmem:[#allocation2 + $0x26] ss:$2 sm:$0xff]  ;;  %v370_v49 = vld [vmem:[#allocation2 + $0x27] ss:$2 sm:$0xff]  ;;  %v7584_v33 = vld [vmem:[%s10716_s4 + $0x38] sm:$0xff] }
 0x126   :  { %v391_v50 = vld [vmem:[#allocation3 + $0x1] sm:$0xff]  ;;  %383 = vst.msk [vmem:[#allocation3 + $0xc] sm:$0xff] %vm269_vm3, %v374_v43  ;;  %4057 = vst.msk [vmem:[#allocation2 + $0x20] sm:$0xff] %vm269_vm3, %v9269_v19  ;;  %v328_v52 = vmax.f32 %v316_v44, %v324_v42  ;;  %v7579_v32 = vld [vmem:[%s10716_s4 + $0x30] sm:$0xff] }
 0x127   :  { %4058 = vst.msk [vmem:[#allocation2 + $0x28] sm:$0xff] %vm269_vm3, %v9269_v19  ;;  %8246 = vmatprep.mubr.msk.f32.mxu1 %vm269_vm3, %v391_v50  ;;  %v339_v51 = vmax.f32 %v327_v31, %v334_v38  ;;  %4059 = vst.msk [vmem:[#allocation2 + $0x30] sm:$0xff] %vm269_vm3, %v9269_v19  ;;  %v386_v59 = vld [vmem:[#allocation3] sm:$0xff]  ;;  %v7574_v30 = vld [vmem:[%s10716_s4 + $0x28] sm:$0xff] }
 0x128   :  { %v340_v54 = vmax.f32 %v328_v52, %v336_v45  ;;  %v591_v61 = vld [vmem:[#allocation3 + $0x2] sm:$0xff]  ;;  %v2218_v38 = vld [vmem:[%s10720_s8 + $0x10] sm:$0xff] }
 0x129   :  { %v351_v53 = vmax.f32 %v339_v51, %v346_v39  ;;  %v698_v62 = vld [vmem:[#allocation3 + $0x3] sm:$0xff]  ;;  %v2219_v39 = vld [vmem:[%s10720_s8 + $0x18] sm:$0xff]  ;;  %v2222_v45 = vld [vmem:[%s10720_s8 + $0x30] sm:$0xff] }
 0x12a   :  { %v352_v40 = vmax.f32 %v340_v54, %v348_v46  ;;  %v805_v63 = vld [vmem:[#allocation3 + $0x4] sm:$0xff]  ;;  %v8844_v41 = vpack.c.bf16 %v2219_v39, %v2218_v38  ;;  %v2223_v46 = vld [vmem:[%s10720_s8 + $0x38] sm:$0xff] }
 0x12b   :  { %v363_v55 = vmax.f32 %v351_v53, %v358_v47  ;;  %v7569_v24 = vld [vmem:[%s10716_s4 + $0x20] sm:$0xff]  ;;  %v2217_v35 = vld [vmem:[%s10720_s8 + $0x8] sm:$0xff]  ;;  %v8852_v31 = vpack.c.bf16 %v2223_v46, %v2222_v45  ;;  %v2227_v51 = vld [vmem:[%s10720_s8 + $0x58] sm:$0xff] }
 0x12c   :  { %v364_v48 = vmax.f32 %v352_v40, %v9474_v22  ;;  %v2216_v34 = vld [vmem:[%s10720_s8] sm:$0xff]  ;;  %v2221_v43 = vld [vmem:[%s10720_s8 + $0x28] sm:$0xff]  ;;  %v2215_v40 = vld [vmem:[%s10735_s28 + $0x18] sm:$0x3] }
 0x12d   :  { %v392_v57 = vld [vmem:[#allocation3 + $0x9] sm:$0xff]  ;;  %v375_v58 = vmax.f32 %v363_v55, %v370_v49  ;;  %v8840_v26 = vpack.c.bf16 %v2217_v35, %v2216_v34  ;;  %v2220_v42 = vld [vmem:[%s10720_s8 + $0x20] sm:$0xff] }
 0x12e   :  { %8247 = vmatmul.mubr.msk.f32.vlgmr.msra.gmra.mrb[0].mxu1 %vm269_vm3, %v392_v57  ;;  %v376_v1 = vmax.f32 %v364_v48, %v9476_v23  ;;  %v912_v2 = vld [vmem:[#allocation3 + $0x5] sm:$0xff]  ;;  %v8848_v44 = vpack.c.bf16 %v2221_v43, %v2220_v42  ;;  %v2228_v53 = vld [vmem:[%s10720_s8 + $0x60] sm:$0xf]  ;;  %v2214_v55 = vld [vmem:[%s10735_s28 + $0x10] sm:$0xff] }
 0x12f   :  { %8253 = vmatpush3.msra.mxu1 %v9471_v21  ;;  %384 = vst.msk [vmem:[#allocation3 + $0x14] sm:$0xff] %vm269_vm3, %v375_v58  ;;  %v9556_v4 = vld [vmem:[#allocation3 + $0x6] sm:$0xff]  ;;  %v7590_v57 = vld [vmem:[%s10718_s6 + $0x10] sm:$0xff]  ;;  %v7591_v58 = vld [vmem:[%s10718_s6 + $0x18] sm:$0xff] }
 0x130   :  { %v9558_v5 = vld [vmem:[#allocation3 + $0x7] sm:$0xff]  ;;  %8260 = vmatprep.subr.mxu1 %v7559_v60  ;;  %385 = vst.msk [vmem:[#allocation3 + $0x1c] sm:$0x3] %vm277_vm4, %v376_v1  ;;  %v7589_v1 = vld [vmem:[%s10717_s5] ss:$0 sm:$0xff] }
 0x131   :  { %4128 = vst.msk [vmem:[#allocation3] sm:$0xff] %vm269_vm3, %v9268_v6  ;;  %v387_v21 = vld [vmem:[#allocation3 + $0x8] sm:$0xff]  ;;  %v2224_v47 = vld [vmem:[%s10720_s8 + $0x40] sm:$0xff] }
 0x132   :  { %v592_v9 = vld [vmem:[#allocation3 + $0xa] sm:$0xff] }
 0x133   :  { %v699_v13 = vld [vmem:[#allocation3 + $0xb] sm:$0xff] }
 0x134   :  { %v806_v16 = vld [vmem:[#allocation3 + $0xc] sm:$0xff] }
 0x135   :  { %v2225_v49 = vld [vmem:[%s10720_s8 + $0x48] sm:$0xff] }
 0x136   :  { %v393_v22 = vld [vmem:[#allocation3 + $0x11] sm:$0xff]  ;;  %v394_v7 = vld [vmem:[#allocation3 + $0x19] sm:$0x7]  ;;  %v8856_v50 = vpack.c.bf16 %v2225_v49, %v2224_v47  ;;  %v2213_v54 = vld [vmem:[%s10735_s28 + $0x8] sm:$0xff] }
 0x137   :  { %8249 = vmatprep.mubr.msk.f32.mxu1 %vm269_vm3, %v393_v22  ;;  %v388_v23 = vld [vmem:[#allocation3 + $0x10] sm:$0xff]  ;;  %v389_v56 = vld [vmem:[#allocation3 + $0x18] sm:$0x7]  ;;  %v701_v15 = vld [vmem:[#allocation3 + $0x1b] sm:$0x7] }
 0x138   :  { %8250 = vmatmul.mubr.msk.f32.gmra.mrb[2].mxu1 %vm269_vm3, %v394_v7  ;;  %v593_v10 = vld [vmem:[#allocation3 + $0x12] sm:$0xff]  ;;  %v594_v11 = vld [vmem:[#allocation3 + $0x1a] sm:$0x7]  ;;  %v915_v25 = vld [vmem:[#allocation3 + $0x1d] sm:$0x7] }
 0x139   :  { %8254 = vmatprep.mubr.msk.f32.mxu1 %vm269_vm3, %v386_v59  ;;  %v700_v14 = vld [vmem:[#allocation3 + $0x13] sm:$0xff]  ;;  %v808_v18 = vld [vmem:[#allocation3 + $0x1c] sm:$0x7]  ;;  %v8808_v59 = vpack.c.bf16 %v7591_v58, %v7590_v57  ;;  %v1296_v48 = vld [vmem:[%s10718_s6 + $0x8] sm:$0xff] }
 0x13a   :  { %v807_v17 = vld [vmem:[#allocation3 + $0x14] sm:$0xff] }
 0x13b   :  { %v913_v0 = vld [vmem:[#allocation3 + $0xd] sm:$0xff]  ;;  %v914_v20 = vld [vmem:[#allocation3 + $0x15] sm:$0xff]  ;;  %8809 = vmatprep.subr.bf16.mxu0 %v8808_v59 }
 0x13c   :  { %v1020_v27 = vld [vmem:[#allocation3 + $0xe] sm:$0xff]  ;;  %v1021_v28 = vld [vmem:[#allocation3 + $0x16] sm:$0xff]  ;;  %8255 = vmatmul.mubr.msk.f32.vlgmr.msra.gmra.mrb[0].mxu1 %vm269_vm3, %v387_v21  ;;  %8811 = vmatpush3.bf16.msra.mxu0 %v8808_v59 }
 0x13d   :  { %v1127_v29 = vld [vmem:[#allocation3 + $0xf] sm:$0xff]  ;;  %v1128_v12 = vld [vmem:[#allocation3 + $0x17] sm:$0xff]  ;;  %8261 = vmatpush3.msra.mxu1 %v7559_v60  ;;  %8257 = vmatprep.mubr.msk.f32.mxu1 %vm269_vm3, %v388_v23  ;;  %v1295_v60 = vld [vmem:[%s10718_s6] sm:$0xff] }
 0x13e   :  { %4129 = vst.msk [vmem:[#allocation3 + $0x8] sm:$0xff] %vm269_vm3, %v9268_v6  ;;  %4130 = vst.msk [vmem:[#allocation3 + $0x10] sm:$0xff] %vm269_vm3, %v9268_v6  ;;  %8268 = vmatprep.subr.mxu1 %v7564_v8 }
 0x13f   :  { %4131 = vst.msk [vmem:[#allocation3 + $0x18] sm:$0xff] %vm269_vm3, %v9268_v6 }
 0x140   :  { %8258 = vmatmul.mubr.msk.f32.gmra.mrb[2].mxu1 %vm269_vm3, %v389_v56 }
 0x141   :  { %8262 = vmatprep.mubr.msk.f32.mxu1 %vm269_vm3, %v591_v61  ;;  %v9713_v61 = vpack.c.bf16 %v1296_v48, %v1295_v60 }
 0x143   :  { %8813 = vmatprep.subr.bf16.mxu0 %v9713_v61 }
 0x144   :  { %8263 = vmatmul.mubr.msk.f32.vlgmr.msra.gmra.mrb[0].mxu1 %vm269_vm3, %v592_v9 }
 0x145   :  { %8269 = vmatpush3.msra.mxu1 %v7564_v8  ;;  %8265 = vmatprep.mubr.msk.f32.mxu1 %vm269_vm3, %v593_v10 }
 0x146   :  { %8276 = vmatprep.subr.mxu1 %v7569_v24 }
 0x148   :  { %8266 = vmatmul.mubr.msk.f32.gmra.mrb[2].mxu1 %vm269_vm3, %v594_v11 }
 0x149   :  { %8270 = vmatprep.mubr.msk.f32.mxu1 %vm269_vm3, %v698_v62  ;;  %v7643_v62 = vld [vmem:[%s10722_s10 + $0x8] sm:$0xff] }
 0x14c   :  { %8271 = vmatmul.mubr.msk.f32.vlgmr.msra.gmra.mrb[0].mxu1 %vm269_vm3, %v699_v13 }
 0x14d   :  { %8277 = vmatpush3.msra.mxu1 %v7569_v24  ;;  %8273 = vmatprep.mubr.msk.f32.mxu1 %vm269_vm3, %v700_v14 }
 0x14e   :  { %8284 = vmatprep.subr.mxu1 %v7574_v30 }
 0x150   :  { %8274 = vmatmul.mubr.msk.f32.gmra.mrb[2].mxu1 %vm269_vm3, %v701_v15 }
 0x151   :  { %8278 = vmatprep.mubr.msk.f32.mxu1 %vm269_vm3, %v805_v63  ;;  %v9726_v63 = vld [vmem:[%s10722_s10] sm:$0xff] }
 0x154   :  { %8279 = vmatmul.mubr.msk.f32.vlgmr.msra.gmra.mrb[0].mxu1 %vm269_vm3, %v806_v16 }
 0x155   :  { %8285 = vmatpush3.msra.mxu1 %v7574_v30  ;;  %8281 = vmatprep.mubr.msk.f32.mxu1 %vm269_vm3, %v807_v17 }
 0x156   :  { %8292 = vmatprep.subr.mxu1 %v7579_v32 }
 0x158   :  { %8282 = vmatmul.mubr.msk.f32.gmra.mrb[2].mxu1 %vm269_vm3, %v808_v18 }
 0x159   :  { %8286 = vmatprep.mubr.msk.f32.mxu1 %vm269_vm3, %v912_v2 }
 0x15c   :  { %8287 = vmatmul.mubr.msk.f32.vlgmr.msra.gmra.mrb[0].mxu1 %vm269_vm3, %v913_v0 }
 0x15d   :  { %8293 = vmatpush3.msra.mxu1 %v7579_v32  ;;  %8289 = vmatprep.mubr.msk.f32.mxu1 %vm269_vm3, %v914_v20 }
 0x15e   :  { %8300 = vmatprep.subr.mxu1 %v7584_v33 }
 0x160   :  { %8290 = vmatmul.mubr.msk.f32.gmra.mrb[2].mxu1 %vm269_vm3, %v915_v25 }
 0x161   :  { %8294 = vmatprep.mubr.msk.f32.mxu1 %vm269_vm3, %v9556_v4 }
 0x164   :  { %8295 = vmatmul.mubr.msk.f32.vlgmr.msra.gmra.mrb[0].mxu1 %vm269_vm3, %v1020_v27 }
 0x165   :  { %8301 = vmatpush3.msra.mxu1 %v7584_v33  ;;  %8297 = vmatprep.mubr.msk.f32.mxu1 %vm269_vm3, %v1021_v28 }
 0x166   :  { %8841 = vmatprep.subr.bf16.mxu1 %v8840_v26 }
 0x168   :  { %8298 = vmatmul.mubr.msk.f32.gmra.mrb[2].mxu1 %vm269_vm3, %v9487_v36  ;;  %v2212_v36 = vld [vmem:[%s10735_s28] sm:$0xff] }
 0x169   :  { %8302 = vmatprep.mubr.msk.f32.mxu1 %vm269_vm3, %v9558_v5 }
 0x16c   :  { %8303 = vmatmul.mubr.msk.f32.vlgmr.msra.gmra.mrb[0].mxu1 %vm269_vm3, %v1127_v29 }
 0x16d   :  { %8843 = vmatpush3.bf16.msra.mxu1 %v8840_v26  ;;  %8305 = vmatprep.mubr.msk.f32.mxu1 %vm269_vm3, %v1128_v12  ;;  %v7637_v26 = vld [vmem:[%s10721_s9] ss:$0 sm:$0xff] }
 0x16e   :  { %8845 = vmatprep.subr.bf16.mxu1 %v8844_v41 }
 0x170   :  { %8306 = vmatmul.mubr.msk.f32.gmra.mrb[2].mxu1 %vm269_vm3, %v9489_v37  ;;  %v2226_v37 = vld [vmem:[%s10720_s8 + $0x50] sm:$0xff] }
 0x171   :  { %8847 = vmatpush3.bf16.msra.mxu1 %v8844_v41  ;;  %8414 = vmatprep.mubr.msk.f32.mxu1 %vm2236_vm5, %v2212_v36  ;;  %v8860_v52 = vpack.c.bf16 %v2227_v51, %v2226_v37 }
 0x172   :  { %8849 = vmatprep.subr.bf16.mxu1 %v8848_v44 }
 0x175   :  { %8851 = vmatpush3.bf16.msra.mxu1 %v8848_v44 }
 0x176   :  { %8853 = vmatprep.subr.bf16.mxu1 %v8852_v31 }
 0x179   :  { %8855 = vmatpush3.bf16.msra.mxu1 %v8852_v31 }
 0x17a   :  { %8857 = vmatprep.subr.bf16.mxu1 %v8856_v50 }
 0x17d   :  { %8859 = vmatpush3.bf16.msra.mxu1 %v8856_v50 }
 0x17e   :  { %8861 = vmatprep.subr.bf16.mxu1 %v8860_v52 }
 0x181   :  { %8863 = vmatpush3.bf16.msra.mxu1 %v8860_v52 }
 0x182   :  { %8412 = vmatprep.subr.msk.mxu1 %vm2249_vm6, %v2228_v53 }
 0x185   :  { %8413 = vmatpush3.msk.msra.mxu1 %vm2249_vm6, %v2228_v53 }
 0x186   :  { %8415 = vmatmul.mubr.msk.f32.vlgmr.msra.gmra.mrb[4].mxu1 %vm2236_vm5, %v2213_v54  ;;  %8420 = vmatprep.subr.mxu1 %v7643_v62 }
 0x187   :  { %8417 = vmatprep.mubr.msk.f32.mxu1 %vm2236_vm5, %v2214_v55  ;;  %8421 = vmatpush3.msra.mxu1 %v7643_v62 }
 0x188   :  { %8425 = vmatprep.subr.mxu1 %v9726_v63 }
 0x18a   :  { %8418 = vmatmul.mubr.msk.f32.gmra.mrb[6].mxu1 %vm2236_vm5, %v2215_v40 }
 0x23f   :  { %v8304_v2 = vpop.f32.mrb[0].mxu1 }
 0x240   :  { %v1241_v4 = vadd.f32 %v8304_v2, %v7589_v1  ;;  %v1210_v5 = vpop.f32.mrb[1].mxu1 }
 0x241   :  { %v1240_v22 = vadd.f32 %v7589_v1, %v1210_v5 }
 0x242   :  { %v1245_v7 = vmul.f32 %v1241_v4, %v1241_v4 }
 0x243   :  { %v1244_v21 = vmul.f32 %v1240_v22, %v1240_v22  ;;  %v8307_v23 = vpop.f32.mrb[2].mxu1 }
 0x244   :  { %v1249_v56 = vmul.f32 %v1245_v7, %v1241_v4  ;;  %v1243_v8 = vadd.f32 %v8307_v23, %v7589_v1  ;;  %v1220_v9 = vpop.f32.mrb[3].mxu1  ;;  %v7600_v7 = vld [vmem:[%s10718_s6 + $0x20] sm:$0xff] }
 0x245   :  { %v1248_v10 = vmul.f32 %v1244_v21, %v1240_v22  ;;  %v1242_v11 = vadd.f32 %v7589_v1, %v1220_v9  ;;  %v7601_v21 = vld [vmem:[%s10718_s6 + $0x28] sm:$0xff] }
 0x246   :  { %v1253_v13 = vmul.f32 0.044715, %v1249_v56  ;;  %v1247_v14 = vmul.f32 %v1243_v8, %v1243_v8 }
 0x247   :  { %v1252_v15 = vmul.f32 0.044715, %v1248_v10  ;;  %v1246_v16 = vmul.f32 %v1242_v11, %v1242_v11 }
 0x248   :  { %v1257_v17 = vadd.f32 %v1253_v13, %v1241_v4  ;;  %v1251_v18 = vmul.f32 %v1247_v14, %v1243_v8 }
 0x249   :  { %v1256_v0 = vadd.f32 %v1252_v15, %v1240_v22  ;;  %v1250_v20 = vmul.f32 %v1246_v16, %v1242_v11  ;;  %v8816_v15 = vpack.c.bf16 %v7601_v21, %v7600_v7 }
 0x24a   :  { %v1261_v25 = vmul.f32 0.7978846, %v1257_v17  ;;  %v1255_v27 = vmul.f32 0.044715, %v1251_v18 }
 0x24b   :  { %v1260_v28 = vmul.f32 0.7978846, %v1256_v0  ;;  %v1254_v29 = vmul.f32 0.044715, %v1250_v20 }
 0x24c   :  { %9164 = vtanh.f32 %v1261_v25  ;;  %v1259_v12 = vadd.f32 %v1255_v27, %v1243_v8  ;;  %v7606_v27 = vld [vmem:[%s10718_s6 + $0x30] sm:$0xff] }
 0x24d   :  { %9166 = vtanh.f32 %v1260_v28  ;;  %v1258_v24 = vadd.f32 %v1254_v29, %v1242_v11  ;;  %v7607_v28 = vld [vmem:[%s10718_s6 + $0x38] sm:$0xff] }
 0x24e   :  { %v1263_v30 = vmul.f32 0.7978846, %v1259_v12 }
 0x24f   :  { %v1262_v32 = vmul.f32 0.7978846, %v1258_v24 }
 0x250   :  { %9168 = vtanh.f32 %v1263_v30 }
 0x251   :  { %9170 = vtanh.f32 %v1262_v32 }
 0x256   :  { %v9165_v33 = vpop.eup %9164 }
 0x257   :  { %v9167_v34 = vpop.eup %9166  ;;  %v1269_v35 = vadd.f32 1.0, %v9165_v33 }
 0x258   :  { %v1268_v38 = vadd.f32 1.0, %v9167_v34 }
 0x259   :  { %v1273_v39 = vmul.f32 0.5, %v1269_v35  ;;  %v8416_v41 = vpop.f32.mrb[4].mxu1 }
 0x25a   :  { %v9169_v42 = vpop.eup %9168  ;;  %v1272_v43 = vmul.f32 0.5, %v1268_v38  ;;  %v9735_v44 = vadd.f32 %v8416_v41, %v7637_v26  ;;  %v2319_v36 = vpop.f32.mrb[5].mxu1  ;;  %v9793_v38 = vld [vmem:[#allocation4 + $0x1f] sm:$0xf] }
 0x25b   :  { %v9171_v45 = vpop.eup %9170  ;;  %v1277_v46 = vmul.f32 %v1273_v39, %v1241_v4  ;;  %v1271_v31 = vadd.f32 1.0, %v9169_v42  ;;  %v9737_v47 = vadd.f32 %v7637_v26, %v2319_v36  ;;  %v8820_v36 = vpack.c.bf16 %v7607_v28, %v7606_v27  ;;  %v7625_v27 = vld [vmem:[%s10718_s6 + $0x68] sm:$0xff] }
 0x25c   :  { %v1276_v49 = vmul.f32 %v1272_v43, %v1240_v22  ;;  %v1270_v50 = vadd.f32 1.0, %v9171_v45  ;;  %v2339_v37 = vmul.f32 %v9735_v44, %v9735_v44 }
 0x25d   :  { %1288 = vst.msk [vmem:[#allocation4 + $0xc] sm:$0xff] %vm1280_vm7, %v1277_v46  ;;  %v1275_v51 = vmul.f32 0.5, %v1271_v31  ;;  %v2338_v52 = vmul.f32 %v9737_v47, %v9737_v47  ;;  %v8419_v53 = vpop.f32.mrb[6].mxu1 }
 0x25e   :  { %1287 = vst.msk [vmem:[#allocation4 + $0x4] sm:$0xff] %vm1280_vm7, %v1276_v49  ;;  %v1274_v54 = vmul.f32 0.5, %v1270_v50  ;;  %v2343_v55 = vmul.f32 %v2339_v37, %v9735_v44  ;;  %v9746_v40 = vadd.f32 %v8419_v53, %v7637_v26  ;;  %v2329_v57 = vpop.f32.mrb[7].mxu1 }
 0x25f   :  { %v1279_v58 = vmul.f32 %v1275_v51, %v1243_v8  ;;  %v2342_v59 = vmul.f32 %v2338_v52, %v9737_v47  ;;  %v9749_v60 = vadd.f32 %v7637_v26, %v2329_v57 }
 0x260   :  { %v1278_v48 = vmul.f32 %v1274_v54, %v1242_v11  ;;  %v2347_v62 = vmul.f32 0.044715, %v2343_v55  ;;  %v2341_v1 = vmul.f32 %v9746_v40, %v9746_v40 }
 0x261   :  { %1290 = vst.msk [vmem:[#allocation4 + $0x1c] sm:$0x7] %vm1285_vm8, %v1279_v58  ;;  %v2346_v2 = vmul.f32 0.044715, %v2342_v59  ;;  %v2340_v4 = vmul.f32 %v9749_v60, %v9749_v60 }
 0x262   :  { %1289 = vst.msk [vmem:[#allocation4 + $0x14] sm:$0xff] %vm1280_vm7, %v1278_v48  ;;  %v2351_v5 = vadd.f32 %v2347_v62, %v9735_v44  ;;  %v2345_v22 = vmul.f32 %v2341_v1, %v9746_v40 }
 0x263   :  { %v2350_v23 = vadd.f32 %v2346_v2, %v9737_v47  ;;  %v2344_v56 = vmul.f32 %v2340_v4, %v9749_v60  ;;  %v7612_v2 = vld [vmem:[%s10718_s6 + $0x40] sm:$0xff]  ;;  %v7613_v4 = vld [vmem:[%s10718_s6 + $0x48] sm:$0xff] }
 0x264   :  { %v2355_v8 = vmul.f32 0.7978846, %v2351_v5  ;;  %v2349_v9 = vmul.f32 0.044715, %v2345_v22  ;;  %v9787_v34 = vld [vmem:[#allocation4 + $0xc] sm:$0xff] }
 0x265   :  { %v2354_v10 = vmul.f32 0.7978846, %v2350_v23  ;;  %v2348_v11 = vmul.f32 0.044715, %v2344_v56  ;;  %v1297_v13 = vld [vmem:[#allocation4 + $0x1] sm:$0xff]  ;;  %v1298_v14 = vld [vmem:[#allocation4 + $0x9] sm:$0xff] }
 0x266   :  { %9172 = vtanh.f32 %v2355_v8  ;;  %v2353_v16 = vadd.f32 %v2349_v9, %v9746_v40  ;;  %8312 = vmatprep.mubr.msk.f32.mxu0 %vm1280_vm7, %v1297_v13  ;;  %v1291_v29 = vld [vmem:[#allocation4] sm:$0xff]  ;;  %v1499_v24 = vld [vmem:[#allocation4 + $0xa] sm:$0xff]  ;;  %v8824_v8 = vpack.c.bf16 %v7613_v4, %v7612_v2 }
 0x267   :  { %9174 = vtanh.f32 %v2354_v10  ;;  %v2352_v17 = vadd.f32 %v2348_v11, %v9749_v60  ;;  %8313 = vmatmul.mubr.msk.f32.vlgmr.msra.gmra.mrb[14].mxu0 %vm1280_vm7, %v1298_v14  ;;  %v1498_v12 = vld [vmem:[#allocation4 + $0x2] sm:$0xff]  ;;  %v9783_v32 = vld [vmem:[#allocation4 + $0xb] sm:$0xff] }
 0x268   :  { %v2357_v18 = vmul.f32 0.7978846, %v2353_v16  ;;  %8815 = vmatpush3.bf16.msra.mxu0 %v9713_v61  ;;  %v1292_v61 = vld [vmem:[#allocation4 + $0x8] sm:$0xff]  ;;  %v9799_v49 = vld [vmem:[#allocation4 + $0x1c] sm:$0xf] }
 0x269   :  { %v2356_v0 = vmul.f32 0.7978846, %v2352_v17  ;;  %v1299_v20 = vld [vmem:[#allocation4 + $0x11] sm:$0xff]  ;;  %v1300_v25 = vld [vmem:[#allocation4 + $0x19] sm:$0xf]  ;;  %8817 = vmatprep.subr.bf16.mxu0 %v8816_v15  ;;  %v9781_v30 = vld [vmem:[#allocation4 + $0x3] sm:$0xff] }
 0x26a   :  { %9176 = vtanh.f32 %v2357_v18  ;;  %8315 = vmatprep.mubr.msk.f32.mxu0 %vm1280_vm7, %v1299_v20  ;;  %v9785_v33 = vld [vmem:[#allocation4 + $0x4] sm:$0xff]  ;;  %v9791_v26 = vld [vmem:[#allocation4 + $0xd] sm:$0xff]  ;;  %v1294_v41 = vld [vmem:[#allocation4 + $0x18] sm:$0xf] }
 0x26b   :  { %9178 = vtanh.f32 %v2356_v0  ;;  %8316 = vmatmul.mubr.msk.f32.gmra.mrb[16].mxu0 %vm1280_vm7, %v1300_v25  ;;  %v9789_v35 = vld [vmem:[#allocation4 + $0x5] sm:$0xff]  ;;  %v1293_v39 = vld [vmem:[#allocation4 + $0x10] sm:$0xff]  ;;  %v1501_v43 = vld [vmem:[#allocation4 + $0x1a] sm:$0xf] }
 0x26c   :  { %8322 = vmatprep.mubr.msk.f32.mxu0 %vm1280_vm7, %v1291_v29  ;;  %v1500_v42 = vld [vmem:[#allocation4 + $0x12] sm:$0xff]  ;;  %v9795_v46 = vld [vmem:[#allocation4 + $0x1b] sm:$0xf]  ;;  %v9803_v37 = vld [vmem:[#allocation4 + $0x6] sm:$0xff] }
 0x26d   :  { %v1608_v45 = vld [vmem:[#allocation4 + $0x13] sm:$0xff]  ;;  %v9801_v50 = vld [vmem:[#allocation4 + $0x1d] sm:$0xf]  ;;  %v9809_v53 = vld [vmem:[#allocation4 + $0x7] sm:$0xff] }
 0x26e   :  { %v9797_v31 = vld [vmem:[#allocation4 + $0x14] sm:$0xff]  ;;  %v9807_v52 = vld [vmem:[#allocation4 + $0x1e] sm:$0xf]  ;;  %5024 = vst.msk [vmem:[#allocation4] sm:$0xff] %vm1280_vm7, %v9268_v6 }
 0x26f   :  { %v9805_v51 = vld [vmem:[#allocation4 + $0xe] sm:$0xff]  ;;  %8323 = vmatmul.mubr.msk.f32.vlgmr.msra.gmra.mrb[14].mxu0 %vm1280_vm7, %v1292_v61  ;;  %v9816_v57 = vld [vmem:[#allocation4 + $0x16] sm:$0xff]  ;;  %5028 = vst.msk [vmem:[#allocation4 + $0x20] sm:$0x7] %vm1285_vm8, %v9268_v6 }
 0x270   :  { %v9811_v54 = vld [vmem:[#allocation4 + $0xf] sm:$0xff]  ;;  %v9822_v58 = vld [vmem:[#allocation4 + $0x17] sm:$0xff]  ;;  %v9173_v59 = vpop.eup %9172  ;;  %8325 = vmatprep.mubr.msk.f32.mxu0 %vm1280_vm7, %v1293_v39  ;;  %8819 = vmatpush3.bf16.msra.mxu0 %v8816_v15 }
 0x271   :  { %v9814_v55 = vld [vmem:[#allocation4 + $0x15] sm:$0xff]  ;;  %5025 = vst.msk [vmem:[#allocation4 + $0x8] sm:$0xff] %vm1280_vm7, %v9268_v6  ;;  %v9175_v48 = vpop.eup %9174  ;;  %v2363_v62 = vadd.f32 1.0, %v9173_v59  ;;  %8821 = vmatprep.subr.bf16.mxu0 %v8820_v36 }
 0x272   :  { %5026 = vst.msk [vmem:[#allocation4 + $0x10] sm:$0xff] %vm1280_vm7, %v9268_v6  ;;  %5027 = vst.msk [vmem:[#allocation4 + $0x18] sm:$0xff] %vm1280_vm7, %v9268_v6  ;;  %v2362_v1 = vadd.f32 1.0, %v9175_v48  ;;  %v7619_v15 = vld [vmem:[%s10718_s6 + $0x58] sm:$0xff]  ;;  %v7624_v25 = vld [vmem:[%s10718_s6 + $0x60] sm:$0xff] }
 0x273   :  { %v2367_v5 = vmul.f32 0.5, %v2363_v62  ;;  %8326 = vmatmul.mubr.msk.f32.gmra.mrb[16].mxu0 %vm1280_vm7, %v1294_v41  ;;  %v7630_v41 = vld [vmem:[%s10718_s6 + $0x70] sm:$0xff] }
 0x274   :  { %v9177_v22 = vpop.eup %9176  ;;  %v2366_v7 = vmul.f32 0.5, %v2362_v1  ;;  %8332 = vmatprep.mubr.msk.f32.mxu0 %vm1280_vm7, %v1498_v12 }
 0x275   :  { %v9179_v21 = vpop.eup %9178  ;;  %v2371_v23 = vmul.f32 %v2367_v5, %v9735_v44  ;;  %v2365_v56 = vadd.f32 1.0, %v9177_v22  ;;  %v3856_v5 = vld [vmem:[%s10714_s2 + $0x20] sm:$0xff]  ;;  %v3857_v22 = vld [vmem:[%s10714_s2 + $0x28] sm:$0xff] }
 0x276   :  { %v2370_v9 = vmul.f32 %v2366_v7, %v9737_v47  ;;  %v2364_v10 = vadd.f32 1.0, %v9179_v21  ;;  %v7618_v47 = vld [vmem:[%s10718_s6 + $0x50] sm:$0xff]  ;;  %v8899_v7 = vpack.c.bf16 %v3857_v22, %v3856_v5 }
 0x277   :  { %2380 = vst.msk [vmem:[#allocation6 + $0xa] sm:$0xff] %vm269_vm3, %v2371_v23  ;;  %v2369_v11 = vmul.f32 0.5, %v2365_v56  ;;  %8333 = vmatmul.mubr.msk.f32.vlgmr.msra.gmra.mrb[14].mxu0 %vm1280_vm7, %v1499_v24  ;;  %v3858_v21 = vld [vmem:[%s10714_s2 + $0x30] sm:$0x3]  ;;  %v7704_v23 = vld [vmem:[%s10734_s25 + $0x38] sm:$0xff]  ;;  %v7706_v56 = vld [vmem:[%s10734_s25 + $0x48] sm:$0xff] }
 0x278   :  { %2379 = vst.msk [vmem:[#allocation6 + $0x2] sm:$0xff] %vm269_vm3, %v2370_v9  ;;  %v2368_v13 = vmul.f32 0.5, %v2364_v10  ;;  %8335 = vmatprep.mubr.msk.f32.mxu0 %vm1280_vm7, %v1500_v42  ;;  %8823 = vmatpush3.bf16.msra.mxu0 %v8820_v36  ;;  %v7631_v42 = vld [vmem:[%s10718_s6 + $0x78] sm:$0xff]  ;;  %v7709_v10 = vld [vmem:[%s10734_s25 + $0x60] sm:$0xff] }
 0x279   :  { %v2373_v14 = vmul.f32 %v2369_v11, %v9746_v40  ;;  %8825 = vmatprep.subr.bf16.mxu0 %v8824_v8  ;;  %v8828_v40 = vpack.c.bf16 %v7619_v15, %v7618_v47  ;;  %v7708_v9 = vld [vmem:[%s10734_s25 + $0x58] sm:$0xff]  ;;  %v7710_v11 = vld [vmem:[%s10734_s25 + $0x68] sm:$0x3]  ;;  %v3049_v47 = vld [vmem:[%s10724_s12] sm:$0xff] }
 0x27a   :  { %v2372_v44 = vmul.f32 %v2368_v13, %v9749_v60  ;;  %v7664_v13 = vld [vmem:[%s10724_s12 + $0x10] sm:$0xff]  ;;  %v3050_v15 = vld [vmem:[%s10724_s12 + $0x8] sm:$0xff] }
 0x27b   :  { %2382 = vst.msk [vmem:[#allocation6 + $0x1a] sm:$0x3] %vm277_vm4, %v2373_v14  ;;  %8336 = vmatmul.mubr.msk.f32.gmra.mrb[16].mxu0 %vm1280_vm7, %v1501_v43  ;;  %v8836_v43 = vpack.c.bf16 %v7631_v42, %v7630_v41  ;;  %v7665_v14 = vld [vmem:[%s10724_s12 + $0x18] sm:$0xff] }
 0x27c   :  { %2381 = vst.msk [vmem:[#allocation6 + $0x12] sm:$0xff] %vm269_vm3, %v2372_v44  ;;  %8342 = vmatprep.mubr.msk.f32.mxu0 %vm1280_vm7, %v9781_v30  ;;  %v8864_v44 = vpack.c.bf16 %v7665_v14, %v7664_v13 }
 0x27f   :  { %v2383_v16 = vld [vmem:[#allocation6] ss:$2 sm:$0xff]  ;;  %v2387_v60 = vld [vmem:[#allocation6 + $0x1] ss:$2 sm:$0xff]  ;;  %8343 = vmatmul.mubr.msk.f32.vlgmr.msra.gmra.mrb[14].mxu0 %vm1280_vm7, %v9783_v32  ;;  %v8832_v32 = vpack.c.bf16 %v7625_v27, %v7624_v25 }
 0x280   :  { %v2393_v17 = vld [vmem:[#allocation6 + $0x2] ss:$2 sm:$0xff]  ;;  %v2399_v18 = vld [vmem:[#allocation6 + $0x3] ss:$2 sm:$0xff]  ;;  %8345 = vmatprep.mubr.msk.f32.mxu0 %vm1280_vm7, %v1608_v45  ;;  %8827 = vmatpush3.bf16.msra.mxu0 %v8824_v8  ;;  %v2390_v0 = vmax.f32 %v2383_v16, %v2387_v60 }
 0x281   :  { %6104 = vst.msk [vmem:[#allocation6] sm:$0xff] %vm269_vm3, %v9269_v19  ;;  %6105 = vst.msk [vmem:[#allocation6 + $0x8] sm:$0xff] %vm269_vm3, %v9269_v19  ;;  %8829 = vmatprep.subr.bf16.mxu0 %v8828_v40  ;;  %v7648_v45 = vld [vmem:[%s10722_s10 + $0x10] sm:$0xff]  ;;  %v7636_v16 = vld [vmem:[%s10719_s7] ss:$0 sm:$0xff] }
 0x282   :  { %v2396_v20 = vmax.f32 %v2390_v0, %v2393_v17  ;;  %v7707_v8 = vld [vmem:[%s10734_s25 + $0x50] sm:$0xff] }
 0x283   :  { %v2385_v28 = vld [vmem:[#allocation6 + $0x10] ss:$2 sm:$0x3f]  ;;  %v2389_v29 = vld [vmem:[#allocation6 + $0x11] ss:$2 sm:$0x3f]  ;;  %8346 = vmatmul.mubr.msk.f32.gmra.mrb[16].mxu0 %vm1280_vm7, %v9795_v46 }
 0x284   :  { %v2395_v61 = vld [vmem:[#allocation6 + $0x12] ss:$2 sm:$0x3f]  ;;  %v2401_v12 = vld [vmem:[#allocation6 + $0x13] ss:$2 sm:$0x3f]  ;;  %8352 = vmatprep.mubr.msk.f32.mxu0 %vm1280_vm7, %v9785_v33  ;;  %v2402_v24 = vmax.f32 %v2396_v20, %v2399_v18  ;;  %v2391_v30 = vmax.f32 %v2385_v28, %v2389_v29 }
 0x285   :  { %6106 = vst.msk [vmem:[#allocation6 + $0x10] sm:$0xff] %vm269_vm3, %v9269_v19 }
 0x286   :  { %6107 = vst.msk [vmem:[#allocation6 + $0x18] sm:$0x3f] %vm2377_vm9, %v9269_v19  ;;  %v2397_v39 = vmax.f32 %v2391_v30, %v2395_v61 }
 0x287   :  { %2408 = vst.msk [vmem:[#allocation7 + $0x3] sm:$0xff] %vm269_vm3, %v2402_v24  ;;  %8353 = vmatmul.mubr.msk.f32.vlgmr.msra.gmra.mrb[14].mxu0 %vm1280_vm7, %v9787_v34 }
 0x288   :  { %8355 = vmatprep.mubr.msk.f32.mxu0 %vm1280_vm7, %v9797_v31  ;;  %8831 = vmatpush3.bf16.msra.mxu0 %v8828_v40  ;;  %v2403_v33 = vmax.f32 %v2397_v39, %v2401_v12  ;;  %v10035_v40 = vpack.c.bf16 %v3050_v15, %v3049_v47 }
 0x289   :  { %8833 = vmatprep.subr.bf16.mxu0 %v8832_v32 }
 0x28a   :  { %2409 = vst.msk [vmem:[#allocation7 + $0xb] sm:$0x3f] %vm2377_vm9, %v2403_v33 }
 0x28b   :  { %8356 = vmatmul.mubr.msk.f32.gmra.mrb[16].mxu0 %vm1280_vm7, %v9799_v49 }
 0x28c   :  { %8362 = vmatprep.mubr.msk.f32.mxu0 %vm1280_vm7, %v9789_v35 }
 0x28e   :  { %v2413_v34 = vld [vmem:[#allocation7 + $0x1] sm:$0xff] }
 0x28f   :  { %8422 = vmatprep.mubr.msk.f32.mxu1 %vm269_vm3, %v2413_v34  ;;  %8363 = vmatmul.mubr.msk.f32.vlgmr.msra.gmra.mrb[14].mxu0 %vm1280_vm7, %v9791_v26  ;;  %v2410_v36 = vld [vmem:[#allocation7] sm:$0xff] }
 0x290   :  { %8365 = vmatprep.mubr.msk.f32.mxu0 %vm1280_vm7, %v9814_v55  ;;  %8835 = vmatpush3.bf16.msra.mxu0 %v8832_v32  ;;  %v2579_v31 = vld [vmem:[#allocation7 + $0x2] sm:$0xff] }
 0x291   :  { %v2414_v46 = vld [vmem:[#allocation7 + $0x9] sm:$0x3f]  ;;  %8837 = vmatprep.subr.bf16.mxu0 %v8836_v43 }
 0x292   :  { %v2666_v35 = vld [vmem:[#allocation7 + $0x3] sm:$0xff]  ;;  %8423 = vmatmul.mubr.msk.f32.vlgmr.msra.gmra.mrb[8].mxu1 %vm269_vm3, %v2414_v46  ;;  %v2667_v48 = vld [vmem:[#allocation7 + $0xb] sm:$0x3f] }
 0x293   :  { %v2411_v49 = vld [vmem:[#allocation7 + $0x8] sm:$0x3f]  ;;  %8426 = vmatpush3.msra.mxu1 %v9726_v63  ;;  %8427 = vmatprep.mubr.msk.f32.mxu1 %vm269_vm3, %v2410_v36  ;;  %v2928_v4 = vld [vmem:[#allocation7 + $0xe] sm:$0x3f] }
 0x294   :  { %v2580_v59 = vld [vmem:[#allocation7 + $0xa] sm:$0x3f]  ;;  %8366 = vmatmul.mubr.msk.f32.gmra.mrb[16].mxu0 %vm1280_vm7, %v9801_v50  ;;  %8430 = vmatprep.subr.mxu1 %v7648_v45  ;;  %v7654_v50 = vld [vmem:[%s10722_s10 + $0x20] sm:$0xff] }
 0x295   :  { %v2753_v26 = vld [vmem:[#allocation7 + $0x4] sm:$0xff]  ;;  %v2754_v1 = vld [vmem:[#allocation7 + $0xc] sm:$0x3f]  ;;  %8372 = vmatprep.mubr.msk.f32.mxu0 %vm1280_vm7, %v9803_v37  ;;  %v7657_v37 = vld [vmem:[%s10722_s10 + $0x28] sm:$0xff] }
 0x296   :  { %v2840_v55 = vld [vmem:[#allocation7 + $0x5] sm:$0xff]  ;;  %v2841_v2 = vld [vmem:[#allocation7 + $0xd] sm:$0x3f] }
 0x297   :  { %v2927_v62 = vld [vmem:[#allocation7 + $0x6] sm:$0xff]  ;;  %6128 = vst.msk [vmem:[#allocation7 + $0x10] sm:$0xf] %vm2406_vm10, %v9268_v6 }
 0x298   :  { %6126 = vst.msk [vmem:[#allocation7] sm:$0xff] %vm269_vm3, %v9268_v6  ;;  %6127 = vst.msk [vmem:[#allocation7 + $0x8] sm:$0xff] %vm269_vm3, %v9268_v6  ;;  %8373 = vmatmul.mubr.msk.f32.vlgmr.msra.gmra.mrb[14].mxu0 %vm1280_vm7, %v9805_v51  ;;  %v7651_v63 = vld [vmem:[%s10722_s10 + $0x18] sm:$0xff]  ;;  %v7660_v51 = vld [vmem:[%s10722_s10 + $0x30] sm:$0xff] }
 0x299   :  { %8375 = vmatprep.mubr.msk.f32.mxu0 %vm1280_vm7, %v9816_v57  ;;  %8839 = vmatpush3.bf16.msra.mxu0 %v8836_v43  ;;  %v3855_v57 = vld [vmem:[%s10714_s2 + $0x18] sm:$0xff] }
 0x29a   :  { %8428 = vmatmul.mubr.msk.f32.vlgmr.msra.gmra.mrb[8].mxu1 %vm269_vm3, %v2411_v49  ;;  %8865 = vmatprep.subr.bf16.mxu0 %v8864_v44 }
 0x29b   :  { %8431 = vmatpush3.msra.mxu1 %v7648_v45  ;;  %8432 = vmatprep.mubr.msk.f32.mxu1 %vm269_vm3, %v2579_v31 }
 0x29c   :  { %8376 = vmatmul.mubr.msk.f32.gmra.mrb[16].mxu0 %vm1280_vm7, %v9807_v52  ;;  %8435 = vmatprep.subr.mxu1 %v7651_v63  ;;  %v3853_v52 = vld [vmem:[%s10714_s2 + $0x8] sm:$0xff] }
 0x29d   :  { %8382 = vmatprep.mubr.msk.f32.mxu0 %vm1280_vm7, %v9809_v53 }
 0x2a0   :  { %8383 = vmatmul.mubr.msk.f32.vlgmr.msra.gmra.mrb[14].mxu0 %vm1280_vm7, %v9811_v54  ;;  %v3854_v54 = vld [vmem:[%s10714_s2 + $0x10] sm:$0xff] }
 0x2a1   :  { %8385 = vmatprep.mubr.msk.f32.mxu0 %vm1280_vm7, %v9822_v58  ;;  %v8896_v58 = vpack.c.bf16 %v3855_v57, %v3854_v54  ;;  %8867 = vmatpush3.bf16.msra.mxu0 %v8864_v44 }
 0x2a2   :  { %8433 = vmatmul.mubr.msk.f32.vlgmr.msra.gmra.mrb[8].mxu1 %vm269_vm3, %v2580_v59  ;;  %8869 = vmatprep.subr.bf16.mxu0 %v10035_v40 }
 0x2a3   :  { %8436 = vmatpush3.msra.mxu1 %v7651_v63  ;;  %8437 = vmatprep.mubr.msk.f32.mxu1 %vm269_vm3, %v2666_v35 }
 0x2a4   :  { %8386 = vmatmul.mubr.msk.f32.gmra.mrb[16].mxu0 %vm1280_vm7, %v9793_v38  ;;  %8440 = vmatprep.subr.mxu1 %v7654_v50  ;;  %v3852_v38 = vld [vmem:[%s10714_s2] sm:$0xff] }
 0x2a5   :  { %v8893_v53 = vpack.c.bf16 %v3853_v52, %v3852_v38 }
 0x2aa   :  { %8438 = vmatmul.mubr.msk.f32.vlgmr.msra.gmra.mrb[8].mxu1 %vm269_vm3, %v2667_v48 }
 0x2ab   :  { %8441 = vmatpush3.msra.mxu1 %v7654_v50  ;;  %8442 = vmatprep.mubr.msk.f32.mxu1 %vm269_vm3, %v2753_v26 }
 0x2ac   :  { %8445 = vmatprep.subr.mxu1 %v7657_v37 }
 0x2b2   :  { %8443 = vmatmul.mubr.msk.f32.vlgmr.msra.gmra.mrb[8].mxu1 %vm269_vm3, %v2754_v1 }
 0x2b3   :  { %8446 = vmatpush3.msra.mxu1 %v7657_v37  ;;  %8447 = vmatprep.mubr.msk.f32.mxu1 %vm269_vm3, %v2840_v55 }
 0x2b4   :  { %8450 = vmatprep.subr.mxu1 %v7660_v51 }
 0x2ba   :  { %8448 = vmatmul.mubr.msk.f32.vlgmr.msra.gmra.mrb[8].mxu1 %vm269_vm3, %v2841_v2 }
 0x2bb   :  { %8451 = vmatpush3.msra.mxu1 %v7660_v51  ;;  %8452 = vmatprep.mubr.msk.f32.mxu1 %vm269_vm3, %v2927_v62 }
 0x2bc   :  { %8892 = vmatprep.subr.bf16.mxu1 %v9266_v3 }
 0x2c2   :  { %8453 = vmatmul.mubr.msk.f32.vlgmr.msra.gmra.mrb[8].mxu1 %vm269_vm3, %v2928_v4 }
 0x2c3   :  { %8894 = vmatpush3.bf16.msra.mxu1 %v8893_v53  ;;  %8518 = vmatprep.mubr.msk.f32.mxu1 %vm9267_vm0, %v9268_v6 }
 0x2c4   :  { %8895 = vmatprep.subr.bf16.mxu1 %v9266_v3 }
 0x2c7   :  { %8897 = vmatpush3.bf16.msra.mxu1 %v8896_v58  ;;  %v7663_v58 = vld [vmem:[%s10723_s11] ss:$0 sm:$0xff] }
 0x2c8   :  { %8898 = vmatprep.subr.bf16.mxu1 %v9266_v3  ;;  %v7705_v3 = vld [vmem:[%s10734_s25 + $0x40] sm:$0xff] }
 0x2cb   :  { %8900 = vmatpush3.bf16.msra.mxu1 %v8899_v7 }
 0x2cc   :  { %8516 = vmatprep.subr.mxu1 %v9268_v6 }
 0x2cf   :  { %8517 = vmatpush3.msk.msra.mxu1 %vm102_vm1, %v3858_v21 }
 0x2d0   :  { %8519 = vmatmul.mubr.msk.f32.vlgmr.msra.gmra.mrb[10].mxu1 %vm80_vm2, %v7704_v23 }
 0x2d1   :  { %8521 = vmatprep.mubr.msk.f32.mxu1 %vm9267_vm0, %v9268_v6 }
 0x2d4   :  { %8522 = vmatmul.mubr.msk.f32.gmra.mrb[12].mxu1 %vm80_vm2, %v7705_v3 }
 0x2d5   :  { %8524 = vmatprep.mubr.msk.f32.mxu1 %vm9267_vm0, %v9268_v6 }
 0x2d8   :  { %8525 = vmatmul.mubr.msk.f32.gmra.mrb[14].mxu1 %vm80_vm2, %v7706_v56 }
 0x2d9   :  { %8527 = vmatprep.mubr.msk.f32.mxu1 %vm9267_vm0, %v9268_v6 }
 0x2dc   :  { %8528 = vmatmul.mubr.msk.f32.gmra.mrb[16].mxu1 %vm80_vm2, %v7707_v8 }
 0x2dd   :  { %8530 = vmatprep.mubr.msk.f32.mxu1 %vm9267_vm0, %v9268_v6 }
 0x2e0   :  { %8531 = vmatmul.mubr.msk.f32.gmra.mrb[18].mxu1 %vm80_vm2, %v7708_v9 }
 0x2e1   :  { %8533 = vmatprep.mubr.msk.f32.mxu1 %vm9267_vm0, %v9268_v6 }
 0x2e4   :  { %8534 = vmatmul.mubr.msk.f32.gmra.mrb[20].mxu1 %vm80_vm2, %v7709_v10 }
 0x2e5   :  { %8536 = vmatprep.mubr.msk.f32.mxu1 %vm9267_vm0, %v9268_v6 }
 0x2e8   :  { %8537 = vmatmul.mubr.msk.f32.gmra.mrb[22].mxu1 %vm80_vm2, %v7710_v11  ;;  %vm3842_vm2 = vcmask 32768  }
 0x373   :  { %v8384_v60 = vpop.f32.mrb[14].mxu0 }
 0x374   :  { %v2154_v17 = vadd.f32 %v8384_v60, %v7636_v16  ;;  %v2123_v18 = vpop.f32.mrb[15].mxu0 }
 0x375   :  { %v2153_v0 = vadd.f32 %v7636_v16, %v2123_v18 }
 0x376   :  { %v2158_v20 = vmul.f32 %v2154_v17, %v2154_v17 }
 0x377   :  { %v2157_v25 = vmul.f32 %v2153_v0, %v2153_v0  ;;  %v8387_v27 = vpop.f32.mrb[16].mxu0 }
 0x378   :  { %v2162_v28 = vmul.f32 %v2158_v20, %v2154_v17  ;;  %v2156_v29 = vadd.f32 %v8387_v27, %v7636_v16  ;;  %v2133_v61 = vpop.f32.mrb[17].mxu0  ;;  %v3694_v20 = vld [vmem:[%s10726_s14] sm:$0xff] }
 0x379   :  { %v2161_v12 = vmul.f32 %v2157_v25, %v2153_v0  ;;  %v2155_v24 = vadd.f32 %v7636_v16, %v2133_v61 }
 0x37a   :  { %v2166_v30 = vmul.f32 0.044715, %v2162_v28  ;;  %v2160_v32 = vmul.f32 %v2156_v29, %v2156_v29 }
 0x37b   :  { %v2165_v39 = vmul.f32 0.044715, %v2161_v12  ;;  %v2159_v33 = vmul.f32 %v2155_v24, %v2155_v24 }
 0x37c   :  { %v2170_v41 = vadd.f32 %v2166_v30, %v2154_v17  ;;  %v2164_v42 = vmul.f32 %v2160_v32, %v2156_v29 }
 0x37d   :  { %v2169_v34 = vadd.f32 %v2165_v39, %v2153_v0  ;;  %v2163_v43 = vmul.f32 %v2159_v33, %v2155_v24 }
 0x37e   :  { %v2174_v36 = vmul.f32 0.7978846, %v2170_v41  ;;  %v2168_v45 = vmul.f32 0.044715, %v2164_v42  ;;  %v7695_v41 = vld [vmem:[%s10726_s14 + $0x10] sm:$0xff] }
 0x37f   :  { %v2173_v46 = vmul.f32 0.7978846, %v2169_v34  ;;  %v2167_v31 = vmul.f32 0.044715, %v2163_v43 }
 0x380   :  { %9180 = vtanh.f32 %v2174_v36  ;;  %v2172_v35 = vadd.f32 %v2168_v45, %v2156_v29 }
 0x381   :  { %9182 = vtanh.f32 %v2173_v46  ;;  %v2171_v49 = vadd.f32 %v2167_v31, %v2155_v24 }
 0x382   :  { %v2176_v59 = vmul.f32 0.7978846, %v2172_v35  ;;  %v7698_v35 = vld [vmem:[%s10726_s14 + $0x18] sm:$0xff] }
 0x383   :  { %v2175_v48 = vmul.f32 0.7978846, %v2171_v49 }
 0x384   :  { %9184 = vtanh.f32 %v2176_v59 }
 0x385   :  { %9186 = vtanh.f32 %v2175_v48 }
 0x38a   :  { %v9181_v26 = vpop.eup %9180 }
 0x38b   :  { %v9183_v55 = vpop.eup %9182  ;;  %v2182_v62 = vadd.f32 1.0, %v9181_v26 }
 0x38c   :  { %v2181_v1 = vadd.f32 1.0, %v9183_v55 }
 0x38d   :  { %v2186_v2 = vmul.f32 0.5, %v2182_v62 }
 0x38e   :  { %v9185_v4 = vpop.eup %9184  ;;  %v2185_v63 = vmul.f32 0.5, %v2181_v1 }
 0x38f   :  { %v9187_v50 = vpop.eup %9186  ;;  %v2190_v37 = vmul.f32 %v2186_v2, %v2154_v17  ;;  %v2184_v51 = vadd.f32 1.0, %v9185_v4 }
 0x390   :  { %v2189_v38 = vmul.f32 %v2185_v63, %v2153_v0  ;;  %v2183_v52 = vadd.f32 1.0, %v9187_v50  ;;  %v10071_v0 = vld [vmem:[%s10715_s3] ss:$0 sm:$0xff] }
 0x391   :  { %2198 = vst.msk [vmem:[#allocation5 + $0xa] sm:$0xff] %vm1280_vm7, %v2190_v37  ;;  %v2188_v53 = vmul.f32 0.5, %v2184_v51 }
 0x392   :  { %2197 = vst.msk [vmem:[#allocation5 + $0x2] sm:$0xff] %vm1280_vm7, %v2189_v38  ;;  %v2187_v54 = vmul.f32 0.5, %v2183_v52  ;;  %v7701_v38 = vld [vmem:[%s10726_s14 + $0x20] sm:$0xff] }
 0x393   :  { %v2192_v57 = vmul.f32 %v2188_v53, %v2156_v29  ;;  %v7692_v29 = vld [vmem:[%s10726_s14 + $0x8] sm:$0xff] }
 0x394   :  { %v2191_v5 = vmul.f32 %v2187_v54, %v2155_v24 }
 0x395   :  { %2201 = vst.msk [vmem:[#allocation5 + $0x1a] sm:$0xf] %vm2200_vm11, %v2192_v57  ;;  %v8454_v22 = vpop.f32.mrb[8].mxu1 }
 0x396   :  { %2199 = vst.msk [vmem:[#allocation5 + $0x12] sm:$0xff] %vm1280_vm7, %v2191_v5  ;;  %v10048_v7 = vadd.f32 %v8454_v22, %v7663_v58  ;;  %v3003_v21 = vpop.f32.mrb[9].mxu1 }
 0x397   :  { %v10050_v23 = vadd.f32 %v7663_v58, %v3003_v21 }
 0x398   :  { %v3024_v3 = vmul.f32 %v10048_v7, %v10048_v7 }
 0x399   :  { %v3023_v56 = vmul.f32 %v10050_v23, %v10050_v23 }
 0x39a   :  { %v3026_v8 = vmul.f32 %v3024_v3, %v10048_v7 }
 0x39b   :  { %v3025_v9 = vmul.f32 %v3023_v56, %v10050_v23 }
 0x39c   :  { %v3028_v10 = vmul.f32 0.044715, %v3026_v8 }
 0x39d   :  { %v2202_v11 = vld [vmem:[#allocation5] ss:$4 sm:$0xff]  ;;  %v2204_v13 = vld [vmem:[#allocation5 + $0x1] ss:$4 sm:$0xff]  ;;  %v2207_v14 = vld [vmem:[#allocation5 + $0x2] ss:$4 sm:$0xff] }
 0x39e   :  { %v2210_v44 = vld [vmem:[#allocation5 + $0x3] ss:$4 sm:$0xff]  ;;  %v3030_v47 = vadd.f32 %v3028_v10, %v10048_v7  ;;  %v3027_v15 = vmul.f32 0.044715, %v3025_v9  ;;  %v2205_v16 = vmax.f32 %v2202_v11, %v2204_v13 }
 0x39f   :  { %5930 = vst.msk [vmem:[#allocation5 + $0x10] sm:$0xff] %vm1280_vm7, %v9269_v19  ;;  %5931 = vst.msk [vmem:[#allocation5 + $0x18] sm:$0xff] %vm1280_vm7, %v9269_v19 }
 0x3a0   :  { %5928 = vst.msk [vmem:[#allocation5] sm:$0xff] %vm1280_vm7, %v9269_v19  ;;  %5929 = vst.msk [vmem:[#allocation5 + $0x8] sm:$0xff] %vm1280_vm7, %v9269_v19  ;;  %v3032_v60 = vmul.f32 0.7978846, %v3030_v47  ;;  %v3029_v17 = vadd.f32 %v3027_v15, %v10050_v23  ;;  %v2208_v18 = vmax.f32 %v2205_v16, %v2207_v14 }
 0x3a2   :  { %9188 = vtanh.f32 %v3032_v60  ;;  %v3031_v25 = vmul.f32 0.7978846, %v3029_v17  ;;  %v2211_v27 = vmax.f32 %v2208_v18, %v2210_v44 }
 0x3a3   :  { %v3956_v28 = vpop.f32.mrb[10].mxu1 }
 0x3a4   :  { %9190 = vtanh.f32 %v3031_v25  ;;  %v10080_v61 = vadd.f32 %v10071_v0, %v3956_v28  ;;  %v8520_v12 = vpop.f32.mrb[11].mxu1  ;;  %v3695_v24 = vmul.f32 %v3694_v20, %v2211_v27  ;;  %v3724_v39 = vmul.f32 %v7692_v29, %v2211_v27  ;;  %v7670_v29 = vld [vmem:[%s10724_s12 + $0x20] sm:$0xff] }
 0x3a5   :  { %v3754_v31 = vmul.f32 %v7695_v41, %v2211_v27  ;;  %v3784_v2 = vmul.f32 %v7698_v35, %v2211_v27  ;;  %v3814_v56 = vmul.f32 %v7701_v38, %v2211_v27  ;;  %v7671_v12 = vld [vmem:[%s10724_s12 + $0x28] sm:$0xff] }
 0x3a6   :  { %v3990_v30 = vmul.f32 %v10080_v61, %v10080_v61  ;;  %v3696_v32 = vsel %vm1280_vm7, %v3695_v24, 0.0  ;;  %v3725_v46 = vsel %vm1280_vm7, %v3724_v39, 0.0 }
 0x3a7   :  { %v3961_v33 = vpop.f32.mrb[12].mxu1  ;;  %3697 = vadd.xlane.f32.xlu0 %v3696_v32  ;;  %v3755_v51 = vsel %vm1280_vm7, %v3754_v31, 0.0  ;;  %v3785_v11 = vsel %vm1280_vm7, %v3784_v2, 0.0 }
 0x3a8   :  { %v3997_v42 = vmul.f32 %v3990_v30, %v10080_v61  ;;  %v10090_v34 = vadd.f32 %v10071_v0, %v3961_v33  ;;  %v8523_v43 = vpop.f32.mrb[13].mxu1 }
 0x3aa   :  { %v4004_v36 = vmul.f32 0.044715, %v3997_v42  ;;  %v3991_v45 = vmul.f32 %v10090_v34, %v10090_v34  ;;  %v8872_v42 = vpack.c.bf16 %v7671_v12, %v7670_v29 }
 0x3ab   :  { %v3966_v49 = vpop.f32.mrb[14].mxu1  ;;  %3726 = vadd.xlane.f32.xlu0 %v3725_v46 }
 0x3ac   :  { %v9189_v59 = vpop.eup %9188  ;;  %v4011_v48 = vadd.f32 %v4004_v36, %v10080_v61  ;;  %v3998_v26 = vmul.f32 %v3991_v45, %v10090_v34  ;;  %v10101_v55 = vadd.f32 %v10071_v0, %v3966_v49  ;;  %v8526_v62 = vpop.f32.mrb[15].mxu1 }
 0x3ad   :  { %v3036_v1 = vadd.f32 1.0, %v9189_v59 }
 0x3ae   :  { %v9191_v4 = vpop.eup %9190  ;;  %v4018_v63 = vmul.f32 0.7978846, %v4011_v48  ;;  %v4005_v50 = vmul.f32 0.044715, %v3998_v26  ;;  %v3992_v37 = vmul.f32 %v10101_v55, %v10101_v55 }
 0x3af   :  { %v3038_v52 = vmul.f32 0.5, %v3036_v1  ;;  %v3035_v53 = vadd.f32 1.0, %v9191_v4  ;;  %v3971_v54 = vpop.f32.mrb[16].mxu1  ;;  %3756 = vadd.xlane.f32.xlu0 %v3755_v51 }
 0x3b0   :  { %9192 = vtanh.f32 %v4018_v63  ;;  %v4012_v57 = vadd.f32 %v4005_v50, %v10090_v34  ;;  %v3999_v58 = vmul.f32 %v3992_v37, %v10101_v55  ;;  %v10112_v5 = vadd.f32 %v10071_v0, %v3971_v54  ;;  %v8529_v22 = vpop.f32.mrb[17].mxu1 }
 0x3b1   :  { %v3040_v21 = vmul.f32 %v3038_v52, %v10048_v7  ;;  %v3037_v3 = vmul.f32 0.5, %v3035_v53 }
 0x3b2   :  { %v4019_v8 = vmul.f32 0.7978846, %v4012_v57  ;;  %v4006_v9 = vmul.f32 0.044715, %v3999_v58  ;;  %v3993_v10 = vmul.f32 %v10112_v5, %v10112_v5 }
 0x3b3   :  { %3046 = vst.msk [vmem:[#allocation8 + $0xb] sm:$0x3f] %vm3045_vm12, %v3040_v21  ;;  %v3039_v13 = vmul.f32 %v3037_v3, %v10050_v23  ;;  %v3976_v14 = vpop.f32.mrb[18].mxu1  ;;  %3786 = vadd.xlane.f32.xlu0 %v3785_v11  ;;  %v3815_v23 = vsel %vm1280_vm7, %v3814_v56, 0.0  ;;  %v7675_v3 = vld [vmem:[%s10724_s12 + $0x38] sm:$0xff] }
 0x3b4   :  { %9194 = vtanh.f32 %v4019_v8  ;;  %v4013_v44 = vadd.f32 %v4006_v9, %v10101_v55  ;;  %v4000_v7 = vmul.f32 %v3993_v10, %v10112_v5  ;;  %v10123_v47 = vadd.f32 %v10071_v0, %v3976_v14  ;;  %v8532_v15 = vpop.f32.mrb[19].mxu1 }
 0x3b5   :  { %3044 = vst.msk [vmem:[#allocation8 + $0x3] sm:$0xff] %vm1280_vm7, %v3039_v13 }
 0x3b6   :  { %v4020_v16 = vmul.f32 0.7978846, %v4013_v44  ;;  %v4007_v60 = vmul.f32 0.044715, %v4000_v7  ;;  %v3994_v17 = vmul.f32 %v10123_v47, %v10123_v47 }
 0x3b7   :  { %v3981_v18 = vpop.f32.mrb[20].mxu1  ;;  %3816 = vadd.xlane.f32.xlu0 %v3815_v23  ;;  %v7679_v23 = vld [vmem:[%s10724_s12 + $0x48] sm:$0xff] }
 0x3b8   :  { %9196 = vtanh.f32 %v4020_v16  ;;  %v4014_v20 = vadd.f32 %v4007_v60, %v10112_v5  ;;  %v4001_v25 = vmul.f32 %v3994_v17, %v10123_v47  ;;  %v10132_v27 = vadd.f32 %v10071_v0, %v3981_v18  ;;  %v8535_v28 = vpop.f32.mrb[21].mxu1  ;;  %v7678_v17 = vld [vmem:[%s10724_s12 + $0x40] sm:$0xff] }
 0x3ba   :  { %v9193_v24 = vpop.eup %9192  ;;  %v4021_v30 = vmul.f32 0.7978846, %v4014_v20  ;;  %v4008_v32 = vmul.f32 0.044715, %v4001_v25  ;;  %v3995_v39 = vmul.f32 %v10132_v27, %v10132_v27  ;;  %v10148_v1 = vld [vmem:[#allocation8 + $0xb] sm:$0x3f]  ;;  %v8880_v25 = vpack.c.bf16 %v7679_v23, %v7678_v17 }
 0x3bb   :  { %v4032_v33 = vadd.f32 1.0, %v9193_v24  ;;  %v3986_v41 = vpop.f32.mrb[22].mxu1  ;;  %v10150_v2 = vld [vmem:[#allocation8 + $0xc] sm:$0x3f] }
 0x3bc   :  { %9198 = vtanh.f32 %v4021_v30  ;;  %v4015_v43 = vadd.f32 %v4008_v32, %v10123_v47  ;;  %v4002_v36 = vmul.f32 %v3995_v39, %v10132_v27  ;;  %v10145_v45 = vadd.f32 %v10071_v0, %v3986_v41  ;;  %v3051_v46 = vld [vmem:[#allocation8 + $0x1] sm:$0xff]  ;;  %v3052_v31 = vld [vmem:[#allocation8 + $0x9] sm:$0x3f]  ;;  %v8538_v49 = vpop.f32.mrb[23].mxu1 }
 0x3bd   :  { %v3047_v35 = vld [vmem:[#allocation8] sm:$0xff]  ;;  %v4039_v59 = vmul.f32 0.5, %v4032_v33  ;;  %8459 = vmatprep.mubr.msk.f32.mxu0 %vm1280_vm7, %v3051_v46  ;;  %v3048_v48 = vld [vmem:[#allocation8 + $0x8] sm:$0x3f]  ;;  %v10166_v58 = vld [vmem:[#allocation8 + $0xe] sm:$0x3f] }
 0x3be   :  { %v3218_v26 = vld [vmem:[#allocation8 + $0x2] sm:$0xff]  ;;  %v3219_v62 = vld [vmem:[#allocation8 + $0xa] sm:$0x3f]  ;;  %v9195_v63 = vpop.eup %9194  ;;  %v4022_v50 = vmul.f32 0.7978846, %v4015_v43  ;;  %v3996_v37 = vmul.f32 %v10145_v45, %v10145_v45  ;;  %8460 = vmatmul.mubr.msk.f32.vlgmr.msra.gmra.mrb[18].mxu0 %vm1280_vm7, %v3052_v31 }
 0x3bf   :  { %v10152_v4 = vld [vmem:[#allocation8 + $0xd] sm:$0x3f]  ;;  %v4009_v0 = vmul.f32 0.044715, %v4002_v36  ;;  %v3306_v51 = vld [vmem:[#allocation8 + $0x3] sm:$0xff]  ;;  %v4046_v52 = vmul.f32 %v4039_v59, %v10080_v61  ;;  %v4033_v53 = vadd.f32 1.0, %v9195_v63  ;;  %8871 = vmatpush3.bf16.msra.mxu0 %v10035_v40  ;;  %8466 = vmatprep.mubr.msk.f32.mxu0 %vm1280_vm7, %v3047_v35 }
 0x3c0   :  { %v10157_v38 = vld [vmem:[#allocation8 + $0x4] sm:$0xff]  ;;  %9200 = vtanh.f32 %v4022_v50  ;;  %v4003_v21 = vmul.f32 %v3996_v37, %v10145_v45  ;;  %8873 = vmatprep.subr.bf16.mxu0 %v8872_v42  ;;  %6758 = vst.msk [vmem:[#allocation8 + $0x10] sm:$0xf] %vm2200_vm11, %v9268_v6  ;;  %v7683_v36 = vld [vmem:[%s10724_s12 + $0x58] sm:$0xff] }
 0x3c1   :  { %v10162_v54 = vld [vmem:[#allocation8 + $0x5] sm:$0xff]  ;;  %v4016_v22 = vadd.f32 %v4009_v0, %v10132_v27  ;;  %4061 = vst.msk [vmem:[#allocation2 + $0x4] sm:$0xff] %vm269_vm3, %v4046_v52  ;;  %v4040_v40 = vmul.f32 0.5, %v4033_v53 }
 0x3c2   :  { %v10164_v57 = vld [vmem:[#allocation8 + $0x6] sm:$0xff]  ;;  %v9197_v56 = vpop.eup %9196  ;;  %v4010_v9 = vmul.f32 0.044715, %v4003_v21 }
 0x3c3   :  { %6756 = vst.msk [vmem:[#allocation8] sm:$0xff] %vm1280_vm7, %v9268_v6  ;;  %6757 = vst.msk [vmem:[#allocation8 + $0x8] sm:$0xff] %vm1280_vm7, %v9268_v6  ;;  %v7674_v61 = vld [vmem:[%s10724_s12 + $0x30] sm:$0xff]  ;;  %v4023_v8 = vmul.f32 0.7978846, %v4016_v22  ;;  %v4047_v10 = vmul.f32 %v4040_v40, %v10090_v34  ;;  %v4034_v11 = vadd.f32 1.0, %v9197_v56 }
 0x3c4   :  { %v4017_v13 = vadd.f32 %v4010_v9, %v10145_v45  ;;  %v8876_v14 = vpack.c.bf16 %v7675_v3, %v7674_v61  ;;  %v7682_v43 = vld [vmem:[%s10724_s12 + $0x50] sm:$0xff]  ;;  %v7686_v3 = vld [vmem:[%s10724_s12 + $0x60] sm:$0xff] }
 0x3c5   :  { %9202 = vtanh.f32 %v4023_v8  ;;  %4062 = vst.msk [vmem:[#allocation2 + $0xc] sm:$0xff] %vm269_vm3, %v4047_v10  ;;  %v4041_v44 = vmul.f32 0.5, %v4034_v11 }
 0x3c6   :  { %v9199_v7 = vpop.eup %9198  ;;  %v4024_v15 = vmul.f32 0.7978846, %v4017_v13  ;;  %8467 = vmatmul.mubr.msk.f32.vlgmr.msra.gmra.mrb[18].mxu0 %vm1280_vm7, %v3048_v48 }
 0x3c7   :  { %v4048_v16 = vmul.f32 %v4041_v44, %v10101_v55  ;;  %v4035_v60 = vadd.f32 1.0, %v9199_v7  ;;  %8875 = vmatpush3.bf16.msra.mxu0 %v8872_v42  ;;  %8473 = vmatprep.mubr.msk.f32.mxu0 %vm1280_vm7, %v3218_v26 }
 0x3c8   :  { %9204 = vtanh.f32 %v4024_v15  ;;  %8877 = vmatprep.subr.bf16.mxu0 %v8876_v14 }
 0x3c9   :  { %4063 = vst.msk [vmem:[#allocation2 + $0x14] sm:$0xff] %vm269_vm3, %v4048_v16  ;;  %v4042_v34 = vmul.f32 0.5, %v4035_v60 }
 0x3ca   :  { %v9201_v18 = vpop.eup %9200 }
 0x3cb   :  { %v4049_v55 = vmul.f32 %v4042_v34, %v10112_v5  ;;  %v4036_v20 = vadd.f32 1.0, %v9201_v18 }
 0x3cc   :  { %v4068_v28 = vld [vmem:[#allocation2] ss:$2 sm:$0xff]  ;;  %v4072_v29 = vld [vmem:[#allocation2 + $0x1] ss:$2 sm:$0xff] }
 0x3cd   :  { %4064 = vst.msk [vmem:[#allocation2 + $0x1c] sm:$0xff] %vm269_vm3, %v4049_v55  ;;  %v4043_v12 = vmul.f32 0.5, %v4036_v20  ;;  %v4076_v24 = vmax.f32 %v4068_v28, %v4072_v29  ;;  %v4080_v32 = vld [vmem:[#allocation2 + $0x2] ss:$2 sm:$0xff]  ;;  %v4088_v5 = vld [vmem:[#allocation2 + $0x3] ss:$2 sm:$0xff] }
 0x3ce   :  { %8474 = vmatmul.mubr.msk.f32.vlgmr.msra.gmra.mrb[18].mxu0 %vm1280_vm7, %v3219_v62  ;;  %v4096_v31 = vld [vmem:[#allocation2 + $0x4] ss:$2 sm:$0xff]  ;;  %v8884_v62 = vpack.c.bf16 %v7683_v36, %v7682_v43  ;;  %v4104_v63 = vld [vmem:[#allocation2 + $0x5] ss:$2 sm:$0xff] }
 0x3cf   :  { %v9203_v30 = vpop.eup %9202  ;;  %v4050_v39 = vmul.f32 %v4043_v12, %v10123_v47  ;;  %8879 = vmatpush3.bf16.msra.mxu0 %v8876_v14  ;;  %8480 = vmatprep.mubr.msk.f32.mxu0 %vm1280_vm7, %v3306_v51  ;;  %v4084_v41 = vmax.f32 %v4076_v24, %v4080_v32 }
 0x3d0   :  { %v4037_v33 = vadd.f32 1.0, %v9203_v30  ;;  %8881 = vmatprep.subr.bf16.mxu0 %v8880_v25  ;;  %v4112_v52 = vld [vmem:[#allocation2 + $0x6] ss:$2 sm:$0xff]  ;;  %v4120_v40 = vld [vmem:[#allocation2 + $0x7] ss:$2 sm:$0xff] }
 0x3d1   :  { %4065 = vst.msk [vmem:[#allocation2 + $0x24] sm:$0xff] %vm269_vm3, %v4050_v39  ;;  %v4092_v46 = vmax.f32 %v4084_v41, %v4088_v5  ;;  %v4115_v41 = vld [vmem:[#allocation2 + $0x36] ss:$2 sm:$0x3] }
 0x3d2   :  { %v4044_v42 = vmul.f32 0.5, %v4037_v33  ;;  %v9205_v47 = vpop.eup %9204 }
 0x3d3   :  { %v4038_v49 = vadd.f32 1.0, %v9205_v47  ;;  %v4100_v59 = vmax.f32 %v4092_v46, %v4096_v31  ;;  %v4123_v47 = vld [vmem:[#allocation2 + $0x37] ss:$2 sm:$0x3] }
 0x3d4   :  { %v4051_v35 = vmul.f32 %v4044_v42, %v10132_v27  ;;  %v4069_v48 = vld [vmem:[#allocation2 + $0x10] ss:$2 sm:$0xff]  ;;  %v4073_v26 = vld [vmem:[#allocation2 + $0x11] ss:$2 sm:$0xff] }
 0x3d5   :  { %v4077_v50 = vmax.f32 %v4069_v48, %v4073_v26  ;;  %v4108_v0 = vmax.f32 %v4100_v59, %v4104_v63  ;;  %v4081_v37 = vld [vmem:[#allocation2 + $0x12] ss:$2 sm:$0xff]  ;;  %v4045_v51 = vmul.f32 0.5, %v4038_v49  ;;  %v4089_v22 = vld [vmem:[#allocation2 + $0x13] ss:$2 sm:$0xff] }
 0x3d6   :  { %4066 = vst.msk [vmem:[#allocation2 + $0x2c] sm:$0xff] %vm269_vm3, %v4051_v35  ;;  %8481 = vmatmul.mubr.msk.f32.vlgmr.msra.gmra.mrb[18].mxu0 %vm1280_vm7, %v10148_v1  ;;  %v7687_v1 = vld [vmem:[%s10724_s12 + $0x68] sm:$0xff]  ;;  %v4097_v8 = vld [vmem:[#allocation2 + $0x14] ss:$2 sm:$0xff]  ;;  %v4105_v9 = vld [vmem:[#allocation2 + $0x15] ss:$2 sm:$0xff] }
 0x3d7   :  { %v4085_v53 = vmax.f32 %v4077_v50, %v4081_v37  ;;  %8883 = vmatpush3.bf16.msra.mxu0 %v8880_v25  ;;  %8487 = vmatprep.mubr.msk.f32.mxu0 %vm1280_vm7, %v10157_v38  ;;  %v4116_v27 = vmax.f32 %v4108_v0, %v4112_v52  ;;  %v4052_v21 = vmul.f32 %v4045_v51, %v10145_v45  ;;  %v7729_v48 = vld [vmem:[%s10716_s4 + $0x10] sm:$0xff]  ;;  %v7734_v50 = vld [vmem:[%s10716_s4 + $0x18] sm:$0xff] }
 0x3d8   :  { %8885 = vmatprep.subr.bf16.mxu0 %v8884_v62  ;;  %v8888_v11 = vpack.c.bf16 %v7687_v1, %v7686_v3  ;;  %v4113_v7 = vld [vmem:[#allocation2 + $0x16] ss:$2 sm:$0xff]  ;;  %v4121_v34 = vld [vmem:[#allocation2 + $0x17] ss:$2 sm:$0xff] }
 0x3d9   :  { %v4093_v61 = vmax.f32 %v4085_v53, %v4089_v22  ;;  %v4124_v56 = vmax.f32 %v4116_v27, %v4120_v40  ;;  %4067 = vst.msk [vmem:[#allocation2 + $0x34] sm:$0x3] %vm277_vm4, %v4052_v21  ;;  %v7739_v53 = vld [vmem:[%s10716_s4 + $0x20] sm:$0xff] }
 0x3db   :  { %v4101_v38 = vmax.f32 %v4093_v61, %v4097_v8  ;;  %4133 = vst.msk [vmem:[#allocation3 + $0x4] sm:$0xff] %vm269_vm3, %v4124_v56  ;;  %v7744_v61 = vld [vmem:[%s10716_s4 + $0x28] sm:$0xff] }
 0x3dd   :  { %v4070_v45 = vld [vmem:[#allocation2 + $0x20] ss:$2 sm:$0xff]  ;;  %v4071_v10 = vld [vmem:[#allocation2 + $0x30] ss:$2 sm:$0x3]  ;;  %v4109_v13 = vmax.f32 %v4101_v38, %v4105_v9 }
 0x3de   :  { %v4074_v14 = vld [vmem:[#allocation2 + $0x21] ss:$2 sm:$0xff]  ;;  %v4075_v44 = vld [vmem:[#allocation2 + $0x31] ss:$2 sm:$0x3]  ;;  %8488 = vmatmul.mubr.msk.f32.vlgmr.msra.gmra.mrb[18].mxu0 %vm1280_vm7, %v10150_v2 }
 0x3df   :  { %v4078_v15 = vmax.f32 %v4070_v45, %v4074_v14  ;;  %v4117_v16 = vmax.f32 %v4109_v13, %v4113_v7  ;;  %v4082_v60 = vld [vmem:[#allocation2 + $0x22] ss:$2 sm:$0xff]  ;;  %8887 = vmatpush3.bf16.msra.mxu0 %v8884_v62  ;;  %8494 = vmatprep.mubr.msk.f32.mxu0 %vm1280_vm7, %v10162_v54  ;;  %v4079_v17 = vmax.f32 %v4071_v10, %v4075_v44  ;;  %v4090_v20 = vld [vmem:[#allocation2 + $0x23] ss:$2 sm:$0xff]  ;;  %v7754_v13 = vld [vmem:[%s10716_s4 + $0x38] sm:$0xff] }
 0x3e0   :  { %8889 = vmatprep.subr.bf16.mxu0 %v8888_v11  ;;  %v4083_v55 = vld [vmem:[#allocation2 + $0x32] ss:$2 sm:$0x3]  ;;  %v4091_v29 = vld [vmem:[#allocation2 + $0x33] ss:$2 sm:$0x3] }
 0x3e1   :  { %v4086_v23 = vmax.f32 %v4078_v15, %v4082_v60  ;;  %v4125_v18 = vmax.f32 %v4117_v16, %v4121_v34  ;;  %v4087_v25 = vmax.f32 %v4079_v17, %v4083_v55  ;;  %v4098_v12 = vld [vmem:[#allocation2 + $0x24] ss:$2 sm:$0xff]  ;;  %v4099_v30 = vld [vmem:[#allocation2 + $0x34] ss:$2 sm:$0x3]  ;;  %v5951_v55 = vld [vmem:[%s10720_s8 + $0x18] sm:$0xff] }
 0x3e2   :  { %v4106_v32 = vld [vmem:[#allocation2 + $0x25] ss:$2 sm:$0xff]  ;;  %v4107_v5 = vld [vmem:[#allocation2 + $0x35] ss:$2 sm:$0x3] }
 0x3e3   :  { %v4094_v28 = vmax.f32 %v4086_v23, %v4090_v20  ;;  %4134 = vst.msk [vmem:[#allocation3 + $0xc] sm:$0xff] %vm269_vm3, %v4125_v18  ;;  %v4095_v2 = vmax.f32 %v4087_v25, %v4091_v29  ;;  %v7720_v54 = vld [vmem:[%s10716_s4 + $0x8] sm:$0xff]  ;;  %v4137_v62 = vld [vmem:[#allocation3] sm:$0xff]  ;;  %v7749_v38 = vld [vmem:[%s10716_s4 + $0x30] sm:$0xff] }
 0x3e4   :  { %v4114_v42 = vld [vmem:[#allocation2 + $0x26] ss:$2 sm:$0xff]  ;;  %v4122_v46 = vld [vmem:[#allocation2 + $0x27] ss:$2 sm:$0xff]  ;;  %v4768_v23 = vld [vmem:[#allocation3 + $0x1e] sm:$0x7] }
 0x3e5   :  { %v4102_v24 = vmax.f32 %v4094_v28, %v4098_v12  ;;  %v4103_v39 = vmax.f32 %v4095_v2, %v4099_v30  ;;  %v4142_v59 = vld [vmem:[#allocation3 + $0x1] sm:$0xff]  ;;  %v5950_v18 = vld [vmem:[%s10720_s8 + $0x10] sm:$0xff] }
 0x3e6   :  { %8495 = vmatmul.mubr.msk.f32.vlgmr.msra.gmra.mrb[18].mxu0 %vm1280_vm7, %v10152_v4  ;;  %v4141_v4 = vld [vmem:[%s10716_s4] sm:$0xff]  ;;  %v5949_v15 = vld [vmem:[%s10720_s8 + $0x8] sm:$0xff]  ;;  %v8937_v25 = vpack.c.bf16 %v5951_v55, %v5950_v18 }
 0x3e7   :  { %v4110_v33 = vmax.f32 %v4102_v24, %v4106_v32  ;;  %8891 = vmatpush3.bf16.msra.mxu0 %v8888_v11  ;;  %8501 = vmatprep.mubr.msk.f32.mxu0 %vm1280_vm7, %v10164_v57  ;;  %v4111_v43 = vmax.f32 %v4103_v39, %v4107_v5  ;;  %v4341_v51 = vld [vmem:[#allocation3 + $0x2] sm:$0xff]  ;;  %v4874_v24 = vld [vmem:[#allocation3 + $0x1f] sm:$0x7] }
 0x3e8   :  { %8539 = vmatprep.subr.mxu0 %v7720_v54  ;;  %v4447_v21 = vld [vmem:[#allocation3 + $0x3] sm:$0xff]  ;;  %v5955_v39 = vld [vmem:[%s10720_s8 + $0x38] sm:$0xff] }
 0x3e9   :  { %v4118_v36 = vmax.f32 %v4110_v33, %v4114_v42  ;;  %v4119_v35 = vmax.f32 %v4111_v43, %v4115_v41  ;;  %v4553_v56 = vld [vmem:[#allocation3 + $0x4] sm:$0xff]  ;;  %v5958_v43 = vld [vmem:[%s10720_s8 + $0x50] sm:$0xff] }
 0x3ea   :  { %v4143_v57 = vld [vmem:[#allocation3 + $0x9] sm:$0xff]  ;;  %v5948_v7 = vld [vmem:[%s10720_s8] sm:$0xff] }
 0x3eb   :  { %v4126_v31 = vmax.f32 %v4118_v36, %v4122_v46  ;;  %v4127_v49 = vmax.f32 %v4119_v35, %v4123_v47  ;;  %v4138_v63 = vld [vmem:[#allocation3 + $0x8] sm:$0xff]  ;;  %v8933_v60 = vpack.c.bf16 %v5949_v15, %v5948_v7  ;;  %v5952_v29 = vld [vmem:[%s10720_s8 + $0x20] sm:$0xff]  ;;  %v5959_v36 = vld [vmem:[%s10720_s8 + $0x58] sm:$0xff] }
 0x3ec   :  { %v4342_v52 = vld [vmem:[#allocation3 + $0xa] sm:$0xff]  ;;  %v7807_v32 = vld [vmem:[%s10735_s28 + $0x20] sm:$0xff]  ;;  %v8953_v46 = vpack.c.bf16 %v5959_v36, %v5958_v43 }
 0x3ed   :  { %4135 = vst.msk [vmem:[#allocation3 + $0x14] sm:$0xff] %vm269_vm3, %v4126_v31  ;;  %v4448_v40 = vld [vmem:[#allocation3 + $0xb] sm:$0xff]  ;;  %v5956_v41 = vld [vmem:[%s10720_s8 + $0x40] sm:$0xff] }
 0x3ee   :  { %8502 = vmatmul.mubr.msk.f32.vlgmr.msra.gmra.mrb[18].mxu0 %vm1280_vm7, %v10166_v58  ;;  %4136 = vst.msk [vmem:[#allocation3 + $0x1c] sm:$0x3] %vm277_vm4, %v4127_v49  ;;  %v4554_v8 = vld [vmem:[#allocation3 + $0xc] sm:$0xff]  ;;  %v5960_v47 = vld [vmem:[%s10720_s8 + $0x60] sm:$0xf] }
 0x3ef   :  { %8540 = vmatpush3.msra.mxu0 %v7720_v54  ;;  %8541 = vmatprep.mubr.msk.f32.mxu0 %vm269_vm3, %v4142_v59  ;;  %v4659_v10 = vld [vmem:[#allocation3 + $0x5] sm:$0xff]  ;;  %v5954_v54 = vld [vmem:[%s10720_s8 + $0x30] sm:$0xff]  ;;  %v7810_v49 = vld [vmem:[%s10735_s28 + $0x38] sm:$0x3] }
 0x3f0   :  { %8547 = vmatprep.subr.mxu0 %v4141_v4  ;;  %v4765_v16 = vld [vmem:[#allocation3 + $0x6] sm:$0xff]  ;;  %v8945_v33 = vpack.c.bf16 %v5955_v39, %v5954_v54  ;;  %v7809_v35 = vld [vmem:[%s10735_s28 + $0x30] sm:$0xff]  ;;  %v7761_v59 = vld [vmem:[%s10718_s6 + $0x18] sm:$0xff] }
 0x3f1   :  { %v4871_v20 = vld [vmem:[#allocation3 + $0x7] sm:$0xff] }
 0x3f2   :  { %8542 = vmatmul.mubr.msk.f32.vlgmr.msra.gmra.mrb[20].mxu0 %vm269_vm3, %v4143_v57  ;;  %v5953_v12 = vld [vmem:[%s10720_s8 + $0x28] sm:$0xff]  ;;  %v3705_v15 = vld [vmem:[%s10727_s15] sm:$0xff] }
 0x3f3   :  { %8548 = vmatpush3.msra.mxu0 %v4141_v4  ;;  %v8941_v30 = vpack.c.bf16 %v5953_v12, %v5952_v29  ;;  %v5957_v5 = vld [vmem:[%s10720_s8 + $0x48] sm:$0xff]  ;;  %v7760_v4 = vld [vmem:[%s10718_s6 + $0x10] sm:$0xff] }
 0x3f4   :  { %v4144_v26 = vld [vmem:[#allocation3 + $0x11] sm:$0xff]  ;;  %8555 = vmatprep.subr.mxu0 %v7729_v48  ;;  %v4145_v58 = vld [vmem:[#allocation3 + $0x19] sm:$0x7]  ;;  %v8949_v42 = vpack.c.bf16 %v5957_v5, %v5956_v41  ;;  %v7808_v31 = vld [vmem:[%s10735_s28 + $0x28] sm:$0xff]  ;;  %v8901_v57 = vpack.c.bf16 %v7761_v59, %v7760_v4 }
 0x3f5   :  { %8544 = vmatprep.mubr.msk.f32.mxu0 %vm269_vm3, %v4144_v26  ;;  %v4139_v0 = vld [vmem:[#allocation3 + $0x10] sm:$0xff]  ;;  %v4140_v37 = vld [vmem:[#allocation3 + $0x18] sm:$0x7]  ;;  %v4450_v1 = vld [vmem:[#allocation3 + $0x1b] sm:$0x7] }
 0x3f6   :  { %8545 = vmatmul.mubr.msk.f32.gmra.mrb[22].mxu0 %vm269_vm3, %v4145_v58  ;;  %v4343_v27 = vld [vmem:[#allocation3 + $0x12] sm:$0xff]  ;;  %v4344_v22 = vld [vmem:[#allocation3 + $0x1a] sm:$0x7]  ;;  %v4662_v44 = vld [vmem:[#allocation3 + $0x1d] sm:$0x7]  ;;  %8902 = vmatprep.subr.bf16.mxu1 %v8901_v57 }
 0x3f7   :  { %8549 = vmatprep.mubr.msk.f32.mxu0 %vm269_vm3, %v4137_v62  ;;  %v4449_v3 = vld [vmem:[#allocation3 + $0x13] sm:$0xff]  ;;  %v4556_v45 = vld [vmem:[#allocation3 + $0x1c] sm:$0x7]  ;;  %8904 = vmatpush3.bf16.msra.mxu1 %v8901_v57  ;;  %v5038_v26 = vld [vmem:[%s10718_s6 + $0x8] sm:$0xff] }
 0x3f8   :  { %v4555_v9 = vld [vmem:[#allocation3 + $0x14] sm:$0xff]  ;;  %v7690_v62 = vld [vmem:[%s10725_s13] ss:$0 sm:$0xff] }
 0x3f9   :  { %v4660_v11 = vld [vmem:[#allocation3 + $0xd] sm:$0xff]  ;;  %v4661_v14 = vld [vmem:[#allocation3 + $0x15] sm:$0xff] }
 0x3fa   :  { %8550 = vmatmul.mubr.msk.f32.vlgmr.msra.gmra.mrb[20].mxu0 %vm269_vm3, %v4138_v63  ;;  %v4766_v34 = vld [vmem:[#allocation3 + $0xe] sm:$0xff]  ;;  %v4767_v17 = vld [vmem:[#allocation3 + $0x16] sm:$0xff] }
 0x3fb   :  { %8556 = vmatpush3.msra.mxu0 %v7729_v48  ;;  %8552 = vmatprep.mubr.msk.f32.mxu0 %vm269_vm3, %v4139_v0  ;;  %v4872_v28 = vld [vmem:[#allocation3 + $0xf] sm:$0xff]  ;;  %v4873_v2 = vld [vmem:[#allocation3 + $0x17] sm:$0xff]  ;;  %v5037_v48 = vld [vmem:[%s10718_s6] sm:$0xff] }
 0x3fc   :  { %8563 = vmatprep.subr.mxu0 %v7734_v50  ;;  %v10361_v58 = vpack.c.bf16 %v5038_v26, %v5037_v48 }
 0x3fe   :  { %8553 = vmatmul.mubr.msk.f32.gmra.mrb[22].mxu0 %vm269_vm3, %v4140_v37  ;;  %8906 = vmatprep.subr.bf16.mxu1 %v10361_v58 }
 0x3ff   :  { %8557 = vmatprep.mubr.msk.f32.mxu0 %vm269_vm3, %v4341_v51 }
 0x402   :  { %8558 = vmatmul.mubr.msk.f32.vlgmr.msra.gmra.mrb[20].mxu0 %vm269_vm3, %v4342_v52 }
 0x403   :  { %8564 = vmatpush3.msra.mxu0 %v7734_v50  ;;  %8560 = vmatprep.mubr.msk.f32.mxu0 %vm269_vm3, %v4343_v27 }
 0x404   :  { %8571 = vmatprep.subr.mxu0 %v7739_v53 }
 0x406   :  { %8561 = vmatmul.mubr.msk.f32.gmra.mrb[22].mxu0 %vm269_vm3, %v4344_v22 }
 0x407   :  { %8565 = vmatprep.mubr.msk.f32.mxu0 %vm269_vm3, %v4447_v21 }
 0x40a   :  { %8566 = vmatmul.mubr.msk.f32.vlgmr.msra.gmra.mrb[20].mxu0 %vm269_vm3, %v4448_v40 }
 0x40b   :  { %8572 = vmatpush3.msra.mxu0 %v7739_v53  ;;  %8568 = vmatprep.mubr.msk.f32.mxu0 %vm269_vm3, %v4449_v3 }
 0x40c   :  { %8579 = vmatprep.subr.mxu0 %v7744_v61 }
 0x40e   :  { %8569 = vmatmul.mubr.msk.f32.gmra.mrb[22].mxu0 %vm269_vm3, %v4450_v1 }
 0x40f   :  { %8573 = vmatprep.mubr.msk.f32.mxu0 %vm269_vm3, %v4553_v56 }
 0x412   :  { %8574 = vmatmul.mubr.msk.f32.vlgmr.msra.gmra.mrb[20].mxu0 %vm269_vm3, %v4554_v8 }
 0x413   :  { %8580 = vmatpush3.msra.mxu0 %v7744_v61  ;;  %8576 = vmatprep.mubr.msk.f32.mxu0 %vm269_vm3, %v4555_v9 }
 0x414   :  { %8587 = vmatprep.subr.mxu0 %v7749_v38 }
 0x416   :  { %8577 = vmatmul.mubr.msk.f32.gmra.mrb[22].mxu0 %vm269_vm3, %v4556_v45 }
 0x417   :  { %8581 = vmatprep.mubr.msk.f32.mxu0 %vm269_vm3, %v4659_v10 }
 0x41a   :  { %8582 = vmatmul.mubr.msk.f32.vlgmr.msra.gmra.mrb[20].mxu0 %vm269_vm3, %v4660_v11 }
 0x41b   :  { %8588 = vmatpush3.msra.mxu0 %v7749_v38  ;;  %8584 = vmatprep.mubr.msk.f32.mxu0 %vm269_vm3, %v4661_v14  ;;  %v7693_v14 = vld [vmem:[%s10727_s15 + $0x8] sm:$0xff] }
 0x41c   :  { %8595 = vmatprep.subr.mxu0 %v7754_v13 }
 0x41e   :  { %8585 = vmatmul.mubr.msk.f32.gmra.mrb[22].mxu0 %vm269_vm3, %v4662_v44 }
 0x41f   :  { %8589 = vmatprep.mubr.msk.f32.mxu0 %vm269_vm3, %v4765_v16 }
 0x422   :  { %8590 = vmatmul.mubr.msk.f32.vlgmr.msra.gmra.mrb[20].mxu0 %vm269_vm3, %v4766_v34 }
 0x423   :  { %8596 = vmatpush3.msra.mxu0 %v7754_v13  ;;  %8592 = vmatprep.mubr.msk.f32.mxu0 %vm269_vm3, %v4767_v17 }
 0x424   :  { %8934 = vmatprep.subr.bf16.mxu0 %v8933_v60 }
 0x426   :  { %8593 = vmatmul.mubr.msk.f32.gmra.mrb[22].mxu0 %vm269_vm3, %v4768_v23 }
 0x427   :  { %8597 = vmatprep.mubr.msk.f32.mxu0 %vm269_vm3, %v4871_v20  ;;  %v7699_v20 = vld [vmem:[%s10727_s15 + $0x18] sm:$0xff] }
 0x42a   :  { %8598 = vmatmul.mubr.msk.f32.vlgmr.msra.gmra.mrb[20].mxu0 %vm269_vm3, %v4872_v28  ;;  %v7702_v28 = vld [vmem:[%s10727_s15 + $0x20] sm:$0xff] }
 0x42b   :  { %8936 = vmatpush3.bf16.msra.mxu0 %v8933_v60  ;;  %8600 = vmatprep.mubr.msk.f32.mxu0 %vm269_vm3, %v4873_v2  ;;  %v7696_v60 = vld [vmem:[%s10727_s15 + $0x10] sm:$0xff] }
 0x42c   :  { %8938 = vmatprep.subr.bf16.mxu0 %v8937_v25 }
 0x42e   :  { %8601 = vmatmul.mubr.msk.f32.gmra.mrb[22].mxu0 %vm269_vm3, %v4874_v24  ;;  %v7759_v24 = vld [vmem:[%s10717_s5] ss:$0 sm:$0xff]  ;;  %s7533_s5 = sshll.u32 %s9270_s19, 4  ;;  %s7534_s5 = int_to_ptr.vmem [resolvable:$true] %s7533_s5 }
 0x42f   :  { %8940 = vmatpush3.bf16.msra.mxu0 %v8937_v25  ;;  %8709 = vmatprep.mubr.msk.f32.mxu0 %vm2236_vm5, %v7807_v32  ;;  %p9247_p1 = scmp.lt.s32.totalorder %s7534_s5, %s7534_s5 }
 0x430   :  { %8942 = vmatprep.subr.bf16.mxu0 %v8941_v30 }
 0x433   :  { %8944 = vmatpush3.bf16.msra.mxu0 %v8941_v30 }
 0x434   :  { %8946 = vmatprep.subr.bf16.mxu0 %v8945_v33 }
 0x437   :  { %8948 = vmatpush3.bf16.msra.mxu0 %v8945_v33 }
 0x438   :  { %8950 = vmatprep.subr.bf16.mxu0 %v8949_v42 }
 0x43b   :  { %8952 = vmatpush3.bf16.msra.mxu0 %v8949_v42 }
 0x43c   :  { %8954 = vmatprep.subr.bf16.mxu0 %v8953_v46 }
 0x43f   :  { %8956 = vmatpush3.bf16.msra.mxu0 %v8953_v46 }
 0x440   :  { %8707 = vmatprep.subr.msk.mxu0 %vm2249_vm6, %v5960_v47 }
 0x443   :  { %8708 = vmatpush3.msk.msra.mxu0 %vm2249_vm6, %v5960_v47 }
 0x444   :  { %8710 = vmatmul.mubr.msk.f32.vlgmr.msra.gmra.mrb[24].mxu0 %vm2236_vm5, %v7808_v31 }
 0x445   :  { %8712 = vmatprep.mubr.msk.f32.mxu0 %vm2236_vm5, %v7809_v35 }
 0x448   :  { %8713 = vmatmul.mubr.msk.f32.gmra.mrb[26].mxu0 %vm2236_vm5, %v7810_v49 }
 0x4c1   :  { %v8503_v63 = vpop.f32.mrb[18].mxu0 }
 0x4c2   :  { %v3666_v50 = vadd.f32 %v8503_v63, %v7690_v62  ;;  %v3647_v0 = vpop.f32.mrb[19].mxu0 }
 0x4c3   :  { %v3665_v37 = vadd.f32 %v7690_v62, %v3647_v0 }
 0x4c4   :  { %v3668_v51 = vmul.f32 %v3666_v50, %v3666_v50 }
 0x4c5   :  { %v3667_v52 = vmul.f32 %v3665_v37, %v3665_v37 }
 0x4c6   :  { %v3670_v53 = vmul.f32 %v3668_v51, %v3666_v50 }
 0x4c7   :  { %v3669_v27 = vmul.f32 %v3667_v52, %v3665_v37 }
 0x4c8   :  { %v3672_v22 = vmul.f32 0.044715, %v3670_v53 }
 0x4c9   :  { %v3671_v21 = vmul.f32 0.044715, %v3669_v27 }
 0x4ca   :  { %v3674_v40 = vadd.f32 %v3672_v22, %v3666_v50 }
 0x4cb   :  { %v3673_v61 = vadd.f32 %v3671_v21, %v3665_v37 }
 0x4cc   :  { %v3676_v3 = vmul.f32 0.7978846, %v3674_v40  ;;  %v7811_v40 = vld [vmem:[%s10721_s9] ss:$0 sm:$0xff] }
 0x4cd   :  { %v3675_v1 = vmul.f32 0.7978846, %v3673_v61 }
 0x4ce   :  { %9206 = vtanh.f32 %v3676_v3 }
 0x4cf   :  { %9208 = vtanh.f32 %v3675_v1 }
 0x4d8   :  { %v9207_v56 = vpop.eup %9206 }
 0x4d9   :  { %v9209_v8 = vpop.eup %9208  ;;  %v3680_v38 = vadd.f32 1.0, %v9207_v56 }
 0x4da   :  { %v3679_v9 = vadd.f32 1.0, %v9209_v8 }
 0x4db   :  { %v3682_v45 = vmul.f32 0.5, %v3680_v38 }
 0x4dc   :  { %v3681_v10 = vmul.f32 0.5, %v3679_v9 }
 0x4dd   :  { %v3684_v11 = vmul.f32 %v3682_v45, %v3666_v50 }
 0x4de   :  { %v3683_v13 = vmul.f32 %v3681_v10, %v3665_v37 }
 0x4df   :  { %3688 = vst.msk [vmem:[#allocation9 + $0x9] sm:$0x3f] %vm3045_vm12, %v3684_v11 }
 0x4e0   :  { %3687 = vst.msk [vmem:[#allocation9 + $0x1] sm:$0xff] %vm1280_vm7, %v3683_v13 }
 0x4e7   :  { %v3689_v44 = vld [vmem:[#allocation9] ss:$2 sm:$0xff]  ;;  %v3691_v7 = vld [vmem:[#allocation9 + $0x1] ss:$2 sm:$0xff] }
 0x4e8   :  { %v3692_v16 = vmax.f32 %v3689_v44, %v3691_v7  ;;  %7393 = vst.msk [vmem:[#allocation9] sm:$0xff] %vm1280_vm7, %v9269_v19  ;;  %7394 = vst.msk [vmem:[#allocation9 + $0x8] sm:$0xff] %vm1280_vm7, %v9269_v19 }
 0x4ea   :  { %v3736_v34 = vmul.f32 %v7693_v14, %v3692_v16  ;;  %v3706_v17 = vmul.f32 %v3705_v15, %v3692_v16  ;;  %v3766_v55 = vmul.f32 %v7696_v60, %v3692_v16  ;;  %v3796_v19 = vmul.f32 %v7699_v20, %v3692_v16 }
 0x4eb   :  { %v3826_v12 = vmul.f32 %v7702_v28, %v3692_v16 }
 0x4ec   :  { %v3737_v23 = vsel %vm1280_vm7, %v3736_v34, 0.0  ;;  %v3707_v18 = vsel %vm1280_vm7, %v3706_v17, 0.0  ;;  %v3767_v25 = vsel %vm1280_vm7, %v3766_v55, 0.0  ;;  %v3797_v29 = vsel %vm1280_vm7, %v3796_v19, 0.0 }
 0x4ed   :  { %3738 = vadd.xlane.f32.xlu1 %v3737_v23  ;;  %3708 = vadd.xlane.f32.xlu0 %v3707_v18  ;;  %v3827_v2 = vsel %vm1280_vm7, %v3826_v12, 0.0 }
 0x4f1   :  { %3768 = vadd.xlane.f32.xlu1 %v3767_v25 }
 0x4f5   :  { %3798 = vadd.xlane.f32.xlu1 %v3797_v29 }
 0x4f9   :  { %3828 = vadd.xlane.f32.xlu1 %v3827_v2 }
 0x4fd   :  { %v8599_v30 = vpop.f32.mrb[20].mxu0 }
 0x4fe   :  { %v4985_v32 = vadd.f32 %v8599_v30, %v7759_v24  ;;  %v4954_v54 = vpop.f32.mrb[21].mxu0 }
 0x4ff   :  { %v4984_v39 = vadd.f32 %v7759_v24, %v4954_v54  ;;  %v7771_v54 = vld [vmem:[%s10718_s6 + $0x28] sm:$0xff] }
 0x500   :  { %v4989_v33 = vmul.f32 %v4985_v32, %v4985_v32 }
 0x501   :  { %v4988_v41 = vmul.f32 %v4984_v39, %v4984_v39  ;;  %v8602_v5 = vpop.f32.mrb[22].mxu0 }
 0x502   :  { %v4993_v42 = vmul.f32 %v4989_v33, %v4985_v32  ;;  %v4987_v43 = vadd.f32 %v8602_v5, %v7759_v24  ;;  %v4964_v36 = vpop.f32.mrb[23].mxu0 }
 0x503   :  { %v4992_v46 = vmul.f32 %v4988_v41, %v4984_v39  ;;  %v4986_v47 = vadd.f32 %v7759_v24, %v4964_v36 }
 0x504   :  { %v4997_v31 = vmul.f32 0.044715, %v4993_v42  ;;  %v4991_v35 = vmul.f32 %v4987_v43, %v4987_v43 }
 0x505   :  { %v4996_v49 = vmul.f32 0.044715, %v4992_v46  ;;  %v4990_v4 = vmul.f32 %v4986_v47, %v4986_v47 }
 0x506   :  { %v5001_v59 = vadd.f32 %v4997_v31, %v4985_v32  ;;  %v4995_v57 = vmul.f32 %v4991_v35, %v4987_v43 }
 0x507   :  { %v5000_v48 = vadd.f32 %v4996_v49, %v4984_v39  ;;  %v4994_v26 = vmul.f32 %v4990_v4, %v4986_v47 }
 0x508   :  { %v5005_v62 = vmul.f32 0.7978846, %v5001_v59  ;;  %v4999_v63 = vmul.f32 0.044715, %v4995_v57 }
 0x509   :  { %v5004_v50 = vmul.f32 0.7978846, %v5000_v48  ;;  %v4998_v0 = vmul.f32 0.044715, %v4994_v26  ;;  %v7776_v48 = vld [vmem:[%s10718_s6 + $0x30] sm:$0xff]  ;;  %v7777_v26 = vld [vmem:[%s10718_s6 + $0x38] sm:$0xff] }
 0x50a   :  { %9210 = vtanh.f32 %v5005_v62  ;;  %v5003_v37 = vadd.f32 %v4999_v63, %v4987_v43 }
 0x50b   :  { %9212 = vtanh.f32 %v5004_v50  ;;  %v5002_v51 = vadd.f32 %v4998_v0, %v4986_v47 }
 0x50c   :  { %v5007_v52 = vmul.f32 0.7978846, %v5003_v37 }
 0x50d   :  { %v5006_v53 = vmul.f32 0.7978846, %v5002_v51 }
 0x50e   :  { %9214 = vtanh.f32 %v5007_v52 }
 0x50f   :  { %9216 = vtanh.f32 %v5006_v53 }
 0x514   :  { %v9211_v27 = vpop.eup %9210 }
 0x515   :  { %v9213_v22 = vpop.eup %9212  ;;  %v5013_v21 = vadd.f32 1.0, %v9211_v27  ;;  %v7782_v27 = vld [vmem:[%s10718_s6 + $0x40] sm:$0xff] }
 0x516   :  { %v5012_v61 = vadd.f32 1.0, %v9213_v22  ;;  %v7783_v22 = vld [vmem:[%s10718_s6 + $0x48] sm:$0xff] }
 0x517   :  { %v5017_v3 = vmul.f32 0.5, %v5013_v21  ;;  %v8711_v1 = vpop.f32.mrb[24].mxu0 }
 0x518   :  { %v9215_v56 = vpop.eup %9214  ;;  %v5016_v8 = vmul.f32 0.5, %v5012_v61  ;;  %v10399_v38 = vadd.f32 %v8711_v1, %v7811_v40  ;;  %v6049_v9 = vpop.f32.mrb[25].mxu0 }
 0x519   :  { %v9217_v45 = vpop.eup %9216  ;;  %v5021_v10 = vmul.f32 %v5017_v3, %v4985_v32  ;;  %v5015_v11 = vadd.f32 1.0, %v9215_v56  ;;  %v10401_v13 = vadd.f32 %v7811_v40, %v6049_v9  ;;  %v7770_v32 = vld [vmem:[%s10718_s6 + $0x20] sm:$0xff]  ;;  %v8917_v9 = vpack.c.bf16 %v7783_v22, %v7782_v27  ;;  %v3698_v27 = vpop.xlane.xlu0 %3697 }
 0x51a   :  { %v5020_v14 = vmul.f32 %v5016_v8, %v4984_v39  ;;  %v5014_v44 = vadd.f32 1.0, %v9217_v45  ;;  %v6069_v7 = vmul.f32 %v10399_v38, %v10399_v38  ;;  %v5777_v22 = vld [vmem:[#allocation4 + $0x1f] sm:$0xf] }
 0x51b   :  { %5030 = vst.msk [vmem:[#allocation4 + $0xc] sm:$0xff] %vm1280_vm7, %v5021_v10  ;;  %v5019_v15 = vmul.f32 0.5, %v5015_v11  ;;  %v6068_v16 = vmul.f32 %v10401_v13, %v10401_v13  ;;  %v8714_v60 = vpop.f32.mrb[26].mxu0 }
 0x51c   :  { %5029 = vst.msk [vmem:[#allocation4 + $0x4] sm:$0xff] %vm1280_vm7, %v5020_v14  ;;  %v5018_v34 = vmul.f32 0.5, %v5014_v44  ;;  %v6073_v17 = vmul.f32 %v6069_v7, %v10399_v38  ;;  %v10410_v23 = vadd.f32 %v8714_v60, %v7811_v40  ;;  %v6059_v18 = vpop.f32.mrb[27].mxu0  ;;  %v7789_v60 = vld [vmem:[%s10718_s6 + $0x58] sm:$0xff] }
 0x51d   :  { %v5023_v55 = vmul.f32 %v5019_v15, %v4987_v43  ;;  %v6072_v20 = vmul.f32 %v6068_v16, %v10401_v13  ;;  %v10413_v25 = vadd.f32 %v7811_v40, %v6059_v18  ;;  %v7788_v16 = vld [vmem:[%s10718_s6 + $0x50] sm:$0xff] }
 0x51e   :  { %v5022_v19 = vmul.f32 %v5018_v34, %v4986_v47  ;;  %v6077_v28 = vmul.f32 0.044715, %v6073_v17  ;;  %v6071_v29 = vmul.f32 %v10410_v23, %v10410_v23  ;;  %v8909_v47 = vpack.c.bf16 %v7771_v54, %v7770_v32 }
 0x51f   :  { %5032 = vst.msk [vmem:[#allocation4 + $0x1c] sm:$0x7] %vm1285_vm8, %v5023_v55  ;;  %v6076_v12 = vmul.f32 0.044715, %v6072_v20  ;;  %v6070_v2 = vmul.f32 %v10413_v25, %v10413_v25  ;;  %v8921_v17 = vpack.c.bf16 %v7789_v60, %v7788_v16 }
 0x520   :  { %5031 = vst.msk [vmem:[#allocation4 + $0x14] sm:$0xff] %vm1280_vm7, %v5022_v19  ;;  %v6081_v24 = vadd.f32 %v6077_v28, %v10399_v38  ;;  %v6075_v30 = vmul.f32 %v6071_v29, %v10410_v23  ;;  %v7794_v28 = vld [vmem:[%s10718_s6 + $0x60] sm:$0xff]  ;;  %v7795_v29 = vld [vmem:[%s10718_s6 + $0x68] sm:$0xff] }
 0x521   :  { %v6080_v39 = vadd.f32 %v6076_v12, %v10401_v13  ;;  %v6074_v33 = vmul.f32 %v6070_v2, %v10413_v25 }
 0x522   :  { %v6085_v41 = vmul.f32 0.7978846, %v6081_v24  ;;  %v6079_v5 = vmul.f32 0.044715, %v6075_v30 }
 0x523   :  { %v6084_v42 = vmul.f32 0.7978846, %v6080_v39  ;;  %v6078_v43 = vmul.f32 0.044715, %v6074_v33  ;;  %v5039_v36 = vld [vmem:[#allocation4 + $0x1] sm:$0xff]  ;;  %v5040_v46 = vld [vmem:[#allocation4 + $0x9] sm:$0xff] }
 0x524   :  { %9218 = vtanh.f32 %v6085_v41  ;;  %v6083_v31 = vadd.f32 %v6079_v5, %v10410_v23  ;;  %8607 = vmatprep.mubr.msk.f32.mxu1 %vm1280_vm7, %v5039_v36  ;;  %v5033_v62 = vld [vmem:[#allocation4] sm:$0xff]  ;;  %v5034_v63 = vld [vmem:[#allocation4 + $0x8] sm:$0xff]  ;;  %v8925_v5 = vpack.c.bf16 %v7795_v29, %v7794_v28 }
 0x525   :  { %9220 = vtanh.f32 %v6084_v42  ;;  %v6082_v35 = vadd.f32 %v6078_v43, %v10413_v25  ;;  %8608 = vmatmul.mubr.msk.f32.vlgmr.msra.gmra.mrb[24].mxu1 %vm1280_vm7, %v5040_v46  ;;  %v5239_v40 = vld [vmem:[#allocation4 + $0x2] sm:$0xff]  ;;  %v5240_v11 = vld [vmem:[#allocation4 + $0xa] sm:$0xff] }
 0x526   :  { %v6087_v49 = vmul.f32 0.7978846, %v6083_v31  ;;  %8908 = vmatpush3.bf16.msra.mxu1 %v10361_v58  ;;  %v8913_v58 = vpack.c.bf16 %v7777_v26, %v7776_v48  ;;  %v5346_v34 = vld [vmem:[#allocation4 + $0x3] sm:$0xff]  ;;  %v5454_v43 = vld [vmem:[#allocation4 + $0xc] sm:$0xff]  ;;  %v5456_v31 = vld [vmem:[#allocation4 + $0x1c] sm:$0xf] }
 0x527   :  { %v6086_v4 = vmul.f32 0.7978846, %v6082_v35  ;;  %v5041_v59 = vld [vmem:[#allocation4 + $0x11] sm:$0xff]  ;;  %v5042_v57 = vld [vmem:[#allocation4 + $0x19] sm:$0xf]  ;;  %8910 = vmatprep.subr.bf16.mxu1 %v8909_v47  ;;  %v5453_v30 = vld [vmem:[#allocation4 + $0x4] sm:$0xff] }
 0x528   :  { %9222 = vtanh.f32 %v6087_v49  ;;  %8610 = vmatprep.mubr.msk.f32.mxu1 %vm1280_vm7, %v5041_v59  ;;  %v5035_v50 = vld [vmem:[#allocation4 + $0x10] sm:$0xff]  ;;  %v5036_v53 = vld [vmem:[#allocation4 + $0x18] sm:$0xf]  ;;  %v7800_v35 = vld [vmem:[%s10718_s6 + $0x70] sm:$0xff] }
 0x529   :  { %9224 = vtanh.f32 %v6086_v4  ;;  %8611 = vmatmul.mubr.msk.f32.gmra.mrb[26].mxu1 %vm1280_vm7, %v5042_v57  ;;  %v5241_v44 = vld [vmem:[#allocation4 + $0x12] sm:$0xff]  ;;  %v5349_v24 = vld [vmem:[#allocation4 + $0x1b] sm:$0xf]  ;;  %v5560_v4 = vld [vmem:[#allocation4 + $0x5] sm:$0xff] }
 0x52a   :  { %8617 = vmatprep.mubr.msk.f32.mxu1 %vm1280_vm7, %v5033_v62  ;;  %v5348_v20 = vld [vmem:[#allocation4 + $0x13] sm:$0xff]  ;;  %v5563_v26 = vld [vmem:[#allocation4 + $0x1d] sm:$0xf]  ;;  %v5667_v62 = vld [vmem:[#allocation4 + $0x6] sm:$0xff] }
 0x52b   :  { %v5455_v46 = vld [vmem:[#allocation4 + $0x14] sm:$0xff] }
 0x52c   :  { %v7801_v49 = vld [vmem:[%s10718_s6 + $0x78] sm:$0xff] }
 0x52d   :  { %8618 = vmatmul.mubr.msk.f32.vlgmr.msra.gmra.mrb[24].mxu1 %vm1280_vm7, %v5034_v63  ;;  %v8929_v59 = vpack.c.bf16 %v7801_v49, %v7800_v35  ;;  %v5561_v57 = vld [vmem:[#allocation4 + $0xd] sm:$0xff]  ;;  %v5562_v48 = vld [vmem:[#allocation4 + $0x15] sm:$0xff]  ;;  %v7817_v63 = vld [vmem:[%s10722_s10 + $0x8] sm:$0xff] }
 0x52e   :  { %v9219_v0 = vpop.eup %9218  ;;  %8912 = vmatpush3.bf16.msra.mxu1 %v8909_v47  ;;  %8620 = vmatprep.mubr.msk.f32.mxu1 %vm1280_vm7, %v5035_v50  ;;  %v5669_v50 = vld [vmem:[#allocation4 + $0x16] sm:$0xff] }
 0x52f   :  { %v9221_v37 = vpop.eup %9220  ;;  %v6093_v51 = vadd.f32 1.0, %v9219_v0  ;;  %8914 = vmatprep.subr.bf16.mxu1 %v8913_v58  ;;  %v5670_v0 = vld [vmem:[#allocation4 + $0x1e] sm:$0xf] }
 0x530   :  { %v6092_v52 = vadd.f32 1.0, %v9221_v37  ;;  %v5774_v37 = vld [vmem:[#allocation4 + $0x7] sm:$0xff] }
 0x531   :  { %v6097_v21 = vmul.f32 0.5, %v6093_v51  ;;  %8621 = vmatmul.mubr.msk.f32.gmra.mrb[26].mxu1 %vm1280_vm7, %v5036_v53  ;;  %v5775_v51 = vld [vmem:[#allocation4 + $0xf] sm:$0xff]  ;;  %v5776_v53 = vld [vmem:[#allocation4 + $0x17] sm:$0xff] }
 0x532   :  { %v9223_v61 = vpop.eup %9222  ;;  %v6096_v3 = vmul.f32 0.5, %v6092_v52  ;;  %8627 = vmatprep.mubr.msk.f32.mxu1 %vm1280_vm7, %v5239_v40  ;;  %v6133_v52 = vld [vmem:[%s10722_s10] sm:$0xff]  ;;  %v3727_v40 = vpop.xlane.xlu0 %3726 }
 0x533   :  { %v9225_v1 = vpop.eup %9224  ;;  %v6101_v56 = vmul.f32 %v6097_v21, %v10399_v38  ;;  %v6095_v8 = vadd.f32 1.0, %v9223_v61 }
 0x534   :  { %v6100_v45 = vmul.f32 %v6096_v3, %v10401_v13  ;;  %v6094_v10 = vadd.f32 1.0, %v9225_v1  ;;  %v5242_v13 = vld [vmem:[#allocation4 + $0x1a] sm:$0xf]  ;;  %v7822_v3 = vld [vmem:[%s10722_s10 + $0x10] sm:$0xff] }
 0x535   :  { %6109 = vst.msk [vmem:[#allocation6 + $0xa] sm:$0xff] %vm269_vm3, %v6101_v56  ;;  %v6099_v14 = vmul.f32 0.5, %v6095_v8  ;;  %8628 = vmatmul.mubr.msk.f32.vlgmr.msra.gmra.mrb[24].mxu1 %vm1280_vm7, %v5240_v11 }
 0x536   :  { %6108 = vst.msk [vmem:[#allocation6 + $0x2] sm:$0xff] %vm269_vm3, %v6100_v45  ;;  %v6098_v7 = vmul.f32 0.5, %v6094_v10  ;;  %8916 = vmatpush3.bf16.msra.mxu1 %v8913_v58  ;;  %8630 = vmatprep.mubr.msk.f32.mxu1 %vm1280_vm7, %v5241_v44  ;;  %v5668_v58 = vld [vmem:[#allocation4 + $0xe] sm:$0xff]  ;;  %v3757_v56 = vpop.xlane.xlu0 %3756  ;;  %v3699_v10 = vrot.slane %v3698_v27, 4  ;;  %v3728_v44 = vrot.slane %v3727_v40, 4 }
 0x537   :  { %v6103_v38 = vmul.f32 %v6099_v14, %v10410_v23  ;;  %8918 = vmatprep.subr.bf16.mxu1 %v8917_v9  ;;  %v5347_v23 = vld [vmem:[#allocation4 + $0xb] sm:$0xff] }
 0x538   :  { %v6102_v15 = vmul.f32 %v6098_v7, %v10413_v25  ;;  %v3700_v14 = vadd.f32 %v3699_v10, %v3698_v27  ;;  %v3758_v7 = vrot.slane %v3757_v56, 4 }
 0x539   :  { %6111 = vst.msk [vmem:[#allocation6 + $0x1a] sm:$0x3] %vm277_vm4, %v6103_v38  ;;  %8631 = vmatmul.mubr.msk.f32.gmra.mrb[26].mxu1 %vm1280_vm7, %v5242_v13 }
 0x53a   :  { %6110 = vst.msk [vmem:[#allocation6 + $0x12] sm:$0xff] %vm269_vm3, %v6102_v15  ;;  %8637 = vmatprep.mubr.msk.f32.mxu1 %vm1280_vm7, %v5346_v34  ;;  %v3787_v11 = vpop.xlane.xlu0 %3786  ;;  %v7828_v15 = vld [vmem:[%s10722_s10 + $0x20] sm:$0xff]  ;;  %v3701_v60 = vrot.slane %v3700_v14, 2  ;;  %v3729_v34 = vadd.f32 %v3728_v44, %v3727_v40 }
 0x53c   :  { %v3702_v28 = vadd.f32 %v3701_v60, %v3700_v14  ;;  %v3730_v29 = vrot.slane %v3729_v34, 2 }
 0x53d   :  { %v6112_v18 = vld [vmem:[#allocation6] ss:$2 sm:$0xff]  ;;  %v6114_v55 = vld [vmem:[#allocation6 + $0x1] ss:$2 sm:$0xff]  ;;  %8638 = vmatmul.mubr.msk.f32.vlgmr.msra.gmra.mrb[24].mxu1 %vm1280_vm7, %v5347_v23  ;;  %v3788_v23 = vrot.slane %v3787_v11, 4 }
 0x53e   :  { %v6116_v25 = vmax.f32 %v6112_v18, %v6114_v55  ;;  %8920 = vmatpush3.bf16.msra.mxu1 %v8917_v9  ;;  %8640 = vmatprep.mubr.msk.f32.mxu1 %vm1280_vm7, %v5348_v20  ;;  %v6118_v19 = vld [vmem:[#allocation6 + $0x2] ss:$2 sm:$0xff]  ;;  %v6122_v2 = vld [vmem:[#allocation6 + $0x3] ss:$2 sm:$0xff]  ;;  %v3817_v16 = vpop.xlane.xlu0 %3816  ;;  %v57_v55 = vlaneseq }
 0x53f   :  { %8922 = vmatprep.subr.bf16.mxu1 %v8921_v17  ;;  %v7825_v9 = vld [vmem:[%s10722_s10 + $0x18] sm:$0xff] }
 0x540   :  { %v6120_v12 = vmax.f32 %v6116_v25, %v6118_v19 }
 0x541   :  { %v6113_v32 = vld [vmem:[#allocation6 + $0x10] ss:$2 sm:$0x3f]  ;;  %v6115_v54 = vld [vmem:[#allocation6 + $0x11] ss:$2 sm:$0x3f]  ;;  %8641 = vmatmul.mubr.msk.f32.gmra.mrb[26].mxu1 %vm1280_vm7, %v5349_v24 }
 0x542   :  { %v6124_v39 = vmax.f32 %v6120_v12, %v6122_v2  ;;  %v6117_v33 = vmax.f32 %v6113_v32, %v6115_v54  ;;  %8647 = vmatprep.mubr.msk.f32.mxu1 %vm1280_vm7, %v5453_v30  ;;  %v6119_v41 = vld [vmem:[#allocation6 + $0x12] ss:$2 sm:$0x3f]  ;;  %v6123_v36 = vld [vmem:[#allocation6 + $0x13] ss:$2 sm:$0x3f]  ;;  %v3789_v30 = vadd.f32 %v3788_v23, %v3787_v11 }
 0x543   :  { %v7831_v24 = vld [vmem:[%s10722_s10 + $0x28] sm:$0xff] }
 0x544   :  { %6129 = vst.msk [vmem:[#allocation7 + $0x3] sm:$0xff] %vm269_vm3, %v6124_v39  ;;  %v6121_v42 = vmax.f32 %v6117_v33, %v6119_v41  ;;  %v3818_v33 = vrot.slane %v3817_v16, 4  ;;  %v10532_v41 = vand.u32 127, %v57_v55  ;;  %v3790_v35 = vrot.slane %v3789_v30, 2 }
 0x545   :  { %8648 = vmatmul.mubr.msk.f32.vlgmr.msra.gmra.mrb[24].mxu1 %vm1280_vm7, %v5454_v43 }
 0x546   :  { %v6125_v47 = vmax.f32 %v6121_v42, %v6123_v36  ;;  %8924 = vmatpush3.bf16.msra.mxu1 %v8921_v17  ;;  %8650 = vmatprep.mubr.msk.f32.mxu1 %vm1280_vm7, %v5455_v46  ;;  %v3759_v17 = vadd.f32 %v3758_v7, %v3757_v56  ;;  %v3703_v46 = vrot.slane %v3702_v28, 1  ;;  %vm3717_vm13 = vcmp.eq.s32.totalorder %v10532_v41, 0  ;;  %v3693_v7 = vld [vmem:[%s10728_s16] sm:$0x1] }
 0x547   :  { %8926 = vmatprep.subr.bf16.mxu1 %v8925_v5  ;;  %vm3747_vm14 = vcmp.eq.s32.totalorder %v10532_v41, 1  ;;  %vm3777_vm15 = vcmp.eq.s32.totalorder %v10532_v41, 2  ;;  %vm3807_vm0 = vcmp.eq.s32.totalorder %v10532_v41, 3  ;;  %vm3837_vm1 = vcmp.eq.s32.totalorder %v10532_v41, 4  ;;  %v7838_v41 = vld [vmem:[%s10724_s12 + $0x10] sm:$0xff] }
 0x548   :  { %6130 = vst.msk [vmem:[#allocation7 + $0xb] sm:$0x3f] %vm2377_vm9, %v6125_v47  ;;  %v3760_v12 = vrot.slane %v3759_v17, 2  ;;  %v3731_v47 = vadd.f32 %v3730_v29, %v3729_v34 }
 0x549   :  { %8651 = vmatmul.mubr.msk.f32.gmra.mrb[26].mxu1 %vm1280_vm7, %v5456_v31 }
 0x54a   :  { %8657 = vmatprep.mubr.msk.f32.mxu1 %vm1280_vm7, %v5560_v4  ;;  %v3761_v31 = vadd.f32 %v3760_v12, %v3759_v17  ;;  %v10553_v17 = vsel %vm3747_vm14, 1.0, %v9268_v6 }
 0x54b   :  { %v6134_v21 = vld [vmem:[#allocation7 + $0x1] sm:$0xff] }
 0x54c   :  { %v6131_v1 = vld [vmem:[#allocation7] sm:$0xff] }
 0x54d   :  { %8658 = vmatmul.mubr.msk.f32.vlgmr.msra.gmra.mrb[24].mxu1 %vm1280_vm7, %v5561_v57  ;;  %v6299_v45 = vld [vmem:[#allocation7 + $0x2] sm:$0xff]  ;;  %v3819_v57 = vadd.f32 %v3818_v33, %v3817_v16 }
 0x54e   :  { %8928 = vmatpush3.bf16.msra.mxu1 %v8925_v5  ;;  %8660 = vmatprep.mubr.msk.f32.mxu1 %vm1280_vm7, %v5562_v48  ;;  %v6385_v13 = vld [vmem:[#allocation7 + $0x3] sm:$0xff] }
 0x54f   :  { %8930 = vmatprep.subr.bf16.mxu1 %v8929_v59  ;;  %v6135_v61 = vld [vmem:[#allocation7 + $0x9] sm:$0x3f] }
 0x550   :  { %v6132_v8 = vld [vmem:[#allocation7 + $0x8] sm:$0x3f] }
 0x551   :  { %8661 = vmatmul.mubr.msk.f32.gmra.mrb[26].mxu1 %vm1280_vm7, %v5563_v26  ;;  %v6300_v38 = vld [vmem:[#allocation7 + $0xa] sm:$0x3f] }
 0x552   :  { %8667 = vmatprep.mubr.msk.f32.mxu1 %vm1280_vm7, %v5667_v62  ;;  %v6386_v2 = vld [vmem:[#allocation7 + $0xb] sm:$0x3f] }
 0x553   :  { %v6471_v39 = vld [vmem:[#allocation7 + $0x4] sm:$0xff] }
 0x554   :  { %v6557_v40 = vld [vmem:[#allocation7 + $0x5] sm:$0xff] }
 0x555   :  { %8668 = vmatmul.mubr.msk.f32.vlgmr.msra.gmra.mrb[24].mxu1 %vm1280_vm7, %v5668_v58  ;;  %v6643_v12 = vld [vmem:[#allocation7 + $0x6] sm:$0xff] }
 0x556   :  { %8932 = vmatpush3.bf16.msra.mxu1 %v8929_v59  ;;  %8670 = vmatprep.mubr.msk.f32.mxu1 %vm1280_vm7, %v5669_v50  ;;  %v3704_v50 = vadd.f32 %v3703_v46, %v3702_v28  ;;  %v10557_v28 = vsel %vm3777_vm15, 1.0, %v9268_v6  ;;  %v10569_v46 = vsel %vm3837_vm1, 1.0, %v9268_v6 }
 0x557   :  { %8715 = vmatprep.subr.mxu1 %v7817_v63 }
 0x559   :  { %8671 = vmatmul.mubr.msk.f32.gmra.mrb[26].mxu1 %vm1280_vm7, %v5670_v0  ;;  %v3732_v0 = vrot.slane %v3731_v47, 1 }
 0x55a   :  { %8677 = vmatprep.mubr.msk.f32.mxu1 %vm1280_vm7, %v5774_v37  ;;  %v3762_v37 = vrot.slane %v3761_v31, 1 }
 0x55b   :  { %v3733_v10 = vadd.f32 %v3732_v0, %v3731_v47 }
 0x55c   :  { %v3763_v11 = vadd.f32 %v3762_v37, %v3761_v31  ;;  %v6644_v31 = vld [vmem:[#allocation7 + $0xe] sm:$0x3f] }
 0x55d   :  { %8678 = vmatmul.mubr.msk.f32.vlgmr.msra.gmra.mrb[24].mxu1 %vm1280_vm7, %v5775_v51  ;;  %v6472_v51 = vld [vmem:[#allocation7 + $0xc] sm:$0x3f] }
 0x55e   :  { %8716 = vmatpush3.msra.mxu1 %v7817_v63  ;;  %8680 = vmatprep.mubr.msk.f32.mxu1 %vm1280_vm7, %v5776_v53  ;;  %v3791_v53 = vadd.f32 %v3790_v35, %v3789_v30 }
 0x55f   :  { %8720 = vmatprep.subr.mxu1 %v6133_v52 }
 0x560   :  { %v3792_v44 = vrot.slane %v3791_v53, 1 }
 0x561   :  { %8681 = vmatmul.mubr.msk.f32.gmra.mrb[26].mxu1 %vm1280_vm7, %v5777_v22 }
 0x562   :  { %8717 = vmatprep.mubr.msk.f32.mxu1 %vm269_vm3, %v6134_v21 }
 0x565   :  { %8718 = vmatmul.mubr.msk.f32.vlgmr.msra.gmra.mrb[28].mxu1 %vm269_vm3, %v6135_v61  ;;  %v3820_v61 = vrot.slane %v3819_v57, 2 }
 0x566   :  { %8721 = vmatpush3.msra.mxu1 %v6133_v52  ;;  %8722 = vmatprep.mubr.msk.f32.mxu1 %vm269_vm3, %v6131_v1  ;;  %v7834_v52 = vld [vmem:[%s10722_s10 + $0x30] sm:$0xff]  ;;  %v10543_v1 = vsel %vm3717_vm13, 1.0, %v9268_v6 }
 0x567   :  { %8725 = vmatprep.subr.mxu1 %v7822_v3  ;;  %v3821_v16 = vadd.f32 %v3820_v61, %v3819_v57 }
 0x56d   :  { %8723 = vmatmul.mubr.msk.f32.vlgmr.msra.gmra.mrb[28].mxu1 %vm269_vm3, %v6132_v8 }
 0x56e   :  { %8726 = vmatpush3.msra.mxu1 %v7822_v3  ;;  %8727 = vmatprep.mubr.msk.f32.mxu1 %vm269_vm3, %v6299_v45 }
 0x56f   :  { %8730 = vmatprep.subr.mxu1 %v7825_v9 }
 0x575   :  { %8728 = vmatmul.mubr.msk.f32.vlgmr.msra.gmra.mrb[28].mxu1 %vm269_vm3, %v6300_v38 }
 0x576   :  { %8731 = vmatpush3.msra.mxu1 %v7825_v9  ;;  %8732 = vmatprep.mubr.msk.f32.mxu1 %vm269_vm3, %v6385_v13 }
 0x577   :  { %8735 = vmatprep.subr.mxu1 %v7828_v15 }
 0x57a   :  { %v3739_v18 = vpop.xlane.xlu1 %3738  ;;  %v3709_v20 = vpop.xlane.xlu0 %3708 }
 0x57b   :  { %v3740_v25 = vrot.slane %v3739_v18, 4  ;;  %v3710_v19 = vrot.slane %v3709_v20, 4 }
 0x57d   :  { %v3741_v32 = vadd.f32 %v3740_v25, %v3739_v18  ;;  %v3711_v54 = vadd.f32 %v3710_v19, %v3709_v20  ;;  %8733 = vmatmul.mubr.msk.f32.vlgmr.msra.gmra.mrb[28].mxu1 %vm269_vm3, %v6386_v2  ;;  %v6558_v25 = vld [vmem:[#allocation7 + $0xd] sm:$0x3f]  ;;  %v3793_v19 = vadd.f32 %v3792_v44, %v3791_v53  ;;  %v3822_v2 = vrot.slane %v3821_v16, 1 }
 0x57e   :  { %8736 = vmatpush3.msra.mxu1 %v7828_v15  ;;  %8737 = vmatprep.mubr.msk.f32.mxu1 %vm269_vm3, %v6471_v39  ;;  %v3769_v5 = vpop.xlane.xlu1 %3768 }
 0x57f   :  { %v3742_v42 = vrot.slane %v3741_v32, 2  ;;  %v3712_v43 = vrot.slane %v3711_v54, 2  ;;  %v3770_v36 = vrot.slane %v3769_v5, 4  ;;  %8740 = vmatprep.subr.mxu1 %v7831_v24 }
 0x581   :  { %v3743_v49 = vadd.f32 %v3742_v42, %v3741_v32  ;;  %v3713_v4 = vadd.f32 %v3712_v43, %v3711_v54  ;;  %v3771_v59 = vadd.f32 %v3770_v36, %v3769_v5  ;;  %v10563_v54 = vsel %vm3807_vm0, 1.0, %v9268_v6  ;;  %v7839_v6 = vld [vmem:[%s10724_s12 + $0x18] sm:$0xff] }
 0x582   :  { %v3799_v48 = vpop.xlane.xlu1 %3798  ;;  %v3823_v42 = vadd.f32 %v3822_v2, %v3821_v16  ;;  %v8957_v57 = vpack.c.bf16 %v7839_v6, %v7838_v41  ;;  %v7867_v6 = vld [vmem:[%s10726_s14 + $0x10] sm:$0xff] }
 0x583   :  { %v3744_v26 = vrot.slane %v3743_v49, 1  ;;  %v3714_v62 = vrot.slane %v3713_v4, 1  ;;  %v3772_v58 = vrot.slane %v3771_v59, 2  ;;  %v3800_v63 = vrot.slane %v3799_v48, 4 }
 0x584   :  { %8958 = vmatprep.subr.bf16.mxu0 %v8957_v57 }
 0x585   :  { %v3715_v27 = vadd.f32 %v3714_v62, %v3713_v4  ;;  %v3773_v22 = vadd.f32 %v3772_v58, %v3771_v59  ;;  %v3801_v21 = vadd.f32 %v3800_v63, %v3799_v48  ;;  %8738 = vmatmul.mubr.msk.f32.vlgmr.msra.gmra.mrb[28].mxu1 %vm269_vm3, %v6472_v51  ;;  %v3745_v3 = vadd.f32 %v3744_v26, %v3743_v49  ;;  %v6763_v48 = vld [vmem:[%s10724_s12] sm:$0xff]  ;;  %v6764_v26 = vld [vmem:[%s10724_s12 + $0x8] sm:$0xff] }
 0x586   :  { %8741 = vmatpush3.msra.mxu1 %v7831_v24  ;;  %8742 = vmatprep.mubr.msk.f32.mxu1 %vm269_vm3, %v6557_v40  ;;  %v3829_v56 = vpop.xlane.xlu1 %3828  ;;  %v10586_v62 = vpack.c.bf16 %v6764_v26, %v6763_v48  ;;  %v7806_v58 = vld [vmem:[%s10719_s7] ss:$0 sm:$0xff] }
 0x587   :  { %v3716_v8 = vadd.f32 %v3715_v27, %v3704_v50  ;;  %v3774_v9 = vrot.slane %v3773_v22, 1  ;;  %v3802_v45 = vrot.slane %v3801_v21, 2  ;;  %8745 = vmatprep.subr.mxu1 %v7834_v52  ;;  %v3830_v14 = vrot.slane %v3829_v56, 4  ;;  %8960 = vmatpush3.bf16.msra.mxu0 %v8957_v57 }
 0x588   :  { %v3746_v60 = vadd.f32 %v3745_v3, %v3733_v10  ;;  %8962 = vmatprep.subr.bf16.mxu0 %v10586_v62 }
 0x589   :  { %v3720_v38 = vmul.f32 %v10543_v1, %v3716_v8  ;;  %v3775_v15 = vadd.f32 %v3774_v9, %v3773_v22  ;;  %v3803_v13 = vadd.f32 %v3802_v45, %v3801_v21  ;;  %v3831_v34 = vadd.f32 %v3830_v14, %v3829_v56 }
 0x58a   :  { %v3750_v24 = vmul.f32 %v10553_v17, %v3746_v60 }
 0x58b   :  { %v3804_v23 = vrot.slane %v3803_v13, 1  ;;  %v3721_v18 = vadd.f32 %v3720_v38, %v3693_v7  ;;  %v3776_v55 = vadd.f32 %v3775_v15, %v3763_v11  ;;  %v3832_v20 = vrot.slane %v3831_v34, 2 }
 0x58d   :  { %v3805_v29 = vadd.f32 %v3804_v23, %v3803_v13  ;;  %8743 = vmatmul.mubr.msk.f32.vlgmr.msra.gmra.mrb[28].mxu1 %vm269_vm3, %v6558_v25  ;;  %v3833_v30 = vadd.f32 %v3832_v20, %v3831_v34  ;;  %v3780_v39 = vmul.f32 %v10557_v28, %v3776_v55  ;;  %v3751_v5 = vadd.f32 %v3750_v24, %v3721_v18 }
 0x58e   :  { %8746 = vmatpush3.msra.mxu1 %v7834_v52  ;;  %8747 = vmatprep.mubr.msk.f32.mxu1 %vm269_vm3, %v6643_v12 }
 0x58f   :  { %v3806_v32 = vadd.f32 %v3805_v29, %v3793_v19  ;;  %v3834_v33 = vrot.slane %v3833_v30, 1  ;;  %v3781_v35 = vadd.f32 %v3780_v39, %v3751_v5 }
 0x591   :  { %v3835_v43 = vadd.f32 %v3834_v33, %v3833_v30  ;;  %v3810_v36 = vmul.f32 %v10563_v54, %v3806_v32 }
 0x593   :  { %v3836_v47 = vadd.f32 %v3835_v43, %v3823_v42  ;;  %v3811_v49 = vadd.f32 %v3810_v36, %v3781_v35 }
 0x595   :  { %8748 = vmatmul.mubr.msk.f32.vlgmr.msra.gmra.mrb[28].mxu1 %vm269_vm3, %v6644_v31  ;;  %v3840_v4 = vmul.f32 %v10569_v46, %v3836_v47 }
 0x597   :  { %v3841_v59 = vadd.f32 %v3840_v4, %v3811_v49  ;;  %v7401_v4 = vld [vmem:[%s10726_s14] sm:$0xff] }
 0x599   :  { %3843 = vst.msk [vmem:[#allocation10] sm:$0x1] %vm3842_vm2, %v3841_v59  ;;  %v7865_v59 = vld [vmem:[%s10726_s14 + $0x8] sm:$0xff] }
 0x630   :  { %v8679_v63 = vpop.f32.mrb[24].mxu1 }
 0x631   :  { %v5889_v50 = vadd.f32 %v8679_v63, %v7806_v58  ;;  %v5858_v0 = vpop.f32.mrb[25].mxu1 }
 0x632   :  { %v5888_v37 = vadd.f32 %v7806_v58, %v5858_v0  ;;  %v7837_v0 = vld [vmem:[%s10723_s11] ss:$0 sm:$0xff] }
 0x633   :  { %v5893_v51 = vmul.f32 %v5889_v50, %v5889_v50 }
 0x634   :  { %v5892_v52 = vmul.f32 %v5888_v37, %v5888_v37  ;;  %v8682_v53 = vpop.f32.mrb[26].mxu1 }
 0x635   :  { %v5897_v27 = vmul.f32 %v5893_v51, %v5889_v50  ;;  %v5891_v22 = vadd.f32 %v8682_v53, %v7806_v58  ;;  %v5868_v21 = vpop.f32.mrb[27].mxu1  ;;  %v7871_v53 = vld [vmem:[%s10726_s14 + $0x20] sm:$0xff] }
 0x636   :  { %v5896_v40 = vmul.f32 %v5892_v52, %v5888_v37  ;;  %v5890_v61 = vadd.f32 %v7806_v58, %v5868_v21 }
 0x637   :  { %v5901_v3 = vmul.f32 0.044715, %v5897_v27  ;;  %v5895_v56 = vmul.f32 %v5891_v22, %v5891_v22 }
 0x638   :  { %v5900_v8 = vmul.f32 0.044715, %v5896_v40  ;;  %v5894_v9 = vmul.f32 %v5890_v61, %v5890_v61 }
 0x639   :  { %v5905_v45 = vadd.f32 %v5901_v3, %v5889_v50  ;;  %v5899_v10 = vmul.f32 %v5895_v56, %v5891_v22 }
 0x63a   :  { %v5904_v11 = vadd.f32 %v5900_v8, %v5888_v37  ;;  %v5898_v14 = vmul.f32 %v5894_v9, %v5890_v61 }
 0x63b   :  { %v5909_v44 = vmul.f32 0.7978846, %v5905_v45  ;;  %v5903_v7 = vmul.f32 0.044715, %v5899_v10 }
 0x63c   :  { %v5908_v38 = vmul.f32 0.7978846, %v5904_v11  ;;  %v5902_v15 = vmul.f32 0.044715, %v5898_v14 }
 0x63d   :  { %9226 = vtanh.f32 %v5909_v44  ;;  %v5907_v13 = vadd.f32 %v5903_v7, %v5891_v22 }
 0x63e   :  { %9228 = vtanh.f32 %v5908_v38  ;;  %v5906_v16 = vadd.f32 %v5902_v15, %v5890_v61 }
 0x63f   :  { %v5911_v60 = vmul.f32 0.7978846, %v5907_v13 }
 0x640   :  { %v5910_v34 = vmul.f32 0.7978846, %v5906_v16 }
 0x641   :  { %9230 = vtanh.f32 %v5911_v60 }
 0x642   :  { %9232 = vtanh.f32 %v5910_v34 }
 0x647   :  { %v9227_v23 = vpop.eup %9226 }
 0x648   :  { %v9229_v18 = vpop.eup %9228  ;;  %v5917_v55 = vadd.f32 1.0, %v9227_v23 }
 0x649   :  { %v5916_v20 = vadd.f32 1.0, %v9229_v18 }
 0x64a   :  { %v5921_v25 = vmul.f32 0.5, %v5917_v55 }
 0x64b   :  { %v9231_v19 = vpop.eup %9230  ;;  %v5920_v29 = vmul.f32 0.5, %v5916_v20  ;;  %v7844_v20 = vld [vmem:[%s10724_s12 + $0x20] sm:$0xff] }
 0x64c   :  { %v9233_v12 = vpop.eup %9232  ;;  %v5925_v2 = vmul.f32 %v5921_v25, %v5889_v50  ;;  %v5919_v24 = vadd.f32 1.0, %v9231_v19  ;;  %v7869_v50 = vld [vmem:[%s10726_s14 + $0x18] sm:$0xff]  ;;  %v7845_v25 = vld [vmem:[%s10724_s12 + $0x28] sm:$0xff] }
 0x64d   :  { %v5924_v30 = vmul.f32 %v5920_v29, %v5888_v37  ;;  %v5918_v32 = vadd.f32 1.0, %v9233_v12  ;;  %v8965_v12 = vpack.c.bf16 %v7845_v25, %v7844_v20  ;;  %v7868_v25 = vld [vmem:[%s10727_s15 + $0x10] sm:$0xff] }
 0x64e   :  { %5933 = vst.msk [vmem:[#allocation5 + $0xa] sm:$0xff] %vm1280_vm7, %v5925_v2  ;;  %v5923_v39 = vmul.f32 0.5, %v5919_v24  ;;  %v7848_v24 = vld [vmem:[%s10724_s12 + $0x30] sm:$0xff] }
 0x64f   :  { %5932 = vst.msk [vmem:[#allocation5 + $0x2] sm:$0xff] %vm1280_vm7, %v5924_v30  ;;  %v5922_v33 = vmul.f32 0.5, %v5918_v32  ;;  %v7849_v30 = vld [vmem:[%s10724_s12 + $0x38] sm:$0xff] }
 0x650   :  { %v5927_v5 = vmul.f32 %v5923_v39, %v5891_v22  ;;  %v8969_v32 = vpack.c.bf16 %v7849_v30, %v7848_v24  ;;  %v7872_v30 = vld [vmem:[%s10727_s15 + $0x20] sm:$0xff] }
 0x651   :  { %v5926_v42 = vmul.f32 %v5922_v33, %v5890_v61 }
 0x652   :  { %5935 = vst.msk [vmem:[#allocation5 + $0x1a] sm:$0xf] %vm2200_vm11, %v5927_v5  ;;  %v7853_v5 = vld [vmem:[%s10724_s12 + $0x48] sm:$0xff] }
 0x653   :  { %5934 = vst.msk [vmem:[#allocation5 + $0x12] sm:$0xff] %vm1280_vm7, %v5926_v42 }
 0x65a   :  { %v5936_v43 = vld [vmem:[#allocation5] ss:$4 sm:$0xff]  ;;  %v5937_v36 = vld [vmem:[#allocation5 + $0x1] ss:$4 sm:$0xff]  ;;  %v5939_v31 = vld [vmem:[#allocation5 + $0x2] ss:$4 sm:$0xff] }
 0x65b   :  { %v5938_v47 = vmax.f32 %v5936_v43, %v5937_v36  ;;  %v5941_v49 = vld [vmem:[#allocation5 + $0x3] ss:$4 sm:$0xff] }
 0x65d   :  { %v5940_v35 = vmax.f32 %v5938_v47, %v5939_v31  ;;  %v7856_v47 = vld [vmem:[%s10724_s12 + $0x50] sm:$0xff]  ;;  %v7857_v31 = vld [vmem:[%s10724_s12 + $0x58] sm:$0xff] }
 0x65f   :  { %v5942_v41 = vmax.f32 %v5940_v35, %v5941_v49  ;;  %v8977_v35 = vpack.c.bf16 %v7857_v31, %v7856_v47 }
 0x661   :  { %v7402_v57 = vmul.f32 %v7401_v4, %v5942_v41  ;;  %v7427_v48 = vmul.f32 %v7865_v59, %v5942_v41  ;;  %v7452_v63 = vmul.f32 %v7867_v6, %v5942_v41  ;;  %v7477_v51 = vmul.f32 %v7869_v50, %v5942_v41  ;;  %v7860_v59 = vld [vmem:[%s10724_s12 + $0x60] sm:$0xff] }
 0x662   :  { %v7502_v3 = vmul.f32 %v7871_v53, %v5942_v41  ;;  %v7861_v41 = vld [vmem:[%s10724_s12 + $0x68] sm:$0xff]  ;;  %v7864_v50 = vld [vmem:[%s10725_s13] ss:$0 sm:$0xff] }
 0x663   :  { %v7403_v26 = vsel %vm1280_vm7, %v7402_v57, 0.0  ;;  %v7428_v58 = vsel %vm1280_vm7, %v7427_v48, 0.0  ;;  %v7453_v37 = vsel %vm1280_vm7, %v7452_v63, 0.0  ;;  %v7478_v61 = vsel %vm1280_vm7, %v7477_v51, 0.0 }
 0x664   :  { %7404 = vadd.xlane.f32.xlu1 %v7403_v26  ;;  %7429 = vadd.xlane.f32.xlu0 %v7428_v58  ;;  %v7503_v10 = vsel %vm1280_vm7, %v7502_v3, 0.0  ;;  %v8981_v6 = vpack.c.bf16 %v7861_v41, %v7860_v59 }
 0x668   :  { %v8749_v52 = vpop.f32.mrb[28].mxu1  ;;  %7454 = vadd.xlane.f32.xlu0 %v7453_v37 }
 0x669   :  { %v6737_v27 = vadd.f32 %v8749_v52, %v7837_v0  ;;  %v6718_v22 = vpop.f32.mrb[29].mxu1 }
 0x66a   :  { %v6736_v21 = vadd.f32 %v7837_v0, %v6718_v22 }
 0x66b   :  { %v6739_v40 = vmul.f32 %v6737_v27, %v6737_v27 }
 0x66c   :  { %v6738_v56 = vmul.f32 %v6736_v21, %v6736_v21  ;;  %7479 = vadd.xlane.f32.xlu0 %v7478_v61 }
 0x66d   :  { %v6741_v8 = vmul.f32 %v6739_v40, %v6737_v27 }
 0x66e   :  { %v6740_v9 = vmul.f32 %v6738_v56, %v6736_v21 }
 0x66f   :  { %v6743_v45 = vmul.f32 0.044715, %v6741_v8 }
 0x670   :  { %v6742_v11 = vmul.f32 0.044715, %v6740_v9  ;;  %7504 = vadd.xlane.f32.xlu0 %v7503_v10 }
 0x671   :  { %v6745_v14 = vadd.f32 %v6743_v45, %v6737_v27 }
 0x672   :  { %v6744_v44 = vadd.f32 %v6742_v11, %v6736_v21 }
 0x673   :  { %v6747_v7 = vmul.f32 0.7978846, %v6745_v14 }
 0x674   :  { %v6746_v38 = vmul.f32 0.7978846, %v6744_v44 }
 0x675   :  { %9234 = vtanh.f32 %v6747_v7 }
 0x676   :  { %9236 = vtanh.f32 %v6746_v38 }
 0x67f   :  { %v9235_v15 = vpop.eup %9234 }
 0x680   :  { %v9237_v13 = vpop.eup %9236  ;;  %v6751_v16 = vadd.f32 1.0, %v9235_v15 }
 0x681   :  { %v6750_v60 = vadd.f32 1.0, %v9237_v13 }
 0x682   :  { %v6753_v34 = vmul.f32 0.5, %v6751_v16 }
 0x683   :  { %v6752_v23 = vmul.f32 0.5, %v6750_v60  ;;  %v7412_v60 = vld [vmem:[%s10727_s15] sm:$0xff] }
 0x684   :  { %v6755_v18 = vmul.f32 %v6753_v34, %v6737_v27 }
 0x685   :  { %v6754_v55 = vmul.f32 %v6752_v23, %v6736_v21  ;;  %v7866_v23 = vld [vmem:[%s10727_s15 + $0x8] sm:$0xff] }
 0x686   :  { %6760 = vst.msk [vmem:[#allocation8 + $0xb] sm:$0x3f] %vm3045_vm12, %v6755_v18 }
 0x687   :  { %6759 = vst.msk [vmem:[#allocation8 + $0x3] sm:$0xff] %vm1280_vm7, %v6754_v55 }
 0x68d   :  { %v7019_v49 = vld [vmem:[#allocation8 + $0xb] sm:$0x3f] }
 0x68e   :  { %v6765_v19 = vld [vmem:[#allocation8 + $0x1] sm:$0xff]  ;;  %v6766_v29 = vld [vmem:[#allocation8 + $0x9] sm:$0x3f] }
 0x68f   :  { %8754 = vmatprep.mubr.msk.f32.mxu0 %vm1280_vm7, %v6765_v19  ;;  %v6761_v2 = vld [vmem:[#allocation8] sm:$0xff]  ;;  %v6762_v39 = vld [vmem:[#allocation8 + $0x8] sm:$0x3f]  ;;  %v7280_v63 = vld [vmem:[#allocation8 + $0xe] sm:$0x3f] }
 0x690   :  { %8755 = vmatmul.mubr.msk.f32.vlgmr.msra.gmra.mrb[28].mxu0 %vm1280_vm7, %v6766_v29  ;;  %v6931_v33 = vld [vmem:[#allocation8 + $0x2] sm:$0xff]  ;;  %v6932_v43 = vld [vmem:[#allocation8 + $0xa] sm:$0x3f] }
 0x691   :  { %8964 = vmatpush3.bf16.msra.mxu0 %v10586_v62  ;;  %8761 = vmatprep.mubr.msk.f32.mxu0 %vm1280_vm7, %v6761_v2  ;;  %v7852_v62 = vld [vmem:[%s10724_s12 + $0x40] sm:$0xff]  ;;  %v7018_v36 = vld [vmem:[#allocation8 + $0x3] sm:$0xff]  ;;  %v7106_v57 = vld [vmem:[#allocation8 + $0xc] sm:$0x3f] }
 0x692   :  { %8966 = vmatprep.subr.bf16.mxu0 %v8965_v12  ;;  %v8973_v42 = vpack.c.bf16 %v7853_v5, %v7852_v62  ;;  %v7105_v4 = vld [vmem:[#allocation8 + $0x4] sm:$0xff]  ;;  %v7193_v26 = vld [vmem:[#allocation8 + $0xd] sm:$0x3f] }
 0x693   :  { %v7192_v48 = vld [vmem:[#allocation8 + $0x5] sm:$0xff] }
 0x694   :  { %v7279_v58 = vld [vmem:[#allocation8 + $0x6] sm:$0xff] }
 0x698   :  { %8762 = vmatmul.mubr.msk.f32.vlgmr.msra.gmra.mrb[28].mxu0 %vm1280_vm7, %v6762_v39 }
 0x699   :  { %8968 = vmatpush3.bf16.msra.mxu0 %v8965_v12  ;;  %8768 = vmatprep.mubr.msk.f32.mxu0 %vm1280_vm7, %v6931_v33  ;;  %v7870_v12 = vld [vmem:[%s10727_s15 + $0x18] sm:$0xff] }
 0x69a   :  { %8970 = vmatprep.subr.bf16.mxu0 %v8969_v32 }
 0x6a0   :  { %8769 = vmatmul.mubr.msk.f32.vlgmr.msra.gmra.mrb[28].mxu0 %vm1280_vm7, %v6932_v43 }
 0x6a1   :  { %8972 = vmatpush3.bf16.msra.mxu0 %v8969_v32  ;;  %8775 = vmatprep.mubr.msk.f32.mxu0 %vm1280_vm7, %v7018_v36 }
 0x6a2   :  { %8974 = vmatprep.subr.bf16.mxu0 %v8973_v42 }
 0x6a8   :  { %8776 = vmatmul.mubr.msk.f32.vlgmr.msra.gmra.mrb[28].mxu0 %vm1280_vm7, %v7019_v49 }
 0x6a9   :  { %8976 = vmatpush3.bf16.msra.mxu0 %v8973_v42  ;;  %8782 = vmatprep.mubr.msk.f32.mxu0 %vm1280_vm7, %v7105_v4 }
 0x6aa   :  { %8978 = vmatprep.subr.bf16.mxu0 %v8977_v35 }
 0x6b0   :  { %8783 = vmatmul.mubr.msk.f32.vlgmr.msra.gmra.mrb[28].mxu0 %vm1280_vm7, %v7106_v57 }
 0x6b1   :  { %8980 = vmatpush3.bf16.msra.mxu0 %v8977_v35  ;;  %8789 = vmatprep.mubr.msk.f32.mxu0 %vm1280_vm7, %v7192_v48 }
 0x6b2   :  { %8982 = vmatprep.subr.bf16.mxu0 %v8981_v6 }
 0x6b8   :  { %8790 = vmatmul.mubr.msk.f32.vlgmr.msra.gmra.mrb[28].mxu0 %vm1280_vm7, %v7193_v26 }
 0x6b9   :  { %8984 = vmatpush3.bf16.msra.mxu0 %v8981_v6  ;;  %8796 = vmatprep.mubr.msk.f32.mxu0 %vm1280_vm7, %v7279_v58 }
 0x6c0   :  { %8797 = vmatmul.mubr.msk.f32.vlgmr.msra.gmra.mrb[28].mxu0 %vm1280_vm7, %v7280_v63 }
 0x6f1   :  { %v7430_v62 = vpop.xlane.xlu0 %7429  ;;  %v7405_v5 = vpop.xlane.xlu1 %7404 }
 0x6f2   :  { %v7406_v43 = vrot.slane %v7405_v5, 4  ;;  %v7431_v36 = vrot.slane %v7430_v62, 4 }
 0x6f4   :  { %v7407_v31 = vadd.f32 %v7406_v43, %v7405_v5  ;;  %v7432_v59 = vadd.f32 %v7431_v36, %v7430_v62 }
 0x6f5   :  { %v7455_v42 = vpop.xlane.xlu0 %7454 }
 0x6f6   :  { %v7456_v35 = vrot.slane %v7455_v42, 4  ;;  %v7408_v57 = vrot.slane %v7407_v31, 2 }
 0x6f8   :  { %v7457_v48 = vadd.f32 %v7456_v35, %v7455_v42 }
 0x6f9   :  { %v7480_v47 = vpop.xlane.xlu0 %7479 }
 0x6fa   :  { %v7481_v41 = vrot.slane %v7480_v47, 4 }
 0x6fd   :  { %v7505_v58 = vpop.xlane.xlu0 %7504 }
 0x793   :  { %v8798_v0 = vpop.f32.mrb[28].mxu0 }
 0x794   :  { %v7374_v37 = vadd.f32 %v8798_v0, %v7864_v50  ;;  %v7355_v51 = vpop.f32.mrb[29].mxu0  ;;  %v7433_v0 = vrot.slane %v7432_v59, 2 }
 0x795   :  { %v7373_v52 = vadd.f32 %v7864_v50, %v7355_v51 }
 0x796   :  { %v7376_v53 = vmul.f32 %v7374_v37, %v7374_v37 }
 0x797   :  { %v7375_v27 = vmul.f32 %v7373_v52, %v7373_v52 }
 0x798   :  { %v7378_v22 = vmul.f32 %v7376_v53, %v7374_v37  ;;  %v7409_v53 = vadd.f32 %v7408_v57, %v7407_v31 }
 0x799   :  { %v7377_v21 = vmul.f32 %v7375_v27, %v7373_v52  ;;  %v7458_v27 = vrot.slane %v7457_v48, 2 }
 0x79a   :  { %v7380_v40 = vmul.f32 0.044715, %v7378_v22  ;;  %v7506_v22 = vrot.slane %v7505_v58, 4 }
 0x79b   :  { %v7379_v61 = vmul.f32 0.044715, %v7377_v21 }
 0x79c   :  { %v7382_v3 = vadd.f32 %v7380_v40, %v7374_v37 }
 0x79d   :  { %v7381_v56 = vadd.f32 %v7379_v61, %v7373_v52 }
 0x79e   :  { %v7384_v8 = vmul.f32 0.7978846, %v7382_v3  ;;  %v7434_v3 = vadd.f32 %v7433_v0, %v7432_v59 }
 0x79f   :  { %v7383_v9 = vmul.f32 0.7978846, %v7381_v56 }
 0x7a0   :  { %9238 = vtanh.f32 %v7384_v8 }
 0x7a1   :  { %9240 = vtanh.f32 %v7383_v9 }
 0x7aa   :  { %v9239_v45 = vpop.eup %9238 }
 0x7ab   :  { %v9241_v10 = vpop.eup %9240  ;;  %v7388_v11 = vadd.f32 1.0, %v9239_v45 }
 0x7ac   :  { %v7387_v14 = vadd.f32 1.0, %v9241_v10  ;;  %v7410_v10 = vrot.slane %v7409_v53, 1 }
 0x7ad   :  { %v7390_v44 = vmul.f32 0.5, %v7388_v11  ;;  %v7459_v11 = vadd.f32 %v7458_v27, %v7457_v48 }
 0x7ae   :  { %v7389_v7 = vmul.f32 0.5, %v7387_v14  ;;  %v7507_v14 = vadd.f32 %v7506_v22, %v7505_v58 }
 0x7af   :  { %v7392_v38 = vmul.f32 %v7390_v44, %v7374_v37  ;;  %v7482_v37 = vadd.f32 %v7481_v41, %v7480_v47 }
 0x7b0   :  { %v7391_v15 = vmul.f32 %v7389_v7, %v7373_v52 }
 0x7b1   :  { %7396 = vst.msk [vmem:[#allocation9 + $0x9] sm:$0x3f] %vm3045_vm12, %v7392_v38  ;;  %v7483_v8 = vrot.slane %v7482_v37, 2 }
 0x7b2   :  { %7395 = vst.msk [vmem:[#allocation9 + $0x1] sm:$0xff] %vm1280_vm7, %v7391_v15 }
 0x7b9   :  { %v7397_v13 = vld [vmem:[#allocation9] ss:$2 sm:$0xff]  ;;  %v7398_v16 = vld [vmem:[#allocation9 + $0x1] ss:$2 sm:$0xff] }
 0x7ba   :  { %v7399_v34 = vmax.f32 %v7397_v13, %v7398_v16  ;;  %v7435_v13 = vrot.slane %v7434_v3, 1 }
 0x7bc   :  { %v7413_v18 = vmul.f32 %v7412_v60, %v7399_v34  ;;  %v7438_v20 = vmul.f32 %v7866_v23, %v7399_v34  ;;  %v7463_v29 = vmul.f32 %v7868_v25, %v7399_v34  ;;  %v7488_v24 = vmul.f32 %v7870_v12, %v7399_v34 }
 0x7bd   :  { %v7513_v39 = vmul.f32 %v7872_v30, %v7399_v34  ;;  %v7484_v60 = vadd.f32 %v7483_v8, %v7482_v37 }
 0x7be   :  { %v7414_v55 = vsel %vm1280_vm7, %v7413_v18, 0.0  ;;  %v7439_v19 = vsel %vm1280_vm7, %v7438_v20, 0.0  ;;  %v7464_v2 = vsel %vm1280_vm7, %v7463_v29, 0.0  ;;  %v7489_v32 = vsel %vm1280_vm7, %v7488_v24, 0.0 }
 0x7bf   :  { %7415 = vadd.xlane.f32.xlu1 %v7414_v55  ;;  %v7514_v33 = vsel %vm1280_vm7, %v7513_v39, 0.0  ;;  %v7411_v18 = vadd.f32 %v7410_v10, %v7409_v53  ;;  %v7460_v55 = vrot.slane %v7459_v11, 1  ;;  %v7508_v20 = vrot.slane %v7507_v14, 2 }
 0x7c1   :  { %v7461_v62 = vadd.f32 %v7460_v55, %v7459_v11  ;;  %v7509_v5 = vadd.f32 %v7508_v20, %v7507_v14 }
 0x7c3   :  { %7440 = vadd.xlane.f32.xlu1 %v7439_v19  ;;  %v7510_v41 = vrot.slane %v7509_v5, 1 }
 0x7c7   :  { %7465 = vadd.xlane.f32.xlu1 %v7464_v2  ;;  %v7436_v2 = vadd.f32 %v7435_v13, %v7434_v3 }
 0x7cb   :  { %7490 = vadd.xlane.f32.xlu1 %v7489_v32  ;;  %v7485_v32 = vrot.slane %v7484_v60, 1 }
 0x7cf   :  { %7515 = vadd.xlane.f32.xlu1 %v7514_v33 }
 0x84c   :  { %v7416_v49 = vpop.xlane.xlu1 %7415 }
 0x84d   :  { %v7417_v4 = vrot.slane %v7416_v49, 4 }
 0x84f   :  { %v7418_v6 = vadd.f32 %v7417_v4, %v7416_v49  ;;  %v7486_v49 = vadd.f32 %v7485_v32, %v7484_v60  ;;  %v7400_v4 = vld [vmem:[%s10728_s16] sm:$0x1]  ;;  %s9242_s16 = scalar_lea.vmem %s7534_s5, 32 }
 0x850   :  { %v7441_v26 = vpop.xlane.xlu1 %7440  ;;  %p9243_p0 = scmp.ne.s32.totalorder %s7534_s5, %s9242_s16  ;;  %p9248_p2 = scmp.lt.s32.totalorder %s9242_s16, %s9242_s16 }
 0x851   :  { %v7419_v63 = vrot.slane %v7418_v6, 2  ;;  %v7442_v50 = vrot.slane %v7441_v26, 4 }
 0x852   :  { %p9249_p3 = por %p9248_p2, %p9247_p1 }
 0x853   :  { %v7420_v51 = vadd.f32 %v7419_v63, %v7418_v6  ;;  %v7443_v52 = vadd.f32 %v7442_v50, %v7441_v26  ;;  %v7511_v50 = vadd.f32 %v7510_v41, %v7509_v5 }
 0x854   :  { %v7466_v21 = vpop.xlane.xlu1 %7465  ;;  %p9250_p4 = pnand %p9249_p3, %p9243_p0 }
 0x855   :  { %v7444_v40 = vrot.slane %v7443_v52, 2  ;;  %v7467_v61 = vrot.slane %v7466_v21, 4  ;;  %v7421_v56 = vrot.slane %v7420_v51, 1 }
 0x857   :  { %v7445_v9 = vadd.f32 %v7444_v40, %v7443_v52  ;;  %v7468_v45 = vadd.f32 %v7467_v61, %v7466_v21  ;;  %v7422_v16 = vadd.f32 %v7421_v56, %v7420_v51 }
 0x858   :  { %v7491_v44 = vpop.xlane.xlu1 %7490 }
 0x859   :  { %v7446_v7 = vrot.slane %v7445_v9, 1  ;;  %v7469_v38 = vrot.slane %v7468_v45, 2  ;;  %v7492_v15 = vrot.slane %v7491_v44, 4  ;;  %v7423_v24 = vadd.f32 %v7422_v16, %v7411_v18 }
 0x85b   :  { %v7470_v34 = vadd.f32 %v7469_v38, %v7468_v45  ;;  %v7493_v23 = vadd.f32 %v7492_v15, %v7491_v44  ;;  %v7447_v25 = vadd.f32 %v7446_v7, %v7445_v9  ;;  %v7424_v47 = vmul.f32 %v10543_v1, %v7423_v24 }
 0x85c   :  { %v7516_v19 = vpop.xlane.xlu1 %7515 }
 0x85d   :  { %v7471_v29 = vrot.slane %v7470_v34, 1  ;;  %v7494_v12 = vrot.slane %v7493_v23, 2  ;;  %v7517_v30 = vrot.slane %v7516_v19, 4  ;;  %v7448_v42 = vadd.f32 %v7447_v25, %v7436_v2 }
 0x85e   :  { %v7425_v26 = vadd.f32 %v7424_v47, %v7400_v4 }
 0x85f   :  { %v7472_v39 = vadd.f32 %v7471_v29, %v7470_v34  ;;  %v7495_v33 = vadd.f32 %v7494_v12, %v7493_v23  ;;  %v7518_v43 = vadd.f32 %v7517_v30, %v7516_v19  ;;  %v7449_v6 = vmul.f32 %v10553_v17, %v7448_v42 }
 0x861   :  { %v7496_v36 = vrot.slane %v7495_v33, 1  ;;  %v7473_v31 = vadd.f32 %v7472_v39, %v7461_v62  ;;  %v7519_v35 = vrot.slane %v7518_v43, 2  ;;  %v7450_v1 = vadd.f32 %v7449_v6, %v7425_v26 }
 0x863   :  { %v7497_v59 = vadd.f32 %v7496_v36, %v7495_v33  ;;  %v7520_v57 = vadd.f32 %v7519_v35, %v7518_v43  ;;  %v7474_v58 = vmul.f32 %v10557_v28, %v7473_v31 }
 0x865   :  { %v7498_v48 = vadd.f32 %v7497_v59, %v7486_v49  ;;  %v7521_v63 = vrot.slane %v7520_v57, 1  ;;  %v7475_v52 = vadd.f32 %v7474_v58, %v7450_v1 }
 0x867   :  { %v7522_v0 = vadd.f32 %v7521_v63, %v7520_v57  ;;  %v7499_v37 = vmul.f32 %v10563_v54, %v7498_v48 }
 0x869   :  { %v7523_v51 = vadd.f32 %v7522_v0, %v7511_v50  ;;  %v7500_v53 = vadd.f32 %v7499_v37, %v7475_v52 }
 0x86b   :  { %v7524_v27 = vmul.f32 %v10569_v46, %v7523_v51 }
 0x86d   :  { %v7525_v22 = vadd.f32 %v7524_v27, %v7500_v53 }
 0x86f   :  { %7526 = vst.msk [vmem:[#allocation10 + $0x1] sm:$0x1] %vm3842_vm2, %v7525_v22 }
 0x870   :  { %9253 = shalt.err (!%p9250_p4)
}
 0x871   :  { %s9254_s20 = scalar_lea.hbm %s10729_s17, 32 }
 0x872   :  { %p9255_p5 = scmp.ne.s32.totalorder %s10729_s17, %s9254_s20  ;;  %p9258_p6 = scmp.lt.u32.totalorder %s9254_s20, %s10729_s17 }
 0x874   :  { %p9260_p7 = pnand %p9258_p6, %p9255_p5 }
 0x876   :  { %9263 = shalt.err (!%p9260_p7)
}
 0x877   :  { %7536 = dma.vmem_to_hbm [thread:$0]  %s7534_s5, 32, %s10729_s17, [#allocation11]  }
 0x878   :  { %9264 = dma.done.wait [#allocation11], 32  }
 0x879   :  { %9265 = vsyncadd [#allocation11], 4294967264 }
 0x87a   :  { %7540 = vsyncpa [#allocation11], 1 }

</bundles_post_ra>
